<compile_context>
chip_gen: v7x
topology: tpu7x:2x2x1
jax: 0.10.0
libtpu: 0.0.40
codegen_flags: <defaults>
</compile_context>

<pallas_src>
import jax
import jax.numpy as jnp
import numpy as np
from jax.experimental import pallas as pl
from jax.experimental.pallas import tpu as pltpu

INPUT = 128
HIDDEN = 128


def _lstm_recurrence_kernel(gx_ref, whh_ref, h_out_ref, h_scr, c_scr):
    """block_t timesteps of the LSTM recurrence for one batch block.

    gx_ref   : (block_t, Bb, 4*HIDDEN) f32   precomputed x_t @ W_ih^T + (b_ih + b_hh)
    whh_ref  : (HIDDEN, 4*HIDDEN)      bf16  W_hh^T (PyTorch gate order i, f, g, o)
    h_out_ref: (block_t, Bb, HIDDEN)   f32   h_t for every timestep in this chunk
    h_scr, c_scr : (Bb, HIDDEN) f32 VMEM scratch, persistent across time chunks.
    """
    t_chunk = pl.program_id(1)                       # inner, sequential ("arbitrary") axis

    @pl.when(t_chunk == 0)
    def _():                                         # fresh (h, c) at the start of each batch block
        h_scr[...] = jnp.zeros_like(h_scr)
        c_scr[...] = jnp.zeros_like(c_scr)

    block_t = gx_ref.shape[0]
    h_prev = h_scr[...]                              # (Bb, HIDDEN) f32 carried across timesteps
    c_prev = c_scr[...]

    # Fully unrolled static time loop (block_t small, static): lets the LLO scheduler
    # overlap MXU / EUP / VPU work of consecutive timesteps around the serial (h, c) chain.
    for i in range(block_t):
        gx = gx_ref[i]                               # (Bb, 4H) f32
        h_bf = h_prev.astype(jnp.bfloat16)           # bf16 MXU operand, f32 accumulate below

        # Per-gate dots read W_hh^T slices straight from VMEM (no full-weight vreg hoist,
        # which at f32 would occupy the entire 64-vreg file).  i+f share one (128,256) dot
        # and one fused sigmoid slab; g and o follow, overlapping EUP with later MXU work.
        if_pre = gx[:, : 2 * HIDDEN] + jnp.dot(
            h_bf, whh_ref[:, : 2 * HIDDEN], preferred_element_type=jnp.float32)
        if_act = jax.nn.sigmoid(if_pre)
        g_pre = gx[:, 2 * HIDDEN:3 * HIDDEN] + jnp.dot(
            h_bf, whh_ref[:, 2 * HIDDEN:3 * HIDDEN], preferred_element_type=jnp.float32)
        g_act = jnp.tanh(g_pre)
        o_pre = gx[:, 3 * HIDDEN:] + jnp.dot(
            h_bf, whh_ref[:, 3 * HIDDEN:], preferred_element_type=jnp.float32)
        o_act = jax.nn.sigmoid(o_pre)

        c_new = if_act[:, HIDDEN:] * c_prev + if_act[:, :HIDDEN] * g_act
        h_new = o_act * jnp.tanh(c_new)
        h_out_ref[i] = h_new                         # lane-dense (Bb, 128) unmasked store
        h_prev, c_prev = h_new, c_new

    h_scr[...] = h_prev
    c_scr[...] = c_prev


def lstm_fc_forward(x, w_ih, w_hh, b_ih, b_hh, w_fc, b_fc, *, block_t=16, block_b=8):
    """x: (B, T, INPUT) f32 -> (B, T, 1) f32. Matches PyTorch LSTM+Linear+sigmoid forward."""
    B, T, _ = x.shape
    b_pad = ((B + block_b - 1) // block_b) * block_b          # sublane-aligned batch blocks
    t_pad = ((T + block_t - 1) // block_t) * block_t          # pad T to a chunk multiple
    hp = jax.lax.Precision.HIGHEST

    # Time-major BEFORE the hoisted projection: transpose x (B*T*128), not gates_x (4x larger).
    x_tm = jnp.transpose(x.astype(jnp.float32), (1, 0, 2))                 # (T, B, INPUT)
    x_tm = jnp.pad(x_tm, ((0, t_pad - T), (0, b_pad - B), (0, 0)))         # (Tp, Bp, INPUT)

    # Hoisted input projection with the combined bias folded in (one big MXU matmul).
    bias = (b_ih + b_hh).astype(jnp.float32)
    gates_x = jnp.dot(x_tm.reshape(t_pad * b_pad, INPUT),
                      jnp.transpose(w_ih).astype(jnp.float32), precision=hp)
    gates_x = (gates_x + bias).reshape(t_pad, b_pad, 4 * HIDDEN)           # (Tp, Bp, 4H)

    # bf16 recurrent weight: single-pass bf16 MXU matmuls on the serial chain, half the
    # VMEM/DMA bytes; accumulation (preferred_element_type) and (h, c) state stay f32.
    whh_t = jnp.transpose(w_hh).astype(jnp.bfloat16)                       # (HIDDEN, 4H)

    hs_tm = pl.pallas_call(
        _lstm_recurrence_kernel,
        out_shape=jax.ShapeDtypeStruct((t_pad, b_pad, HIDDEN), jnp.float32),
        grid_spec=pltpu.PrefetchScalarGridSpec(
            num_scalar_prefetch=0,
            # (independent batch blocks, sequential time chunks)
            grid=(b_pad // block_b, t_pad // block_t),
            in_specs=[
                pl.BlockSpec((block_t, block_b, 4 * HIDDEN), lambda bb, tc: (tc, bb, 0)),
                # TODO(synk): pipeline_mode=pl.Buffered(1) on this loop-invariant weight would
                # drop its redundant second VMEM buffer; left at the default for portability.
                pl.BlockSpec((HIDDEN, 4 * HIDDEN), lambda bb, tc: (0, 0)),
            ],
            out_specs=pl.BlockSpec((block_t, block_b, HIDDEN), lambda bb, tc: (tc, bb, 0)),
            scratch_shapes=[
                pltpu.VMEM((block_b, HIDDEN), jnp.float32),   # h state
                pltpu.VMEM((block_b, HIDDEN), jnp.float32),   # c state
            ],
        ),
        compiler_params=pltpu.CompilerParams(
            # batch blocks are independent (-> v7x megacore split); time is a true recurrence.
            dimension_semantics=("parallel", "arbitrary")),
    )(gates_x, whh_t)

    # fc(128->1) + sigmoid applied on the time-major hidden state; only the tiny (Tp,Bp,1)
    # result is transposed back (no HBM round-trip of the full (Tp,Bp,128) tensor).
    # TODO(synk): on v6e/v7x, bf16 gates_x / hs (with batch padded to 16 for bf16 packing)
    # would halve HBM traffic; kept f32 here for numerics headroom.
    y_tm = jax.nn.sigmoid(
        jnp.dot(hs_tm.reshape(t_pad * b_pad, HIDDEN),
                jnp.transpose(w_fc).astype(jnp.float32), precision=hp)
        + b_fc).reshape(t_pad, b_pad, 1)
    return jnp.transpose(y_tm, (1, 0, 2))[:B, :T]                          # (B, T, 1)


def _reference(x, w_ih, w_hh, b_ih, b_hh, w_fc, b_fc):
    """Pure-JAX reference with PyTorch LSTM semantics (gate order i, f, g, o)."""
    B, T, _ = x.shape
    hp = jax.lax.Precision.HIGHEST
    h = jnp.zeros((B, HIDDEN), jnp.float32)
    c = jnp.zeros((B, HIDDEN), jnp.float32)

    def step(carry, x_t):
        h, c = carry
        gates = (jnp.dot(x_t, w_ih.T, precision=hp) + b_ih
                 + jnp.dot(h, w_hh.T, precision=hp) + b_hh)
        i = jax.nn.sigmoid(gates[:, 0 * HIDDEN:1 * HIDDEN])
        f = jax.nn.sigmoid(gates[:, 1 * HIDDEN:2 * HIDDEN])
        g = jnp.tanh(gates[:, 2 * HIDDEN:3 * HIDDEN])
        o = jax.nn.sigmoid(gates[:, 3 * HIDDEN:4 * HIDDEN])
        c = f * c + i * g
        h = o * jnp.tanh(c)
        return (h, c), h

    _, hs = jax.lax.scan(step, (h, c), jnp.transpose(x, (1, 0, 2)))
    hs = jnp.transpose(hs, (1, 0, 2))                                      # (B, T, HIDDEN)
    y = jnp.dot(hs.reshape(B * T, HIDDEN), w_fc.T, precision=hp) + b_fc
    return jax.nn.sigmoid(y).reshape(B, T, 1)


if __name__ == "__main__":
    key = jax.random.PRNGKey(0)
    B, T = 2, 8
    ks = jax.random.split(key, 8)

    # Deterministic parameter init (PyTorch LSTM uses U(-1/sqrt(H), 1/sqrt(H))).
    bound = 1.0 / np.sqrt(HIDDEN)
    w_ih = jax.random.uniform(ks[0], (4 * HIDDEN, INPUT), jnp.float32, -bound, bound)
    w_hh = jax.random.uniform(ks[1], (4 * HIDDEN, HIDDEN), jnp.float32, -bound, bound)
    b_ih = jax.random.uniform(ks[2], (4 * HIDDEN,), jnp.float32, -bound, bound)
    b_hh = jax.random.uniform(ks[3], (4 * HIDDEN,), jnp.float32, -bound, bound)
    w_fc = jax.random.uniform(ks[4], (1, HIDDEN), jnp.float32, -bound, bound)
    b_fc = jax.random.uniform(ks[5], (1,), jnp.float32, -bound, bound)

    x = jax.random.normal(ks[6], (B, T, INPUT), jnp.float32)

    out = lstm_fc_forward(x, w_ih, w_hh, b_ih, b_hh, w_fc, b_fc)
    out = jax.block_until_ready(out)

    ref = jax.block_until_ready(_reference(x, w_ih, w_hh, b_ih, b_hh, w_fc, b_fc))
    assert out.shape == (B, T, 1), out.shape
    # bf16 MXU operands in the recurrence (with f32 accumulation / f32 state) -> 2e-3 tol.
    np.testing.assert_allclose(np.asarray(out), np.asarray(ref), rtol=2e-3, atol=2e-3)

    print("KERNEL_OK")
</pallas_src>

<mosaic_0001>
module attributes {stable_mosaic.version = 11 : i64} {
  func.func @_lstm_recurrence_kernel(%arg0: i32, %arg1: i32, %arg2: memref<16x8x512xf32, #tpu.memory_space<vmem>>, %arg3: memref<128x512xbf16, #tpu.memory_space<vmem>>, %arg4: memref<16x8x128xf32, #tpu.memory_space<vmem>>, %arg5: memref<8x128xf32, #tpu.memory_space<vmem>>, %arg6: memref<8x128xf32, #tpu.memory_space<vmem>>) attributes {dimension_semantics = [#tpu.dimension_semantics<parallel>, #tpu.dimension_semantics<arbitrary>], iteration_bounds = array<i64: 1, 1>, scalar_prefetch = 0 : i64, scratch_operands = 2 : i64, tpu.core_type = #tpu.core_type<tc>, window_params = [{transform_indices = @transform_0, window_bounds = array<i64: 16, 8, 512>}, {pipeline_mode = #tpu.pipeline_mode<synchronous>, transform_indices = @transform_1, window_bounds = array<i64: 128, 512>}, {transform_indices = @transform_2, window_bounds = array<i64: 16, 8, 128>}]} {
    %c0_i32 = arith.constant 0 : i32
    %0 = arith.cmpi eq, %arg1, %c0_i32 : i32
    %1 = arith.extui %0 : i1 to i32
    %c0_i32_0 = arith.constant 0 : i32
    %2 = arith.cmpi ne, %1, %c0_i32_0 : i32
    scf.if %2 {
      %cst_262 = arith.constant 0.000000e+00 : f32
      %583 = vector.broadcast %cst_262 : f32 to vector<8x128xf32>
      %c0_263 = arith.constant 0 : index
      %c0_264 = arith.constant 0 : index
      %584 = vector.load %arg5[%c0_263, %c0_264] : memref<8x128xf32, #tpu.memory_space<vmem>>, vector<8x128xf32>
      tpu.vector_store %arg5[%c0_263, %c0_264], %583 {strides = array<i32>} : memref<8x128xf32, #tpu.memory_space<vmem>>, vector<8x128xf32>,
      %cst_265 = arith.constant 0.000000e+00 : f32
      %585 = vector.broadcast %cst_265 : f32 to vector<8x128xf32>
      %c0_266 = arith.constant 0 : index
      %c0_267 = arith.constant 0 : index
      %586 = vector.load %arg6[%c0_266, %c0_267] : memref<8x128xf32, #tpu.memory_space<vmem>>, vector<8x128xf32>
      tpu.vector_store %arg6[%c0_266, %c0_267], %585 {strides = array<i32>} : memref<8x128xf32, #tpu.memory_space<vmem>>, vector<8x128xf32>,
    } else {
    }
    %c0 = arith.constant 0 : index
    %c0_1 = arith.constant 0 : index
    %3 = vector.load %arg5[%c0, %c0_1] : memref<8x128xf32, #tpu.memory_space<vmem>>, vector<8x128xf32>
    %c0_2 = arith.constant 0 : index
    %c0_3 = arith.constant 0 : index
    %4 = vector.load %arg6[%c0_2, %c0_3] : memref<8x128xf32, #tpu.memory_space<vmem>>, vector<8x128xf32>
    %c0_4 = arith.constant 0 : index
    %c0_5 = arith.constant 0 : index
    %c0_6 = arith.constant 0 : index
    %5 = vector.load %arg2[%c0_4, %c0_5, %c0_6] : memref<16x8x512xf32, #tpu.memory_space<vmem>>, vector<1x8x512xf32>
    %6 = vector.shape_cast %5 : vector<1x8x512xf32> to vector<8x512xf32>
    %7 = arith.truncf %3 : vector<8x128xf32> to vector<8x128xbf16>
    %8 = vector.extract_strided_slice %6 {offsets = [0, 0], sizes = [8, 256], strides = [1, 1]} : vector<8x512xf32> to vector<8x256xf32>
    %c0_7 = arith.constant 0 : index
    %c0_8 = arith.constant 0 : index
    %9 = vector.load %arg3[%c0_7, %c0_8] : memref<128x512xbf16, #tpu.memory_space<vmem>>, vector<128x256xbf16>
    %cst = arith.constant dense<0.000000e+00> : vector<8x256xf32>
    %10 = tpu.matmul %7, %9, %cst {dimension_numbers = #tpu.dot_dimension_numbers<[1], [0], [0], [1], [0, 0, 1, 1], [], []>} : vector<8x128xbf16>, vector<128x256xbf16>, vector<8x256xf32> -> vector<8x256xf32>
    %11 = arith.addf %8, %10 : vector<8x256xf32>
    %12 = arith.negf %11 : vector<8x256xf32>
    %13 = math.exp %12 : vector<8x256xf32>
    %cst_9 = arith.constant 1.000000e+00 : f32
    %14 = vector.broadcast %cst_9 : f32 to vector<8x256xf32>
    %15 = arith.addf %14, %13 : vector<8x256xf32>
    %16 = arith.divf %14, %15 : vector<8x256xf32>
    %17 = vector.extract_strided_slice %6 {offsets = [0, 256], sizes = [8, 128], strides = [1, 1]} : vector<8x512xf32> to vector<8x128xf32>
    %c0_10 = arith.constant 0 : index
    %c256 = arith.constant 256 : index
    %18 = vector.load %arg3[%c0_10, %c256] : memref<128x512xbf16, #tpu.memory_space<vmem>>, vector<128x128xbf16>
    %cst_11 = arith.constant dense<0.000000e+00> : vector<8x128xf32>
    %19 = tpu.matmul %7, %18, %cst_11 {dimension_numbers = #tpu.dot_dimension_numbers<[1], [0], [0], [1], [0, 0, 1, 1], [], []>} : vector<8x128xbf16>, vector<128x128xbf16>, vector<8x128xf32> -> vector<8x128xf32>
    %20 = arith.addf %17, %19 : vector<8x128xf32>
    %21 = math.tanh %20 : vector<8x128xf32>
    %22 = vector.extract_strided_slice %6 {offsets = [0, 384], sizes = [8, 128], strides = [1, 1]} : vector<8x512xf32> to vector<8x128xf32>
    %c0_12 = arith.constant 0 : index
    %c384 = arith.constant 384 : index
    %23 = vector.load %arg3[%c0_12, %c384] : memref<128x512xbf16, #tpu.memory_space<vmem>>, vector<128x128xbf16>
    %cst_13 = arith.constant dense<0.000000e+00> : vector<8x128xf32>
    %24 = tpu.matmul %7, %23, %cst_13 {dimension_numbers = #tpu.dot_dimension_numbers<[1], [0], [0], [1], [0, 0, 1, 1], [], []>} : vector<8x128xbf16>, vector<128x128xbf16>, vector<8x128xf32> -> vector<8x128xf32>
    %25 = arith.addf %22, %24 : vector<8x128xf32>
    %26 = arith.negf %25 : vector<8x128xf32>
    %27 = math.exp %26 : vector<8x128xf32>
    %cst_14 = arith.constant 1.000000e+00 : f32
    %28 = vector.broadcast %cst_14 : f32 to vector<8x128xf32>
    %29 = arith.addf %28, %27 : vector<8x128xf32>
    %30 = arith.divf %28, %29 : vector<8x128xf32>
    %31 = vector.extract_strided_slice %16 {offsets = [0, 128], sizes = [8, 128], strides = [1, 1]} : vector<8x256xf32> to vector<8x128xf32>
    %32 = arith.mulf %31, %4 : vector<8x128xf32>
    %33 = vector.extract_strided_slice %16 {offsets = [0, 0], sizes = [8, 128], strides = [1, 1]} : vector<8x256xf32> to vector<8x128xf32>
    %34 = arith.mulf %33, %21 : vector<8x128xf32>
    %35 = arith.addf %32, %34 : vector<8x128xf32>
    %36 = math.tanh %35 : vector<8x128xf32>
    %37 = arith.mulf %30, %36 : vector<8x128xf32>
    %c0_15 = arith.constant 0 : index
    %c0_16 = arith.constant 0 : index
    %c0_17 = arith.constant 0 : index
    %38 = vector.load %arg4[%c0_15, %c0_16, %c0_17] : memref<16x8x128xf32, #tpu.memory_space<vmem>>, vector<1x8x128xf32>
    %39 = vector.shape_cast %38 : vector<1x8x128xf32> to vector<8x128xf32>
    %40 = vector.shape_cast %37 : vector<8x128xf32> to vector<1x8x128xf32>
    tpu.vector_store %arg4[%c0_15, %c0_16, %c0_17], %40 {strides = array<i32>} : memref<16x8x128xf32, #tpu.memory_space<vmem>>, vector<1x8x128xf32>,
    %c1 = arith.constant 1 : index
    %c0_18 = arith.constant 0 : index
    %c0_19 = arith.constant 0 : index
    %41 = vector.load %arg2[%c1, %c0_18, %c0_19] : memref<16x8x512xf32, #tpu.memory_space<vmem>>, vector<1x8x512xf32>
    %42 = vector.shape_cast %41 : vector<1x8x512xf32> to vector<8x512xf32>
    %43 = arith.truncf %37 : vector<8x128xf32> to vector<8x128xbf16>
    %44 = vector.extract_strided_slice %42 {offsets = [0, 0], sizes = [8, 256], strides = [1, 1]} : vector<8x512xf32> to vector<8x256xf32>
    %c0_20 = arith.constant 0 : index
    %c0_21 = arith.constant 0 : index
    %45 = vector.load %arg3[%c0_20, %c0_21] : memref<128x512xbf16, #tpu.memory_space<vmem>>, vector<128x256xbf16>
    %cst_22 = arith.constant dense<0.000000e+00> : vector<8x256xf32>
    %46 = tpu.matmul %43, %45, %cst_22 {dimension_numbers = #tpu.dot_dimension_numbers<[1], [0], [0], [1], [0, 0, 1, 1], [], []>} : vector<8x128xbf16>, vector<128x256xbf16>, vector<8x256xf32> -> vector<8x256xf32>
    %47 = arith.addf %44, %46 : vector<8x256xf32>
    %48 = arith.negf %47 : vector<8x256xf32>
    %49 = math.exp %48 : vector<8x256xf32>
    %cst_23 = arith.constant 1.000000e+00 : f32
    %50 = vector.broadcast %cst_23 : f32 to vector<8x256xf32>
    %51 = arith.addf %50, %49 : vector<8x256xf32>
    %52 = arith.divf %50, %51 : vector<8x256xf32>
    %53 = vector.extract_strided_slice %42 {offsets = [0, 256], sizes = [8, 128], strides = [1, 1]} : vector<8x512xf32> to vector<8x128xf32>
    %c0_24 = arith.constant 0 : index
    %c256_25 = arith.constant 256 : index
    %54 = vector.load %arg3[%c0_24, %c256_25] : memref<128x512xbf16, #tpu.memory_space<vmem>>, vector<128x128xbf16>
    %cst_26 = arith.constant dense<0.000000e+00> : vector<8x128xf32>
    %55 = tpu.matmul %43, %54, %cst_26 {dimension_numbers = #tpu.dot_dimension_numbers<[1], [0], [0], [1], [0, 0, 1, 1], [], []>} : vector<8x128xbf16>, vector<128x128xbf16>, vector<8x128xf32> -> vector<8x128xf32>
    %56 = arith.addf %53, %55 : vector<8x128xf32>
    %57 = math.tanh %56 : vector<8x128xf32>
    %58 = vector.extract_strided_slice %42 {offsets = [0, 384], sizes = [8, 128], strides = [1, 1]} : vector<8x512xf32> to vector<8x128xf32>
    %c0_27 = arith.constant 0 : index
    %c384_28 = arith.constant 384 : index
    %59 = vector.load %arg3[%c0_27, %c384_28] : memref<128x512xbf16, #tpu.memory_space<vmem>>, vector<128x128xbf16>
    %cst_29 = arith.constant dense<0.000000e+00> : vector<8x128xf32>
    %60 = tpu.matmul %43, %59, %cst_29 {dimension_numbers = #tpu.dot_dimension_numbers<[1], [0], [0], [1], [0, 0, 1, 1], [], []>} : vector<8x128xbf16>, vector<128x128xbf16>, vector<8x128xf32> -> vector<8x128xf32>
    %61 = arith.addf %58, %60 : vector<8x128xf32>
    %62 = arith.negf %61 : vector<8x128xf32>
    %63 = math.exp %62 : vector<8x128xf32>
    %cst_30 = arith.constant 1.000000e+00 : f32
    %64 = vector.broadcast %cst_30 : f32 to vector<8x128xf32>
    %65 = arith.addf %64, %63 : vector<8x128xf32>
    %66 = arith.divf %64, %65 : vector<8x128xf32>
    %67 = vector.extract_strided_slice %52 {offsets = [0, 128], sizes = [8, 128], strides = [1, 1]} : vector<8x256xf32> to vector<8x128xf32>
    %68 = arith.mulf %67, %35 : vector<8x128xf32>
    %69 = vector.extract_strided_slice %52 {offsets = [0, 0], sizes = [8, 128], strides = [1, 1]} : vector<8x256xf32> to vector<8x128xf32>
    %70 = arith.mulf %69, %57 : vector<8x128xf32>
    %71 = arith.addf %68, %70 : vector<8x128xf32>
    %72 = math.tanh %71 : vector<8x128xf32>
    %73 = arith.mulf %66, %72 : vector<8x128xf32>
    %c1_31 = arith.constant 1 : index
    %c0_32 = arith.constant 0 : index
    %c0_33 = arith.constant 0 : index
    %74 = vector.load %arg4[%c1_31, %c0_32, %c0_33] : memref<16x8x128xf32, #tpu.memory_space<vmem>>, vector<1x8x128xf32>
    %75 = vector.shape_cast %74 : vector<1x8x128xf32> to vector<8x128xf32>
    %76 = vector.shape_cast %73 : vector<8x128xf32> to vector<1x8x128xf32>
    tpu.vector_store %arg4[%c1_31, %c0_32, %c0_33], %76 {strides = array<i32>} : memref<16x8x128xf32, #tpu.memory_space<vmem>>, vector<1x8x128xf32>,
    %c2 = arith.constant 2 : index
    %c0_34 = arith.constant 0 : index
    %c0_35 = arith.constant 0 : index
    %77 = vector.load %arg2[%c2, %c0_34, %c0_35] : memref<16x8x512xf32, #tpu.memory_space<vmem>>, vector<1x8x512xf32>
    %78 = vector.shape_cast %77 : vector<1x8x512xf32> to vector<8x512xf32>
    %79 = arith.truncf %73 : vector<8x128xf32> to vector<8x128xbf16>
    %80 = vector.extract_strided_slice %78 {offsets = [0, 0], sizes = [8, 256], strides = [1, 1]} : vector<8x512xf32> to vector<8x256xf32>
    %c0_36 = arith.constant 0 : index
    %c0_37 = arith.constant 0 : index
    %81 = vector.load %arg3[%c0_36, %c0_37] : memref<128x512xbf16, #tpu.memory_space<vmem>>, vector<128x256xbf16>
    %cst_38 = arith.constant dense<0.000000e+00> : vector<8x256xf32>
    %82 = tpu.matmul %79, %81, %cst_38 {dimension_numbers = #tpu.dot_dimension_numbers<[1], [0], [0], [1], [0, 0, 1, 1], [], []>} : vector<8x128xbf16>, vector<128x256xbf16>, vector<8x256xf32> -> vector<8x256xf32>
    %83 = arith.addf %80, %82 : vector<8x256xf32>
    %84 = arith.negf %83 : vector<8x256xf32>
    %85 = math.exp %84 : vector<8x256xf32>
    %cst_39 = arith.constant 1.000000e+00 : f32
    %86 = vector.broadcast %cst_39 : f32 to vector<8x256xf32>
    %87 = arith.addf %86, %85 : vector<8x256xf32>
    %88 = arith.divf %86, %87 : vector<8x256xf32>
    %89 = vector.extract_strided_slice %78 {offsets = [0, 256], sizes = [8, 128], strides = [1, 1]} : vector<8x512xf32> to vector<8x128xf32>
    %c0_40 = arith.constant 0 : index
    %c256_41 = arith.constant 256 : index
    %90 = vector.load %arg3[%c0_40, %c256_41] : memref<128x512xbf16, #tpu.memory_space<vmem>>, vector<128x128xbf16>
    %cst_42 = arith.constant dense<0.000000e+00> : vector<8x128xf32>
    %91 = tpu.matmul %79, %90, %cst_42 {dimension_numbers = #tpu.dot_dimension_numbers<[1], [0], [0], [1], [0, 0, 1, 1], [], []>} : vector<8x128xbf16>, vector<128x128xbf16>, vector<8x128xf32> -> vector<8x128xf32>
    %92 = arith.addf %89, %91 : vector<8x128xf32>
    %93 = math.tanh %92 : vector<8x128xf32>
    %94 = vector.extract_strided_slice %78 {offsets = [0, 384], sizes = [8, 128], strides = [1, 1]} : vector<8x512xf32> to vector<8x128xf32>
    %c0_43 = arith.constant 0 : index
    %c384_44 = arith.constant 384 : index
    %95 = vector.load %arg3[%c0_43, %c384_44] : memref<128x512xbf16, #tpu.memory_space<vmem>>, vector<128x128xbf16>
    %cst_45 = arith.constant dense<0.000000e+00> : vector<8x128xf32>
    %96 = tpu.matmul %79, %95, %cst_45 {dimension_numbers = #tpu.dot_dimension_numbers<[1], [0], [0], [1], [0, 0, 1, 1], [], []>} : vector<8x128xbf16>, vector<128x128xbf16>, vector<8x128xf32> -> vector<8x128xf32>
    %97 = arith.addf %94, %96 : vector<8x128xf32>
    %98 = arith.negf %97 : vector<8x128xf32>
    %99 = math.exp %98 : vector<8x128xf32>
    %cst_46 = arith.constant 1.000000e+00 : f32
    %100 = vector.broadcast %cst_46 : f32 to vector<8x128xf32>
    %101 = arith.addf %100, %99 : vector<8x128xf32>
    %102 = arith.divf %100, %101 : vector<8x128xf32>
    %103 = vector.extract_strided_slice %88 {offsets = [0, 128], sizes = [8, 128], strides = [1, 1]} : vector<8x256xf32> to vector<8x128xf32>
    %104 = arith.mulf %103, %71 : vector<8x128xf32>
    %105 = vector.extract_strided_slice %88 {offsets = [0, 0], sizes = [8, 128], strides = [1, 1]} : vector<8x256xf32> to vector<8x128xf32>
    %106 = arith.mulf %105, %93 : vector<8x128xf32>
    %107 = arith.addf %104, %106 : vector<8x128xf32>
    %108 = math.tanh %107 : vector<8x128xf32>
    %109 = arith.mulf %102, %108 : vector<8x128xf32>
    %c2_47 = arith.constant 2 : index
    %c0_48 = arith.constant 0 : index
    %c0_49 = arith.constant 0 : index
    %110 = vector.load %arg4[%c2_47, %c0_48, %c0_49] : memref<16x8x128xf32, #tpu.memory_space<vmem>>, vector<1x8x128xf32>
    %111 = vector.shape_cast %110 : vector<1x8x128xf32> to vector<8x128xf32>
    %112 = vector.shape_cast %109 : vector<8x128xf32> to vector<1x8x128xf32>
    tpu.vector_store %arg4[%c2_47, %c0_48, %c0_49], %112 {strides = array<i32>} : memref<16x8x128xf32, #tpu.memory_space<vmem>>, vector<1x8x128xf32>,
    %c3 = arith.constant 3 : index
    %c0_50 = arith.constant 0 : index
    %c0_51 = arith.constant 0 : index
    %113 = vector.load %arg2[%c3, %c0_50, %c0_51] : memref<16x8x512xf32, #tpu.memory_space<vmem>>, vector<1x8x512xf32>
    %114 = vector.shape_cast %113 : vector<1x8x512xf32> to vector<8x512xf32>
    %115 = arith.truncf %109 : vector<8x128xf32> to vector<8x128xbf16>
    %116 = vector.extract_strided_slice %114 {offsets = [0, 0], sizes = [8, 256], strides = [1, 1]} : vector<8x512xf32> to vector<8x256xf32>
    %c0_52 = arith.constant 0 : index
    %c0_53 = arith.constant 0 : index
    %117 = vector.load %arg3[%c0_52, %c0_53] : memref<128x512xbf16, #tpu.memory_space<vmem>>, vector<128x256xbf16>
    %cst_54 = arith.constant dense<0.000000e+00> : vector<8x256xf32>
    %118 = tpu.matmul %115, %117, %cst_54 {dimension_numbers = #tpu.dot_dimension_numbers<[1], [0], [0], [1], [0, 0, 1, 1], [], []>} : vector<8x128xbf16>, vector<128x256xbf16>, vector<8x256xf32> -> vector<8x256xf32>
    %119 = arith.addf %116, %118 : vector<8x256xf32>
    %120 = arith.negf %119 : vector<8x256xf32>
    %121 = math.exp %120 : vector<8x256xf32>
    %cst_55 = arith.constant 1.000000e+00 : f32
    %122 = vector.broadcast %cst_55 : f32 to vector<8x256xf32>
    %123 = arith.addf %122, %121 : vector<8x256xf32>
    %124 = arith.divf %122, %123 : vector<8x256xf32>
    %125 = vector.extract_strided_slice %114 {offsets = [0, 256], sizes = [8, 128], strides = [1, 1]} : vector<8x512xf32> to vector<8x128xf32>
    %c0_56 = arith.constant 0 : index
    %c256_57 = arith.constant 256 : index
    %126 = vector.load %arg3[%c0_56, %c256_57] : memref<128x512xbf16, #tpu.memory_space<vmem>>, vector<128x128xbf16>
    %cst_58 = arith.constant dense<0.000000e+00> : vector<8x128xf32>
    %127 = tpu.matmul %115, %126, %cst_58 {dimension_numbers = #tpu.dot_dimension_numbers<[1], [0], [0], [1], [0, 0, 1, 1], [], []>} : vector<8x128xbf16>, vector<128x128xbf16>, vector<8x128xf32> -> vector<8x128xf32>
    %128 = arith.addf %125, %127 : vector<8x128xf32>
    %129 = math.tanh %128 : vector<8x128xf32>
    %130 = vector.extract_strided_slice %114 {offsets = [0, 384], sizes = [8, 128], strides = [1, 1]} : vector<8x512xf32> to vector<8x128xf32>
    %c0_59 = arith.constant 0 : index
    %c384_60 = arith.constant 384 : index
    %131 = vector.load %arg3[%c0_59, %c384_60] : memref<128x512xbf16, #tpu.memory_space<vmem>>, vector<128x128xbf16>
    %cst_61 = arith.constant dense<0.000000e+00> : vector<8x128xf32>
    %132 = tpu.matmul %115, %131, %cst_61 {dimension_numbers = #tpu.dot_dimension_numbers<[1], [0], [0], [1], [0, 0, 1, 1], [], []>} : vector<8x128xbf16>, vector<128x128xbf16>, vector<8x128xf32> -> vector<8x128xf32>
    %133 = arith.addf %130, %132 : vector<8x128xf32>
    %134 = arith.negf %133 : vector<8x128xf32>
    %135 = math.exp %134 : vector<8x128xf32>
    %cst_62 = arith.constant 1.000000e+00 : f32
    %136 = vector.broadcast %cst_62 : f32 to vector<8x128xf32>
    %137 = arith.addf %136, %135 : vector<8x128xf32>
    %138 = arith.divf %136, %137 : vector<8x128xf32>
    %139 = vector.extract_strided_slice %124 {offsets = [0, 128], sizes = [8, 128], strides = [1, 1]} : vector<8x256xf32> to vector<8x128xf32>
    %140 = arith.mulf %139, %107 : vector<8x128xf32>
    %141 = vector.extract_strided_slice %124 {offsets = [0, 0], sizes = [8, 128], strides = [1, 1]} : vector<8x256xf32> to vector<8x128xf32>
    %142 = arith.mulf %141, %129 : vector<8x128xf32>
    %143 = arith.addf %140, %142 : vector<8x128xf32>
    %144 = math.tanh %143 : vector<8x128xf32>
    %145 = arith.mulf %138, %144 : vector<8x128xf32>
    %c3_63 = arith.constant 3 : index
    %c0_64 = arith.constant 0 : index
    %c0_65 = arith.constant 0 : index
    %146 = vector.load %arg4[%c3_63, %c0_64, %c0_65] : memref<16x8x128xf32, #tpu.memory_space<vmem>>, vector<1x8x128xf32>
    %147 = vector.shape_cast %146 : vector<1x8x128xf32> to vector<8x128xf32>
    %148 = vector.shape_cast %145 : vector<8x128xf32> to vector<1x8x128xf32>
    tpu.vector_store %arg4[%c3_63, %c0_64, %c0_65], %148 {strides = array<i32>} : memref<16x8x128xf32, #tpu.memory_space<vmem>>, vector<1x8x128xf32>,
    %c4 = arith.constant 4 : index
    %c0_66 = arith.constant 0 : index
    %c0_67 = arith.constant 0 : index
    %149 = vector.load %arg2[%c4, %c0_66, %c0_67] : memref<16x8x512xf32, #tpu.memory_space<vmem>>, vector<1x8x512xf32>
    %150 = vector.shape_cast %149 : vector<1x8x512xf32> to vector<8x512xf32>
    %151 = arith.truncf %145 : vector<8x128xf32> to vector<8x128xbf16>
    %152 = vector.extract_strided_slice %150 {offsets = [0, 0], sizes = [8, 256], strides = [1, 1]} : vector<8x512xf32> to vector<8x256xf32>
    %c0_68 = arith.constant 0 : index
    %c0_69 = arith.constant 0 : index
    %153 = vector.load %arg3[%c0_68, %c0_69] : memref<128x512xbf16, #tpu.memory_space<vmem>>, vector<128x256xbf16>
    %cst_70 = arith.constant dense<0.000000e+00> : vector<8x256xf32>
    %154 = tpu.matmul %151, %153, %cst_70 {dimension_numbers = #tpu.dot_dimension_numbers<[1], [0], [0], [1], [0, 0, 1, 1], [], []>} : vector<8x128xbf16>, vector<128x256xbf16>, vector<8x256xf32> -> vector<8x256xf32>
    %155 = arith.addf %152, %154 : vector<8x256xf32>
    %156 = arith.negf %155 : vector<8x256xf32>
    %157 = math.exp %156 : vector<8x256xf32>
    %cst_71 = arith.constant 1.000000e+00 : f32
    %158 = vector.broadcast %cst_71 : f32 to vector<8x256xf32>
    %159 = arith.addf %158, %157 : vector<8x256xf32>
    %160 = arith.divf %158, %159 : vector<8x256xf32>
    %161 = vector.extract_strided_slice %150 {offsets = [0, 256], sizes = [8, 128], strides = [1, 1]} : vector<8x512xf32> to vector<8x128xf32>
    %c0_72 = arith.constant 0 : index
    %c256_73 = arith.constant 256 : index
    %162 = vector.load %arg3[%c0_72, %c256_73] : memref<128x512xbf16, #tpu.memory_space<vmem>>, vector<128x128xbf16>
    %cst_74 = arith.constant dense<0.000000e+00> : vector<8x128xf32>
    %163 = tpu.matmul %151, %162, %cst_74 {dimension_numbers = #tpu.dot_dimension_numbers<[1], [0], [0], [1], [0, 0, 1, 1], [], []>} : vector<8x128xbf16>, vector<128x128xbf16>, vector<8x128xf32> -> vector<8x128xf32>
    %164 = arith.addf %161, %163 : vector<8x128xf32>
    %165 = math.tanh %164 : vector<8x128xf32>
    %166 = vector.extract_strided_slice %150 {offsets = [0, 384], sizes = [8, 128], strides = [1, 1]} : vector<8x512xf32> to vector<8x128xf32>
    %c0_75 = arith.constant 0 : index
    %c384_76 = arith.constant 384 : index
    %167 = vector.load %arg3[%c0_75, %c384_76] : memref<128x512xbf16, #tpu.memory_space<vmem>>, vector<128x128xbf16>
    %cst_77 = arith.constant dense<0.000000e+00> : vector<8x128xf32>
    %168 = tpu.matmul %151, %167, %cst_77 {dimension_numbers = #tpu.dot_dimension_numbers<[1], [0], [0], [1], [0, 0, 1, 1], [], []>} : vector<8x128xbf16>, vector<128x128xbf16>, vector<8x128xf32> -> vector<8x128xf32>
    %169 = arith.addf %166, %168 : vector<8x128xf32>
    %170 = arith.negf %169 : vector<8x128xf32>
    %171 = math.exp %170 : vector<8x128xf32>
    %cst_78 = arith.constant 1.000000e+00 : f32
    %172 = vector.broadcast %cst_78 : f32 to vector<8x128xf32>
    %173 = arith.addf %172, %171 : vector<8x128xf32>
    %174 = arith.divf %172, %173 : vector<8x128xf32>
    %175 = vector.extract_strided_slice %160 {offsets = [0, 128], sizes = [8, 128], strides = [1, 1]} : vector<8x256xf32> to vector<8x128xf32>
    %176 = arith.mulf %175, %143 : vector<8x128xf32>
    %177 = vector.extract_strided_slice %160 {offsets = [0, 0], sizes = [8, 128], strides = [1, 1]} : vector<8x256xf32> to vector<8x128xf32>
    %178 = arith.mulf %177, %165 : vector<8x128xf32>
    %179 = arith.addf %176, %178 : vector<8x128xf32>
    %180 = math.tanh %179 : vector<8x128xf32>
    %181 = arith.mulf %174, %180 : vector<8x128xf32>
    %c4_79 = arith.constant 4 : index
    %c0_80 = arith.constant 0 : index
    %c0_81 = arith.constant 0 : index
    %182 = vector.load %arg4[%c4_79, %c0_80, %c0_81] : memref<16x8x128xf32, #tpu.memory_space<vmem>>, vector<1x8x128xf32>
    %183 = vector.shape_cast %182 : vector<1x8x128xf32> to vector<8x128xf32>
    %184 = vector.shape_cast %181 : vector<8x128xf32> to vector<1x8x128xf32>
    tpu.vector_store %arg4[%c4_79, %c0_80, %c0_81], %184 {strides = array<i32>} : memref<16x8x128xf32, #tpu.memory_space<vmem>>, vector<1x8x128xf32>,
    %c5 = arith.constant 5 : index
    %c0_82 = arith.constant 0 : index
    %c0_83 = arith.constant 0 : index
    %185 = vector.load %arg2[%c5, %c0_82, %c0_83] : memref<16x8x512xf32, #tpu.memory_space<vmem>>, vector<1x8x512xf32>
    %186 = vector.shape_cast %185 : vector<1x8x512xf32> to vector<8x512xf32>
    %187 = arith.truncf %181 : vector<8x128xf32> to vector<8x128xbf16>
    %188 = vector.extract_strided_slice %186 {offsets = [0, 0], sizes = [8, 256], strides = [1, 1]} : vector<8x512xf32> to vector<8x256xf32>
    %c0_84 = arith.constant 0 : index
    %c0_85 = arith.constant 0 : index
    %189 = vector.load %arg3[%c0_84, %c0_85] : memref<128x512xbf16, #tpu.memory_space<vmem>>, vector<128x256xbf16>
    %cst_86 = arith.constant dense<0.000000e+00> : vector<8x256xf32>
    %190 = tpu.matmul %187, %189, %cst_86 {dimension_numbers = #tpu.dot_dimension_numbers<[1], [0], [0], [1], [0, 0, 1, 1], [], []>} : vector<8x128xbf16>, vector<128x256xbf16>, vector<8x256xf32> -> vector<8x256xf32>
    %191 = arith.addf %188, %190 : vector<8x256xf32>
    %192 = arith.negf %191 : vector<8x256xf32>
    %193 = math.exp %192 : vector<8x256xf32>
    %cst_87 = arith.constant 1.000000e+00 : f32
    %194 = vector.broadcast %cst_87 : f32 to vector<8x256xf32>
    %195 = arith.addf %194, %193 : vector<8x256xf32>
    %196 = arith.divf %194, %195 : vector<8x256xf32>
    %197 = vector.extract_strided_slice %186 {offsets = [0, 256], sizes = [8, 128], strides = [1, 1]} : vector<8x512xf32> to vector<8x128xf32>
    %c0_88 = arith.constant 0 : index
    %c256_89 = arith.constant 256 : index
    %198 = vector.load %arg3[%c0_88, %c256_89] : memref<128x512xbf16, #tpu.memory_space<vmem>>, vector<128x128xbf16>
    %cst_90 = arith.constant dense<0.000000e+00> : vector<8x128xf32>
    %199 = tpu.matmul %187, %198, %cst_90 {dimension_numbers = #tpu.dot_dimension_numbers<[1], [0], [0], [1], [0, 0, 1, 1], [], []>} : vector<8x128xbf16>, vector<128x128xbf16>, vector<8x128xf32> -> vector<8x128xf32>
    %200 = arith.addf %197, %199 : vector<8x128xf32>
    %201 = math.tanh %200 : vector<8x128xf32>
    %202 = vector.extract_strided_slice %186 {offsets = [0, 384], sizes = [8, 128], strides = [1, 1]} : vector<8x512xf32> to vector<8x128xf32>
    %c0_91 = arith.constant 0 : index
    %c384_92 = arith.constant 384 : index
    %203 = vector.load %arg3[%c0_91, %c384_92] : memref<128x512xbf16, #tpu.memory_space<vmem>>, vector<128x128xbf16>
    %cst_93 = arith.constant dense<0.000000e+00> : vector<8x128xf32>
    %204 = tpu.matmul %187, %203, %cst_93 {dimension_numbers = #tpu.dot_dimension_numbers<[1], [0], [0], [1], [0, 0, 1, 1], [], []>} : vector<8x128xbf16>, vector<128x128xbf16>, vector<8x128xf32> -> vector<8x128xf32>
    %205 = arith.addf %202, %204 : vector<8x128xf32>
    %206 = arith.negf %205 : vector<8x128xf32>
    %207 = math.exp %206 : vector<8x128xf32>
    %cst_94 = arith.constant 1.000000e+00 : f32
    %208 = vector.broadcast %cst_94 : f32 to vector<8x128xf32>
    %209 = arith.addf %208, %207 : vector<8x128xf32>
    %210 = arith.divf %208, %209 : vector<8x128xf32>
    %211 = vector.extract_strided_slice %196 {offsets = [0, 128], sizes = [8, 128], strides = [1, 1]} : vector<8x256xf32> to vector<8x128xf32>
    %212 = arith.mulf %211, %179 : vector<8x128xf32>
    %213 = vector.extract_strided_slice %196 {offsets = [0, 0], sizes = [8, 128], strides = [1, 1]} : vector<8x256xf32> to vector<8x128xf32>
    %214 = arith.mulf %213, %201 : vector<8x128xf32>
    %215 = arith.addf %212, %214 : vector<8x128xf32>
    %216 = math.tanh %215 : vector<8x128xf32>
    %217 = arith.mulf %210, %216 : vector<8x128xf32>
    %c5_95 = arith.constant 5 : index
    %c0_96 = arith.constant 0 : index
    %c0_97 = arith.constant 0 : index
    %218 = vector.load %arg4[%c5_95, %c0_96, %c0_97] : memref<16x8x128xf32, #tpu.memory_space<vmem>>, vector<1x8x128xf32>
    %219 = vector.shape_cast %218 : vector<1x8x128xf32> to vector<8x128xf32>
    %220 = vector.shape_cast %217 : vector<8x128xf32> to vector<1x8x128xf32>
    tpu.vector_store %arg4[%c5_95, %c0_96, %c0_97], %220 {strides = array<i32>} : memref<16x8x128xf32, #tpu.memory_space<vmem>>, vector<1x8x128xf32>,
    %c6 = arith.constant 6 : index
    %c0_98 = arith.constant 0 : index
    %c0_99 = arith.constant 0 : index
    %221 = vector.load %arg2[%c6, %c0_98, %c0_99] : memref<16x8x512xf32, #tpu.memory_space<vmem>>, vector<1x8x512xf32>
    %222 = vector.shape_cast %221 : vector<1x8x512xf32> to vector<8x512xf32>
    %223 = arith.truncf %217 : vector<8x128xf32> to vector<8x128xbf16>
    %224 = vector.extract_strided_slice %222 {offsets = [0, 0], sizes = [8, 256], strides = [1, 1]} : vector<8x512xf32> to vector<8x256xf32>
    %c0_100 = arith.constant 0 : index
    %c0_101 = arith.constant 0 : index
    %225 = vector.load %arg3[%c0_100, %c0_101] : memref<128x512xbf16, #tpu.memory_space<vmem>>, vector<128x256xbf16>
    %cst_102 = arith.constant dense<0.000000e+00> : vector<8x256xf32>
    %226 = tpu.matmul %223, %225, %cst_102 {dimension_numbers = #tpu.dot_dimension_numbers<[1], [0], [0], [1], [0, 0, 1, 1], [], []>} : vector<8x128xbf16>, vector<128x256xbf16>, vector<8x256xf32> -> vector<8x256xf32>
    %227 = arith.addf %224, %226 : vector<8x256xf32>
    %228 = arith.negf %227 : vector<8x256xf32>
    %229 = math.exp %228 : vector<8x256xf32>
    %cst_103 = arith.constant 1.000000e+00 : f32
    %230 = vector.broadcast %cst_103 : f32 to vector<8x256xf32>
    %231 = arith.addf %230, %229 : vector<8x256xf32>
    %232 = arith.divf %230, %231 : vector<8x256xf32>
    %233 = vector.extract_strided_slice %222 {offsets = [0, 256], sizes = [8, 128], strides = [1, 1]} : vector<8x512xf32> to vector<8x128xf32>
    %c0_104 = arith.constant 0 : index
    %c256_105 = arith.constant 256 : index
    %234 = vector.load %arg3[%c0_104, %c256_105] : memref<128x512xbf16, #tpu.memory_space<vmem>>, vector<128x128xbf16>
    %cst_106 = arith.constant dense<0.000000e+00> : vector<8x128xf32>
    %235 = tpu.matmul %223, %234, %cst_106 {dimension_numbers = #tpu.dot_dimension_numbers<[1], [0], [0], [1], [0, 0, 1, 1], [], []>} : vector<8x128xbf16>, vector<128x128xbf16>, vector<8x128xf32> -> vector<8x128xf32>
    %236 = arith.addf %233, %235 : vector<8x128xf32>
    %237 = math.tanh %236 : vector<8x128xf32>
    %238 = vector.extract_strided_slice %222 {offsets = [0, 384], sizes = [8, 128], strides = [1, 1]} : vector<8x512xf32> to vector<8x128xf32>
    %c0_107 = arith.constant 0 : index
    %c384_108 = arith.constant 384 : index
    %239 = vector.load %arg3[%c0_107, %c384_108] : memref<128x512xbf16, #tpu.memory_space<vmem>>, vector<128x128xbf16>
    %cst_109 = arith.constant dense<0.000000e+00> : vector<8x128xf32>
    %240 = tpu.matmul %223, %239, %cst_109 {dimension_numbers = #tpu.dot_dimension_numbers<[1], [0], [0], [1], [0, 0, 1, 1], [], []>} : vector<8x128xbf16>, vector<128x128xbf16>, vector<8x128xf32> -> vector<8x128xf32>
    %241 = arith.addf %238, %240 : vector<8x128xf32>
    %242 = arith.negf %241 : vector<8x128xf32>
    %243 = math.exp %242 : vector<8x128xf32>
    %cst_110 = arith.constant 1.000000e+00 : f32
    %244 = vector.broadcast %cst_110 : f32 to vector<8x128xf32>
    %245 = arith.addf %244, %243 : vector<8x128xf32>
    %246 = arith.divf %244, %245 : vector<8x128xf32>
    %247 = vector.extract_strided_slice %232 {offsets = [0, 128], sizes = [8, 128], strides = [1, 1]} : vector<8x256xf32> to vector<8x128xf32>
    %248 = arith.mulf %247, %215 : vector<8x128xf32>
    %249 = vector.extract_strided_slice %232 {offsets = [0, 0], sizes = [8, 128], strides = [1, 1]} : vector<8x256xf32> to vector<8x128xf32>
    %250 = arith.mulf %249, %237 : vector<8x128xf32>
    %251 = arith.addf %248, %250 : vector<8x128xf32>
    %252 = math.tanh %251 : vector<8x128xf32>
    %253 = arith.mulf %246, %252 : vector<8x128xf32>
    %c6_111 = arith.constant 6 : index
    %c0_112 = arith.constant 0 : index
    %c0_113 = arith.constant 0 : index
    %254 = vector.load %arg4[%c6_111, %c0_112, %c0_113] : memref<16x8x128xf32, #tpu.memory_space<vmem>>, vector<1x8x128xf32>
    %255 = vector.shape_cast %254 : vector<1x8x128xf32> to vector<8x128xf32>
    %256 = vector.shape_cast %253 : vector<8x128xf32> to vector<1x8x128xf32>
    tpu.vector_store %arg4[%c6_111, %c0_112, %c0_113], %256 {strides = array<i32>} : memref<16x8x128xf32, #tpu.memory_space<vmem>>, vector<1x8x128xf32>,
    %c7 = arith.constant 7 : index
    %c0_114 = arith.constant 0 : index
    %c0_115 = arith.constant 0 : index
    %257 = vector.load %arg2[%c7, %c0_114, %c0_115] : memref<16x8x512xf32, #tpu.memory_space<vmem>>, vector<1x8x512xf32>
    %258 = vector.shape_cast %257 : vector<1x8x512xf32> to vector<8x512xf32>
    %259 = arith.truncf %253 : vector<8x128xf32> to vector<8x128xbf16>
    %260 = vector.extract_strided_slice %258 {offsets = [0, 0], sizes = [8, 256], strides = [1, 1]} : vector<8x512xf32> to vector<8x256xf32>
    %c0_116 = arith.constant 0 : index
    %c0_117 = arith.constant 0 : index
    %261 = vector.load %arg3[%c0_116, %c0_117] : memref<128x512xbf16, #tpu.memory_space<vmem>>, vector<128x256xbf16>
    %cst_118 = arith.constant dense<0.000000e+00> : vector<8x256xf32>
    %262 = tpu.matmul %259, %261, %cst_118 {dimension_numbers = #tpu.dot_dimension_numbers<[1], [0], [0], [1], [0, 0, 1, 1], [], []>} : vector<8x128xbf16>, vector<128x256xbf16>, vector<8x256xf32> -> vector<8x256xf32>
    %263 = arith.addf %260, %262 : vector<8x256xf32>
    %264 = arith.negf %263 : vector<8x256xf32>
    %265 = math.exp %264 : vector<8x256xf32>
    %cst_119 = arith.constant 1.000000e+00 : f32
    %266 = vector.broadcast %cst_119 : f32 to vector<8x256xf32>
    %267 = arith.addf %266, %265 : vector<8x256xf32>
    %268 = arith.divf %266, %267 : vector<8x256xf32>
    %269 = vector.extract_strided_slice %258 {offsets = [0, 256], sizes = [8, 128], strides = [1, 1]} : vector<8x512xf32> to vector<8x128xf32>
    %c0_120 = arith.constant 0 : index
    %c256_121 = arith.constant 256 : index
    %270 = vector.load %arg3[%c0_120, %c256_121] : memref<128x512xbf16, #tpu.memory_space<vmem>>, vector<128x128xbf16>
    %cst_122 = arith.constant dense<0.000000e+00> : vector<8x128xf32>
    %271 = tpu.matmul %259, %270, %cst_122 {dimension_numbers = #tpu.dot_dimension_numbers<[1], [0], [0], [1], [0, 0, 1, 1], [], []>} : vector<8x128xbf16>, vector<128x128xbf16>, vector<8x128xf32> -> vector<8x128xf32>
    %272 = arith.addf %269, %271 : vector<8x128xf32>
    %273 = math.tanh %272 : vector<8x128xf32>
    %274 = vector.extract_strided_slice %258 {offsets = [0, 384], sizes = [8, 128], strides = [1, 1]} : vector<8x512xf32> to vector<8x128xf32>
    %c0_123 = arith.constant 0 : index
    %c384_124 = arith.constant 384 : index
    %275 = vector.load %arg3[%c0_123, %c384_124] : memref<128x512xbf16, #tpu.memory_space<vmem>>, vector<128x128xbf16>
    %cst_125 = arith.constant dense<0.000000e+00> : vector<8x128xf32>
    %276 = tpu.matmul %259, %275, %cst_125 {dimension_numbers = #tpu.dot_dimension_numbers<[1], [0], [0], [1], [0, 0, 1, 1], [], []>} : vector<8x128xbf16>, vector<128x128xbf16>, vector<8x128xf32> -> vector<8x128xf32>
    %277 = arith.addf %274, %276 : vector<8x128xf32>
    %278 = arith.negf %277 : vector<8x128xf32>
    %279 = math.exp %278 : vector<8x128xf32>
    %cst_126 = arith.constant 1.000000e+00 : f32
    %280 = vector.broadcast %cst_126 : f32 to vector<8x128xf32>
    %281 = arith.addf %280, %279 : vector<8x128xf32>
    %282 = arith.divf %280, %281 : vector<8x128xf32>
    %283 = vector.extract_strided_slice %268 {offsets = [0, 128], sizes = [8, 128], strides = [1, 1]} : vector<8x256xf32> to vector<8x128xf32>
    %284 = arith.mulf %283, %251 : vector<8x128xf32>
    %285 = vector.extract_strided_slice %268 {offsets = [0, 0], sizes = [8, 128], strides = [1, 1]} : vector<8x256xf32> to vector<8x128xf32>
    %286 = arith.mulf %285, %273 : vector<8x128xf32>
    %287 = arith.addf %284, %286 : vector<8x128xf32>
    %288 = math.tanh %287 : vector<8x128xf32>
    %289 = arith.mulf %282, %288 : vector<8x128xf32>
    %c7_127 = arith.constant 7 : index
    %c0_128 = arith.constant 0 : index
    %c0_129 = arith.constant 0 : index
    %290 = vector.load %arg4[%c7_127, %c0_128, %c0_129] : memref<16x8x128xf32, #tpu.memory_space<vmem>>, vector<1x8x128xf32>
    %291 = vector.shape_cast %290 : vector<1x8x128xf32> to vector<8x128xf32>
    %292 = vector.shape_cast %289 : vector<8x128xf32> to vector<1x8x128xf32>
    tpu.vector_store %arg4[%c7_127, %c0_128, %c0_129], %292 {strides = array<i32>} : memref<16x8x128xf32, #tpu.memory_space<vmem>>, vector<1x8x128xf32>,
    %c8 = arith.constant 8 : index
    %c0_130 = arith.constant 0 : index
    %c0_131 = arith.constant 0 : index
    %293 = vector.load %arg2[%c8, %c0_130, %c0_131] : memref<16x8x512xf32, #tpu.memory_space<vmem>>, vector<1x8x512xf32>
    %294 = vector.shape_cast %293 : vector<1x8x512xf32> to vector<8x512xf32>
    %295 = arith.truncf %289 : vector<8x128xf32> to vector<8x128xbf16>
    %296 = vector.extract_strided_slice %294 {offsets = [0, 0], sizes = [8, 256], strides = [1, 1]} : vector<8x512xf32> to vector<8x256xf32>
    %c0_132 = arith.constant 0 : index
    %c0_133 = arith.constant 0 : index
    %297 = vector.load %arg3[%c0_132, %c0_133] : memref<128x512xbf16, #tpu.memory_space<vmem>>, vector<128x256xbf16>
    %cst_134 = arith.constant dense<0.000000e+00> : vector<8x256xf32>
    %298 = tpu.matmul %295, %297, %cst_134 {dimension_numbers = #tpu.dot_dimension_numbers<[1], [0], [0], [1], [0, 0, 1, 1], [], []>} : vector<8x128xbf16>, vector<128x256xbf16>, vector<8x256xf32> -> vector<8x256xf32>
    %299 = arith.addf %296, %298 : vector<8x256xf32>
    %300 = arith.negf %299 : vector<8x256xf32>
    %301 = math.exp %300 : vector<8x256xf32>
    %cst_135 = arith.constant 1.000000e+00 : f32
    %302 = vector.broadcast %cst_135 : f32 to vector<8x256xf32>
    %303 = arith.addf %302, %301 : vector<8x256xf32>
    %304 = arith.divf %302, %303 : vector<8x256xf32>
    %305 = vector.extract_strided_slice %294 {offsets = [0, 256], sizes = [8, 128], strides = [1, 1]} : vector<8x512xf32> to vector<8x128xf32>
    %c0_136 = arith.constant 0 : index
    %c256_137 = arith.constant 256 : index
    %306 = vector.load %arg3[%c0_136, %c256_137] : memref<128x512xbf16, #tpu.memory_space<vmem>>, vector<128x128xbf16>
    %cst_138 = arith.constant dense<0.000000e+00> : vector<8x128xf32>
    %307 = tpu.matmul %295, %306, %cst_138 {dimension_numbers = #tpu.dot_dimension_numbers<[1], [0], [0], [1], [0, 0, 1, 1], [], []>} : vector<8x128xbf16>, vector<128x128xbf16>, vector<8x128xf32> -> vector<8x128xf32>
    %308 = arith.addf %305, %307 : vector<8x128xf32>
    %309 = math.tanh %308 : vector<8x128xf32>
    %310 = vector.extract_strided_slice %294 {offsets = [0, 384], sizes = [8, 128], strides = [1, 1]} : vector<8x512xf32> to vector<8x128xf32>
    %c0_139 = arith.constant 0 : index
    %c384_140 = arith.constant 384 : index
    %311 = vector.load %arg3[%c0_139, %c384_140] : memref<128x512xbf16, #tpu.memory_space<vmem>>, vector<128x128xbf16>
    %cst_141 = arith.constant dense<0.000000e+00> : vector<8x128xf32>
    %312 = tpu.matmul %295, %311, %cst_141 {dimension_numbers = #tpu.dot_dimension_numbers<[1], [0], [0], [1], [0, 0, 1, 1], [], []>} : vector<8x128xbf16>, vector<128x128xbf16>, vector<8x128xf32> -> vector<8x128xf32>
    %313 = arith.addf %310, %312 : vector<8x128xf32>
    %314 = arith.negf %313 : vector<8x128xf32>
    %315 = math.exp %314 : vector<8x128xf32>
    %cst_142 = arith.constant 1.000000e+00 : f32
    %316 = vector.broadcast %cst_142 : f32 to vector<8x128xf32>
    %317 = arith.addf %316, %315 : vector<8x128xf32>
    %318 = arith.divf %316, %317 : vector<8x128xf32>
    %319 = vector.extract_strided_slice %304 {offsets = [0, 128], sizes = [8, 128], strides = [1, 1]} : vector<8x256xf32> to vector<8x128xf32>
    %320 = arith.mulf %319, %287 : vector<8x128xf32>
    %321 = vector.extract_strided_slice %304 {offsets = [0, 0], sizes = [8, 128], strides = [1, 1]} : vector<8x256xf32> to vector<8x128xf32>
    %322 = arith.mulf %321, %309 : vector<8x128xf32>
    %323 = arith.addf %320, %322 : vector<8x128xf32>
    %324 = math.tanh %323 : vector<8x128xf32>
    %325 = arith.mulf %318, %324 : vector<8x128xf32>
    %c8_143 = arith.constant 8 : index
    %c0_144 = arith.constant 0 : index
    %c0_145 = arith.constant 0 : index
    %326 = vector.load %arg4[%c8_143, %c0_144, %c0_145] : memref<16x8x128xf32, #tpu.memory_space<vmem>>, vector<1x8x128xf32>
    %327 = vector.shape_cast %326 : vector<1x8x128xf32> to vector<8x128xf32>
    %328 = vector.shape_cast %325 : vector<8x128xf32> to vector<1x8x128xf32>
    tpu.vector_store %arg4[%c8_143, %c0_144, %c0_145], %328 {strides = array<i32>} : memref<16x8x128xf32, #tpu.memory_space<vmem>>, vector<1x8x128xf32>,
    %c9 = arith.constant 9 : index
    %c0_146 = arith.constant 0 : index
    %c0_147 = arith.constant 0 : index
    %329 = vector.load %arg2[%c9, %c0_146, %c0_147] : memref<16x8x512xf32, #tpu.memory_space<vmem>>, vector<1x8x512xf32>
    %330 = vector.shape_cast %329 : vector<1x8x512xf32> to vector<8x512xf32>
    %331 = arith.truncf %325 : vector<8x128xf32> to vector<8x128xbf16>
    %332 = vector.extract_strided_slice %330 {offsets = [0, 0], sizes = [8, 256], strides = [1, 1]} : vector<8x512xf32> to vector<8x256xf32>
    %c0_148 = arith.constant 0 : index
    %c0_149 = arith.constant 0 : index
    %333 = vector.load %arg3[%c0_148, %c0_149] : memref<128x512xbf16, #tpu.memory_space<vmem>>, vector<128x256xbf16>
    %cst_150 = arith.constant dense<0.000000e+00> : vector<8x256xf32>
    %334 = tpu.matmul %331, %333, %cst_150 {dimension_numbers = #tpu.dot_dimension_numbers<[1], [0], [0], [1], [0, 0, 1, 1], [], []>} : vector<8x128xbf16>, vector<128x256xbf16>, vector<8x256xf32> -> vector<8x256xf32>
    %335 = arith.addf %332, %334 : vector<8x256xf32>
    %336 = arith.negf %335 : vector<8x256xf32>
    %337 = math.exp %336 : vector<8x256xf32>
    %cst_151 = arith.constant 1.000000e+00 : f32
    %338 = vector.broadcast %cst_151 : f32 to vector<8x256xf32>
    %339 = arith.addf %338, %337 : vector<8x256xf32>
    %340 = arith.divf %338, %339 : vector<8x256xf32>
    %341 = vector.extract_strided_slice %330 {offsets = [0, 256], sizes = [8, 128], strides = [1, 1]} : vector<8x512xf32> to vector<8x128xf32>
    %c0_152 = arith.constant 0 : index
    %c256_153 = arith.constant 256 : index
    %342 = vector.load %arg3[%c0_152, %c256_153] : memref<128x512xbf16, #tpu.memory_space<vmem>>, vector<128x128xbf16>
    %cst_154 = arith.constant dense<0.000000e+00> : vector<8x128xf32>
    %343 = tpu.matmul %331, %342, %cst_154 {dimension_numbers = #tpu.dot_dimension_numbers<[1], [0], [0], [1], [0, 0, 1, 1], [], []>} : vector<8x128xbf16>, vector<128x128xbf16>, vector<8x128xf32> -> vector<8x128xf32>
    %344 = arith.addf %341, %343 : vector<8x128xf32>
    %345 = math.tanh %344 : vector<8x128xf32>
    %346 = vector.extract_strided_slice %330 {offsets = [0, 384], sizes = [8, 128], strides = [1, 1]} : vector<8x512xf32> to vector<8x128xf32>
    %c0_155 = arith.constant 0 : index
    %c384_156 = arith.constant 384 : index
    %347 = vector.load %arg3[%c0_155, %c384_156] : memref<128x512xbf16, #tpu.memory_space<vmem>>, vector<128x128xbf16>
    %cst_157 = arith.constant dense<0.000000e+00> : vector<8x128xf32>
    %348 = tpu.matmul %331, %347, %cst_157 {dimension_numbers = #tpu.dot_dimension_numbers<[1], [0], [0], [1], [0, 0, 1, 1], [], []>} : vector<8x128xbf16>, vector<128x128xbf16>, vector<8x128xf32> -> vector<8x128xf32>
    %349 = arith.addf %346, %348 : vector<8x128xf32>
    %350 = arith.negf %349 : vector<8x128xf32>
    %351 = math.exp %350 : vector<8x128xf32>
    %cst_158 = arith.constant 1.000000e+00 : f32
    %352 = vector.broadcast %cst_158 : f32 to vector<8x128xf32>
    %353 = arith.addf %352, %351 : vector<8x128xf32>
    %354 = arith.divf %352, %353 : vector<8x128xf32>
    %355 = vector.extract_strided_slice %340 {offsets = [0, 128], sizes = [8, 128], strides = [1, 1]} : vector<8x256xf32> to vector<8x128xf32>
    %356 = arith.mulf %355, %323 : vector<8x128xf32>
    %357 = vector.extract_strided_slice %340 {offsets = [0, 0], sizes = [8, 128], strides = [1, 1]} : vector<8x256xf32> to vector<8x128xf32>
    %358 = arith.mulf %357, %345 : vector<8x128xf32>
    %359 = arith.addf %356, %358 : vector<8x128xf32>
    %360 = math.tanh %359 : vector<8x128xf32>
    %361 = arith.mulf %354, %360 : vector<8x128xf32>
    %c9_159 = arith.constant 9 : index
    %c0_160 = arith.constant 0 : index
    %c0_161 = arith.constant 0 : index
    %362 = vector.load %arg4[%c9_159, %c0_160, %c0_161] : memref<16x8x128xf32, #tpu.memory_space<vmem>>, vector<1x8x128xf32>
    %363 = vector.shape_cast %362 : vector<1x8x128xf32> to vector<8x128xf32>
    %364 = vector.shape_cast %361 : vector<8x128xf32> to vector<1x8x128xf32>
    tpu.vector_store %arg4[%c9_159, %c0_160, %c0_161], %364 {strides = array<i32>} : memref<16x8x128xf32, #tpu.memory_space<vmem>>, vector<1x8x128xf32>,
    %c10 = arith.constant 10 : index
    %c0_162 = arith.constant 0 : index
    %c0_163 = arith.constant 0 : index
    %365 = vector.load %arg2[%c10, %c0_162, %c0_163] : memref<16x8x512xf32, #tpu.memory_space<vmem>>, vector<1x8x512xf32>
    %366 = vector.shape_cast %365 : vector<1x8x512xf32> to vector<8x512xf32>
    %367 = arith.truncf %361 : vector<8x128xf32> to vector<8x128xbf16>
    %368 = vector.extract_strided_slice %366 {offsets = [0, 0], sizes = [8, 256], strides = [1, 1]} : vector<8x512xf32> to vector<8x256xf32>
    %c0_164 = arith.constant 0 : index
    %c0_165 = arith.constant 0 : index
    %369 = vector.load %arg3[%c0_164, %c0_165] : memref<128x512xbf16, #tpu.memory_space<vmem>>, vector<128x256xbf16>
    %cst_166 = arith.constant dense<0.000000e+00> : vector<8x256xf32>
    %370 = tpu.matmul %367, %369, %cst_166 {dimension_numbers = #tpu.dot_dimension_numbers<[1], [0], [0], [1], [0, 0, 1, 1], [], []>} : vector<8x128xbf16>, vector<128x256xbf16>, vector<8x256xf32> -> vector<8x256xf32>
    %371 = arith.addf %368, %370 : vector<8x256xf32>
    %372 = arith.negf %371 : vector<8x256xf32>
    %373 = math.exp %372 : vector<8x256xf32>
    %cst_167 = arith.constant 1.000000e+00 : f32
    %374 = vector.broadcast %cst_167 : f32 to vector<8x256xf32>
    %375 = arith.addf %374, %373 : vector<8x256xf32>
    %376 = arith.divf %374, %375 : vector<8x256xf32>
    %377 = vector.extract_strided_slice %366 {offsets = [0, 256], sizes = [8, 128], strides = [1, 1]} : vector<8x512xf32> to vector<8x128xf32>
    %c0_168 = arith.constant 0 : index
    %c256_169 = arith.constant 256 : index
    %378 = vector.load %arg3[%c0_168, %c256_169] : memref<128x512xbf16, #tpu.memory_space<vmem>>, vector<128x128xbf16>
    %cst_170 = arith.constant dense<0.000000e+00> : vector<8x128xf32>
    %379 = tpu.matmul %367, %378, %cst_170 {dimension_numbers = #tpu.dot_dimension_numbers<[1], [0], [0], [1], [0, 0, 1, 1], [], []>} : vector<8x128xbf16>, vector<128x128xbf16>, vector<8x128xf32> -> vector<8x128xf32>
    %380 = arith.addf %377, %379 : vector<8x128xf32>
    %381 = math.tanh %380 : vector<8x128xf32>
    %382 = vector.extract_strided_slice %366 {offsets = [0, 384], sizes = [8, 128], strides = [1, 1]} : vector<8x512xf32> to vector<8x128xf32>
    %c0_171 = arith.constant 0 : index
    %c384_172 = arith.constant 384 : index
    %383 = vector.load %arg3[%c0_171, %c384_172] : memref<128x512xbf16, #tpu.memory_space<vmem>>, vector<128x128xbf16>
    %cst_173 = arith.constant dense<0.000000e+00> : vector<8x128xf32>
    %384 = tpu.matmul %367, %383, %cst_173 {dimension_numbers = #tpu.dot_dimension_numbers<[1], [0], [0], [1], [0, 0, 1, 1], [], []>} : vector<8x128xbf16>, vector<128x128xbf16>, vector<8x128xf32> -> vector<8x128xf32>
    %385 = arith.addf %382, %384 : vector<8x128xf32>
    %386 = arith.negf %385 : vector<8x128xf32>
    %387 = math.exp %386 : vector<8x128xf32>
    %cst_174 = arith.constant 1.000000e+00 : f32
    %388 = vector.broadcast %cst_174 : f32 to vector<8x128xf32>
    %389 = arith.addf %388, %387 : vector<8x128xf32>
    %390 = arith.divf %388, %389 : vector<8x128xf32>
    %391 = vector.extract_strided_slice %376 {offsets = [0, 128], sizes = [8, 128], strides = [1, 1]} : vector<8x256xf32> to vector<8x128xf32>
    %392 = arith.mulf %391, %359 : vector<8x128xf32>
    %393 = vector.extract_strided_slice %376 {offsets = [0, 0], sizes = [8, 128], strides = [1, 1]} : vector<8x256xf32> to vector<8x128xf32>
    %394 = arith.mulf %393, %381 : vector<8x128xf32>
    %395 = arith.addf %392, %394 : vector<8x128xf32>
    %396 = math.tanh %395 : vector<8x128xf32>
    %397 = arith.mulf %390, %396 : vector<8x128xf32>
    %c10_175 = arith.constant 10 : index
    %c0_176 = arith.constant 0 : index
    %c0_177 = arith.constant 0 : index
    %398 = vector.load %arg4[%c10_175, %c0_176, %c0_177] : memref<16x8x128xf32, #tpu.memory_space<vmem>>, vector<1x8x128xf32>
    %399 = vector.shape_cast %398 : vector<1x8x128xf32> to vector<8x128xf32>
    %400 = vector.shape_cast %397 : vector<8x128xf32> to vector<1x8x128xf32>
    tpu.vector_store %arg4[%c10_175, %c0_176, %c0_177], %400 {strides = array<i32>} : memref<16x8x128xf32, #tpu.memory_space<vmem>>, vector<1x8x128xf32>,
    %c11 = arith.constant 11 : index
    %c0_178 = arith.constant 0 : index
    %c0_179 = arith.constant 0 : index
    %401 = vector.load %arg2[%c11, %c0_178, %c0_179] : memref<16x8x512xf32, #tpu.memory_space<vmem>>, vector<1x8x512xf32>
    %402 = vector.shape_cast %401 : vector<1x8x512xf32> to vector<8x512xf32>
    %403 = arith.truncf %397 : vector<8x128xf32> to vector<8x128xbf16>
    %404 = vector.extract_strided_slice %402 {offsets = [0, 0], sizes = [8, 256], strides = [1, 1]} : vector<8x512xf32> to vector<8x256xf32>
    %c0_180 = arith.constant 0 : index
    %c0_181 = arith.constant 0 : index
    %405 = vector.load %arg3[%c0_180, %c0_181] : memref<128x512xbf16, #tpu.memory_space<vmem>>, vector<128x256xbf16>
    %cst_182 = arith.constant dense<0.000000e+00> : vector<8x256xf32>
    %406 = tpu.matmul %403, %405, %cst_182 {dimension_numbers = #tpu.dot_dimension_numbers<[1], [0], [0], [1], [0, 0, 1, 1], [], []>} : vector<8x128xbf16>, vector<128x256xbf16>, vector<8x256xf32> -> vector<8x256xf32>
    %407 = arith.addf %404, %406 : vector<8x256xf32>
    %408 = arith.negf %407 : vector<8x256xf32>
    %409 = math.exp %408 : vector<8x256xf32>
    %cst_183 = arith.constant 1.000000e+00 : f32
    %410 = vector.broadcast %cst_183 : f32 to vector<8x256xf32>
    %411 = arith.addf %410, %409 : vector<8x256xf32>
    %412 = arith.divf %410, %411 : vector<8x256xf32>
    %413 = vector.extract_strided_slice %402 {offsets = [0, 256], sizes = [8, 128], strides = [1, 1]} : vector<8x512xf32> to vector<8x128xf32>
    %c0_184 = arith.constant 0 : index
    %c256_185 = arith.constant 256 : index
    %414 = vector.load %arg3[%c0_184, %c256_185] : memref<128x512xbf16, #tpu.memory_space<vmem>>, vector<128x128xbf16>
    %cst_186 = arith.constant dense<0.000000e+00> : vector<8x128xf32>
    %415 = tpu.matmul %403, %414, %cst_186 {dimension_numbers = #tpu.dot_dimension_numbers<[1], [0], [0], [1], [0, 0, 1, 1], [], []>} : vector<8x128xbf16>, vector<128x128xbf16>, vector<8x128xf32> -> vector<8x128xf32>
    %416 = arith.addf %413, %415 : vector<8x128xf32>
    %417 = math.tanh %416 : vector<8x128xf32>
    %418 = vector.extract_strided_slice %402 {offsets = [0, 384], sizes = [8, 128], strides = [1, 1]} : vector<8x512xf32> to vector<8x128xf32>
    %c0_187 = arith.constant 0 : index
    %c384_188 = arith.constant 384 : index
    %419 = vector.load %arg3[%c0_187, %c384_188] : memref<128x512xbf16, #tpu.memory_space<vmem>>, vector<128x128xbf16>
    %cst_189 = arith.constant dense<0.000000e+00> : vector<8x128xf32>
    %420 = tpu.matmul %403, %419, %cst_189 {dimension_numbers = #tpu.dot_dimension_numbers<[1], [0], [0], [1], [0, 0, 1, 1], [], []>} : vector<8x128xbf16>, vector<128x128xbf16>, vector<8x128xf32> -> vector<8x128xf32>
    %421 = arith.addf %418, %420 : vector<8x128xf32>
    %422 = arith.negf %421 : vector<8x128xf32>
    %423 = math.exp %422 : vector<8x128xf32>
    %cst_190 = arith.constant 1.000000e+00 : f32
    %424 = vector.broadcast %cst_190 : f32 to vector<8x128xf32>
    %425 = arith.addf %424, %423 : vector<8x128xf32>
    %426 = arith.divf %424, %425 : vector<8x128xf32>
    %427 = vector.extract_strided_slice %412 {offsets = [0, 128], sizes = [8, 128], strides = [1, 1]} : vector<8x256xf32> to vector<8x128xf32>
    %428 = arith.mulf %427, %395 : vector<8x128xf32>
    %429 = vector.extract_strided_slice %412 {offsets = [0, 0], sizes = [8, 128], strides = [1, 1]} : vector<8x256xf32> to vector<8x128xf32>
    %430 = arith.mulf %429, %417 : vector<8x128xf32>
    %431 = arith.addf %428, %430 : vector<8x128xf32>
    %432 = math.tanh %431 : vector<8x128xf32>
    %433 = arith.mulf %426, %432 : vector<8x128xf32>
    %c11_191 = arith.constant 11 : index
    %c0_192 = arith.constant 0 : index
    %c0_193 = arith.constant 0 : index
    %434 = vector.load %arg4[%c11_191, %c0_192, %c0_193] : memref<16x8x128xf32, #tpu.memory_space<vmem>>, vector<1x8x128xf32>
    %435 = vector.shape_cast %434 : vector<1x8x128xf32> to vector<8x128xf32>
    %436 = vector.shape_cast %433 : vector<8x128xf32> to vector<1x8x128xf32>
    tpu.vector_store %arg4[%c11_191, %c0_192, %c0_193], %436 {strides = array<i32>} : memref<16x8x128xf32, #tpu.memory_space<vmem>>, vector<1x8x128xf32>,
    %c12 = arith.constant 12 : index
    %c0_194 = arith.constant 0 : index
    %c0_195 = arith.constant 0 : index
    %437 = vector.load %arg2[%c12, %c0_194, %c0_195] : memref<16x8x512xf32, #tpu.memory_space<vmem>>, vector<1x8x512xf32>
    %438 = vector.shape_cast %437 : vector<1x8x512xf32> to vector<8x512xf32>
    %439 = arith.truncf %433 : vector<8x128xf32> to vector<8x128xbf16>
    %440 = vector.extract_strided_slice %438 {offsets = [0, 0], sizes = [8, 256], strides = [1, 1]} : vector<8x512xf32> to vector<8x256xf32>
    %c0_196 = arith.constant 0 : index
    %c0_197 = arith.constant 0 : index
    %441 = vector.load %arg3[%c0_196, %c0_197] : memref<128x512xbf16, #tpu.memory_space<vmem>>, vector<128x256xbf16>
    %cst_198 = arith.constant dense<0.000000e+00> : vector<8x256xf32>
    %442 = tpu.matmul %439, %441, %cst_198 {dimension_numbers = #tpu.dot_dimension_numbers<[1], [0], [0], [1], [0, 0, 1, 1], [], []>} : vector<8x128xbf16>, vector<128x256xbf16>, vector<8x256xf32> -> vector<8x256xf32>
    %443 = arith.addf %440, %442 : vector<8x256xf32>
    %444 = arith.negf %443 : vector<8x256xf32>
    %445 = math.exp %444 : vector<8x256xf32>
    %cst_199 = arith.constant 1.000000e+00 : f32
    %446 = vector.broadcast %cst_199 : f32 to vector<8x256xf32>
    %447 = arith.addf %446, %445 : vector<8x256xf32>
    %448 = arith.divf %446, %447 : vector<8x256xf32>
    %449 = vector.extract_strided_slice %438 {offsets = [0, 256], sizes = [8, 128], strides = [1, 1]} : vector<8x512xf32> to vector<8x128xf32>
    %c0_200 = arith.constant 0 : index
    %c256_201 = arith.constant 256 : index
    %450 = vector.load %arg3[%c0_200, %c256_201] : memref<128x512xbf16, #tpu.memory_space<vmem>>, vector<128x128xbf16>
    %cst_202 = arith.constant dense<0.000000e+00> : vector<8x128xf32>
    %451 = tpu.matmul %439, %450, %cst_202 {dimension_numbers = #tpu.dot_dimension_numbers<[1], [0], [0], [1], [0, 0, 1, 1], [], []>} : vector<8x128xbf16>, vector<128x128xbf16>, vector<8x128xf32> -> vector<8x128xf32>
    %452 = arith.addf %449, %451 : vector<8x128xf32>
    %453 = math.tanh %452 : vector<8x128xf32>
    %454 = vector.extract_strided_slice %438 {offsets = [0, 384], sizes = [8, 128], strides = [1, 1]} : vector<8x512xf32> to vector<8x128xf32>
    %c0_203 = arith.constant 0 : index
    %c384_204 = arith.constant 384 : index
    %455 = vector.load %arg3[%c0_203, %c384_204] : memref<128x512xbf16, #tpu.memory_space<vmem>>, vector<128x128xbf16>
    %cst_205 = arith.constant dense<0.000000e+00> : vector<8x128xf32>
    %456 = tpu.matmul %439, %455, %cst_205 {dimension_numbers = #tpu.dot_dimension_numbers<[1], [0], [0], [1], [0, 0, 1, 1], [], []>} : vector<8x128xbf16>, vector<128x128xbf16>, vector<8x128xf32> -> vector<8x128xf32>
    %457 = arith.addf %454, %456 : vector<8x128xf32>
    %458 = arith.negf %457 : vector<8x128xf32>
    %459 = math.exp %458 : vector<8x128xf32>
    %cst_206 = arith.constant 1.000000e+00 : f32
    %460 = vector.broadcast %cst_206 : f32 to vector<8x128xf32>
    %461 = arith.addf %460, %459 : vector<8x128xf32>
    %462 = arith.divf %460, %461 : vector<8x128xf32>
    %463 = vector.extract_strided_slice %448 {offsets = [0, 128], sizes = [8, 128], strides = [1, 1]} : vector<8x256xf32> to vector<8x128xf32>
    %464 = arith.mulf %463, %431 : vector<8x128xf32>
    %465 = vector.extract_strided_slice %448 {offsets = [0, 0], sizes = [8, 128], strides = [1, 1]} : vector<8x256xf32> to vector<8x128xf32>
    %466 = arith.mulf %465, %453 : vector<8x128xf32>
    %467 = arith.addf %464, %466 : vector<8x128xf32>
    %468 = math.tanh %467 : vector<8x128xf32>
    %469 = arith.mulf %462, %468 : vector<8x128xf32>
    %c12_207 = arith.constant 12 : index
    %c0_208 = arith.constant 0 : index
    %c0_209 = arith.constant 0 : index
    %470 = vector.load %arg4[%c12_207, %c0_208, %c0_209] : memref<16x8x128xf32, #tpu.memory_space<vmem>>, vector<1x8x128xf32>
    %471 = vector.shape_cast %470 : vector<1x8x128xf32> to vector<8x128xf32>
    %472 = vector.shape_cast %469 : vector<8x128xf32> to vector<1x8x128xf32>
    tpu.vector_store %arg4[%c12_207, %c0_208, %c0_209], %472 {strides = array<i32>} : memref<16x8x128xf32, #tpu.memory_space<vmem>>, vector<1x8x128xf32>,
    %c13 = arith.constant 13 : index
    %c0_210 = arith.constant 0 : index
    %c0_211 = arith.constant 0 : index
    %473 = vector.load %arg2[%c13, %c0_210, %c0_211] : memref<16x8x512xf32, #tpu.memory_space<vmem>>, vector<1x8x512xf32>
    %474 = vector.shape_cast %473 : vector<1x8x512xf32> to vector<8x512xf32>
    %475 = arith.truncf %469 : vector<8x128xf32> to vector<8x128xbf16>
    %476 = vector.extract_strided_slice %474 {offsets = [0, 0], sizes = [8, 256], strides = [1, 1]} : vector<8x512xf32> to vector<8x256xf32>
    %c0_212 = arith.constant 0 : index
    %c0_213 = arith.constant 0 : index
    %477 = vector.load %arg3[%c0_212, %c0_213] : memref<128x512xbf16, #tpu.memory_space<vmem>>, vector<128x256xbf16>
    %cst_214 = arith.constant dense<0.000000e+00> : vector<8x256xf32>
    %478 = tpu.matmul %475, %477, %cst_214 {dimension_numbers = #tpu.dot_dimension_numbers<[1], [0], [0], [1], [0, 0, 1, 1], [], []>} : vector<8x128xbf16>, vector<128x256xbf16>, vector<8x256xf32> -> vector<8x256xf32>
    %479 = arith.addf %476, %478 : vector<8x256xf32>
    %480 = arith.negf %479 : vector<8x256xf32>
    %481 = math.exp %480 : vector<8x256xf32>
    %cst_215 = arith.constant 1.000000e+00 : f32
    %482 = vector.broadcast %cst_215 : f32 to vector<8x256xf32>
    %483 = arith.addf %482, %481 : vector<8x256xf32>
    %484 = arith.divf %482, %483 : vector<8x256xf32>
    %485 = vector.extract_strided_slice %474 {offsets = [0, 256], sizes = [8, 128], strides = [1, 1]} : vector<8x512xf32> to vector<8x128xf32>
    %c0_216 = arith.constant 0 : index
    %c256_217 = arith.constant 256 : index
    %486 = vector.load %arg3[%c0_216, %c256_217] : memref<128x512xbf16, #tpu.memory_space<vmem>>, vector<128x128xbf16>
    %cst_218 = arith.constant dense<0.000000e+00> : vector<8x128xf32>
    %487 = tpu.matmul %475, %486, %cst_218 {dimension_numbers = #tpu.dot_dimension_numbers<[1], [0], [0], [1], [0, 0, 1, 1], [], []>} : vector<8x128xbf16>, vector<128x128xbf16>, vector<8x128xf32> -> vector<8x128xf32>
    %488 = arith.addf %485, %487 : vector<8x128xf32>
    %489 = math.tanh %488 : vector<8x128xf32>
    %490 = vector.extract_strided_slice %474 {offsets = [0, 384], sizes = [8, 128], strides = [1, 1]} : vector<8x512xf32> to vector<8x128xf32>
    %c0_219 = arith.constant 0 : index
    %c384_220 = arith.constant 384 : index
    %491 = vector.load %arg3[%c0_219, %c384_220] : memref<128x512xbf16, #tpu.memory_space<vmem>>, vector<128x128xbf16>
    %cst_221 = arith.constant dense<0.000000e+00> : vector<8x128xf32>
    %492 = tpu.matmul %475, %491, %cst_221 {dimension_numbers = #tpu.dot_dimension_numbers<[1], [0], [0], [1], [0, 0, 1, 1], [], []>} : vector<8x128xbf16>, vector<128x128xbf16>, vector<8x128xf32> -> vector<8x128xf32>
    %493 = arith.addf %490, %492 : vector<8x128xf32>
    %494 = arith.negf %493 : vector<8x128xf32>
    %495 = math.exp %494 : vector<8x128xf32>
    %cst_222 = arith.constant 1.000000e+00 : f32
    %496 = vector.broadcast %cst_222 : f32 to vector<8x128xf32>
    %497 = arith.addf %496, %495 : vector<8x128xf32>
    %498 = arith.divf %496, %497 : vector<8x128xf32>
    %499 = vector.extract_strided_slice %484 {offsets = [0, 128], sizes = [8, 128], strides = [1, 1]} : vector<8x256xf32> to vector<8x128xf32>
    %500 = arith.mulf %499, %467 : vector<8x128xf32>
    %501 = vector.extract_strided_slice %484 {offsets = [0, 0], sizes = [8, 128], strides = [1, 1]} : vector<8x256xf32> to vector<8x128xf32>
    %502 = arith.mulf %501, %489 : vector<8x128xf32>
    %503 = arith.addf %500, %502 : vector<8x128xf32>
    %504 = math.tanh %503 : vector<8x128xf32>
    %505 = arith.mulf %498, %504 : vector<8x128xf32>
    %c13_223 = arith.constant 13 : index
    %c0_224 = arith.constant 0 : index
    %c0_225 = arith.constant 0 : index
    %506 = vector.load %arg4[%c13_223, %c0_224, %c0_225] : memref<16x8x128xf32, #tpu.memory_space<vmem>>, vector<1x8x128xf32>
    %507 = vector.shape_cast %506 : vector<1x8x128xf32> to vector<8x128xf32>
    %508 = vector.shape_cast %505 : vector<8x128xf32> to vector<1x8x128xf32>
    tpu.vector_store %arg4[%c13_223, %c0_224, %c0_225], %508 {strides = array<i32>} : memref<16x8x128xf32, #tpu.memory_space<vmem>>, vector<1x8x128xf32>,
    %c14 = arith.constant 14 : index
    %c0_226 = arith.constant 0 : index
    %c0_227 = arith.constant 0 : index
    %509 = vector.load %arg2[%c14, %c0_226, %c0_227] : memref<16x8x512xf32, #tpu.memory_space<vmem>>, vector<1x8x512xf32>
    %510 = vector.shape_cast %509 : vector<1x8x512xf32> to vector<8x512xf32>
    %511 = arith.truncf %505 : vector<8x128xf32> to vector<8x128xbf16>
    %512 = vector.extract_strided_slice %510 {offsets = [0, 0], sizes = [8, 256], strides = [1, 1]} : vector<8x512xf32> to vector<8x256xf32>
    %c0_228 = arith.constant 0 : index
    %c0_229 = arith.constant 0 : index
    %513 = vector.load %arg3[%c0_228, %c0_229] : memref<128x512xbf16, #tpu.memory_space<vmem>>, vector<128x256xbf16>
    %cst_230 = arith.constant dense<0.000000e+00> : vector<8x256xf32>
    %514 = tpu.matmul %511, %513, %cst_230 {dimension_numbers = #tpu.dot_dimension_numbers<[1], [0], [0], [1], [0, 0, 1, 1], [], []>} : vector<8x128xbf16>, vector<128x256xbf16>, vector<8x256xf32> -> vector<8x256xf32>
    %515 = arith.addf %512, %514 : vector<8x256xf32>
    %516 = arith.negf %515 : vector<8x256xf32>
    %517 = math.exp %516 : vector<8x256xf32>
    %cst_231 = arith.constant 1.000000e+00 : f32
    %518 = vector.broadcast %cst_231 : f32 to vector<8x256xf32>
    %519 = arith.addf %518, %517 : vector<8x256xf32>
    %520 = arith.divf %518, %519 : vector<8x256xf32>
    %521 = vector.extract_strided_slice %510 {offsets = [0, 256], sizes = [8, 128], strides = [1, 1]} : vector<8x512xf32> to vector<8x128xf32>
    %c0_232 = arith.constant 0 : index
    %c256_233 = arith.constant 256 : index
    %522 = vector.load %arg3[%c0_232, %c256_233] : memref<128x512xbf16, #tpu.memory_space<vmem>>, vector<128x128xbf16>
    %cst_234 = arith.constant dense<0.000000e+00> : vector<8x128xf32>
    %523 = tpu.matmul %511, %522, %cst_234 {dimension_numbers = #tpu.dot_dimension_numbers<[1], [0], [0], [1], [0, 0, 1, 1], [], []>} : vector<8x128xbf16>, vector<128x128xbf16>, vector<8x128xf32> -> vector<8x128xf32>
    %524 = arith.addf %521, %523 : vector<8x128xf32>
    %525 = math.tanh %524 : vector<8x128xf32>
    %526 = vector.extract_strided_slice %510 {offsets = [0, 384], sizes = [8, 128], strides = [1, 1]} : vector<8x512xf32> to vector<8x128xf32>
    %c0_235 = arith.constant 0 : index
    %c384_236 = arith.constant 384 : index
    %527 = vector.load %arg3[%c0_235, %c384_236] : memref<128x512xbf16, #tpu.memory_space<vmem>>, vector<128x128xbf16>
    %cst_237 = arith.constant dense<0.000000e+00> : vector<8x128xf32>
    %528 = tpu.matmul %511, %527, %cst_237 {dimension_numbers = #tpu.dot_dimension_numbers<[1], [0], [0], [1], [0, 0, 1, 1], [], []>} : vector<8x128xbf16>, vector<128x128xbf16>, vector<8x128xf32> -> vector<8x128xf32>
    %529 = arith.addf %526, %528 : vector<8x128xf32>
    %530 = arith.negf %529 : vector<8x128xf32>
    %531 = math.exp %530 : vector<8x128xf32>
    %cst_238 = arith.constant 1.000000e+00 : f32
    %532 = vector.broadcast %cst_238 : f32 to vector<8x128xf32>
    %533 = arith.addf %532, %531 : vector<8x128xf32>
    %534 = arith.divf %532, %533 : vector<8x128xf32>
    %535 = vector.extract_strided_slice %520 {offsets = [0, 128], sizes = [8, 128], strides = [1, 1]} : vector<8x256xf32> to vector<8x128xf32>
    %536 = arith.mulf %535, %503 : vector<8x128xf32>
    %537 = vector.extract_strided_slice %520 {offsets = [0, 0], sizes = [8, 128], strides = [1, 1]} : vector<8x256xf32> to vector<8x128xf32>
    %538 = arith.mulf %537, %525 : vector<8x128xf32>
    %539 = arith.addf %536, %538 : vector<8x128xf32>
    %540 = math.tanh %539 : vector<8x128xf32>
    %541 = arith.mulf %534, %540 : vector<8x128xf32>
    %c14_239 = arith.constant 14 : index
    %c0_240 = arith.constant 0 : index
    %c0_241 = arith.constant 0 : index
    %542 = vector.load %arg4[%c14_239, %c0_240, %c0_241] : memref<16x8x128xf32, #tpu.memory_space<vmem>>, vector<1x8x128xf32>
    %543 = vector.shape_cast %542 : vector<1x8x128xf32> to vector<8x128xf32>
    %544 = vector.shape_cast %541 : vector<8x128xf32> to vector<1x8x128xf32>
    tpu.vector_store %arg4[%c14_239, %c0_240, %c0_241], %544 {strides = array<i32>} : memref<16x8x128xf32, #tpu.memory_space<vmem>>, vector<1x8x128xf32>,
    %c15 = arith.constant 15 : index
    %c0_242 = arith.constant 0 : index
    %c0_243 = arith.constant 0 : index
    %545 = vector.load %arg2[%c15, %c0_242, %c0_243] : memref<16x8x512xf32, #tpu.memory_space<vmem>>, vector<1x8x512xf32>
    %546 = vector.shape_cast %545 : vector<1x8x512xf32> to vector<8x512xf32>
    %547 = arith.truncf %541 : vector<8x128xf32> to vector<8x128xbf16>
    %548 = vector.extract_strided_slice %546 {offsets = [0, 0], sizes = [8, 256], strides = [1, 1]} : vector<8x512xf32> to vector<8x256xf32>
    %c0_244 = arith.constant 0 : index
    %c0_245 = arith.constant 0 : index
    %549 = vector.load %arg3[%c0_244, %c0_245] : memref<128x512xbf16, #tpu.memory_space<vmem>>, vector<128x256xbf16>
    %cst_246 = arith.constant dense<0.000000e+00> : vector<8x256xf32>
    %550 = tpu.matmul %547, %549, %cst_246 {dimension_numbers = #tpu.dot_dimension_numbers<[1], [0], [0], [1], [0, 0, 1, 1], [], []>} : vector<8x128xbf16>, vector<128x256xbf16>, vector<8x256xf32> -> vector<8x256xf32>
    %551 = arith.addf %548, %550 : vector<8x256xf32>
    %552 = arith.negf %551 : vector<8x256xf32>
    %553 = math.exp %552 : vector<8x256xf32>
    %cst_247 = arith.constant 1.000000e+00 : f32
    %554 = vector.broadcast %cst_247 : f32 to vector<8x256xf32>
    %555 = arith.addf %554, %553 : vector<8x256xf32>
    %556 = arith.divf %554, %555 : vector<8x256xf32>
    %557 = vector.extract_strided_slice %546 {offsets = [0, 256], sizes = [8, 128], strides = [1, 1]} : vector<8x512xf32> to vector<8x128xf32>
    %c0_248 = arith.constant 0 : index
    %c256_249 = arith.constant 256 : index
    %558 = vector.load %arg3[%c0_248, %c256_249] : memref<128x512xbf16, #tpu.memory_space<vmem>>, vector<128x128xbf16>
    %cst_250 = arith.constant dense<0.000000e+00> : vector<8x128xf32>
    %559 = tpu.matmul %547, %558, %cst_250 {dimension_numbers = #tpu.dot_dimension_numbers<[1], [0], [0], [1], [0, 0, 1, 1], [], []>} : vector<8x128xbf16>, vector<128x128xbf16>, vector<8x128xf32> -> vector<8x128xf32>
    %560 = arith.addf %557, %559 : vector<8x128xf32>
    %561 = math.tanh %560 : vector<8x128xf32>
    %562 = vector.extract_strided_slice %546 {offsets = [0, 384], sizes = [8, 128], strides = [1, 1]} : vector<8x512xf32> to vector<8x128xf32>
    %c0_251 = arith.constant 0 : index
    %c384_252 = arith.constant 384 : index
    %563 = vector.load %arg3[%c0_251, %c384_252] : memref<128x512xbf16, #tpu.memory_space<vmem>>, vector<128x128xbf16>
    %cst_253 = arith.constant dense<0.000000e+00> : vector<8x128xf32>
    %564 = tpu.matmul %547, %563, %cst_253 {dimension_numbers = #tpu.dot_dimension_numbers<[1], [0], [0], [1], [0, 0, 1, 1], [], []>} : vector<8x128xbf16>, vector<128x128xbf16>, vector<8x128xf32> -> vector<8x128xf32>
    %565 = arith.addf %562, %564 : vector<8x128xf32>
    %566 = arith.negf %565 : vector<8x128xf32>
    %567 = math.exp %566 : vector<8x128xf32>
    %cst_254 = arith.constant 1.000000e+00 : f32
    %568 = vector.broadcast %cst_254 : f32 to vector<8x128xf32>
    %569 = arith.addf %568, %567 : vector<8x128xf32>
    %570 = arith.divf %568, %569 : vector<8x128xf32>
    %571 = vector.extract_strided_slice %556 {offsets = [0, 128], sizes = [8, 128], strides = [1, 1]} : vector<8x256xf32> to vector<8x128xf32>
    %572 = arith.mulf %571, %539 : vector<8x128xf32>
    %573 = vector.extract_strided_slice %556 {offsets = [0, 0], sizes = [8, 128], strides = [1, 1]} : vector<8x256xf32> to vector<8x128xf32>
    %574 = arith.mulf %573, %561 : vector<8x128xf32>
    %575 = arith.addf %572, %574 : vector<8x128xf32>
    %576 = math.tanh %575 : vector<8x128xf32>
    %577 = arith.mulf %570, %576 : vector<8x128xf32>
    %c15_255 = arith.constant 15 : index
    %c0_256 = arith.constant 0 : index
    %c0_257 = arith.constant 0 : index
    %578 = vector.load %arg4[%c15_255, %c0_256, %c0_257] : memref<16x8x128xf32, #tpu.memory_space<vmem>>, vector<1x8x128xf32>
    %579 = vector.shape_cast %578 : vector<1x8x128xf32> to vector<8x128xf32>
    %580 = vector.shape_cast %577 : vector<8x128xf32> to vector<1x8x128xf32>
    tpu.vector_store %arg4[%c15_255, %c0_256, %c0_257], %580 {strides = array<i32>} : memref<16x8x128xf32, #tpu.memory_space<vmem>>, vector<1x8x128xf32>,
    %c0_258 = arith.constant 0 : index
    %c0_259 = arith.constant 0 : index
    %581 = vector.load %arg5[%c0_258, %c0_259] : memref<8x128xf32, #tpu.memory_space<vmem>>, vector<8x128xf32>
    tpu.vector_store %arg5[%c0_258, %c0_259], %577 {strides = array<i32>} : memref<8x128xf32, #tpu.memory_space<vmem>>, vector<8x128xf32>,
    %c0_260 = arith.constant 0 : index
    %c0_261 = arith.constant 0 : index
    %582 = vector.load %arg6[%c0_260, %c0_261] : memref<8x128xf32, #tpu.memory_space<vmem>>, vector<8x128xf32>
    tpu.vector_store %arg6[%c0_260, %c0_261], %575 {strides = array<i32>} : memref<8x128xf32, #tpu.memory_space<vmem>>, vector<8x128xf32>,
    return
  }
  func.func @transform_0(%arg0: i32, %arg1: i32) -> (i32, i32, i32) {
    %c0_i32 = arith.constant 0 : i32
    %c0_i32_0 = arith.constant 0 : i32
    return %arg1, %arg0, %c0_i32 : i32, i32, i32
  }
  func.func @transform_1(%arg0: i32, %arg1: i32) -> (i32, i32) {
    %c0_i32 = arith.constant 0 : i32
    %c0_i32_0 = arith.constant 0 : i32
    %c0_i32_1 = arith.constant 0 : i32
    return %c0_i32, %c0_i32_0 : i32, i32
  }
  func.func @transform_2(%arg0: i32, %arg1: i32) -> (i32, i32, i32) {
    %c0_i32 = arith.constant 0 : i32
    %c0_i32_0 = arith.constant 0 : i32
    return %arg1, %arg0, %c0_i32 : i32, i32, i32
  }
}

</mosaic_0001>

<bundles_post_ra>
// kernel: tpu_custom_call.1
= control target key start
LH: loop header
LB: loop body
LE: loop exit
PB: predicated region body
PF: predicated region fallthrough
CT: control target
= control target key end

     0   :  { %7 = vsyncpa [#allocation5], 0  ;;  %s9232_s0 = inlined_call_operand.hbm [shape: f32[16,8,512], index: 0, kind: input, shape index: {}]   ;;  %s9233_s1 = inlined_call_operand.hbm [shape: bf16[128,512], index: 1, kind: input, shape index: {}]   ;;  %s9234_s2 = inlined_call_operand.hbm [shape: f32[16,8,128], index: 2, kind: output, shape index: {}]  }
   0x1   :  { %8 = vsyncpa [#allocation8], 0 }
   0x2   :  { %9 = vsyncpa [#allocation6], 0  ;;  %s8408_s9 = smov [#allocation4]   ;;  %s8336_s13 = scalar_lea.hbm %s9232_s0, 8192 }
   0x3   :  { %s15_s10 = sshll.u32 %s8408_s9, 4  ;;  %p8337_p0 = scmp.ne.s32.totalorder %s9232_s0, %s8336_s13  ;;  %s16_s10 = int_to_ptr.vmem [resolvable:$true] %s15_s10 }
   0x4   :  { %p8340_p1 = scmp.lt.u32.totalorder %s8336_s13, %s9232_s0 }
   0x6   :  { %p8342_p2 = pnand %p8340_p1, %p8337_p0 }
   0x8   :  { %8345 = shalt.err (!%p8342_p2)
}
   0x9   :  { %s8346_s18 = scalar_lea.vmem %s16_s10, 8192  ;;  %p8351_p4 = scmp.lt.s32.totalorder %s16_s10, %s16_s10 }
   0xa   :  { %p8347_p3 = scmp.ne.s32.totalorder %s16_s10, %s8346_s18  ;;  %p8352_p5 = scmp.lt.s32.totalorder %s8346_s18, %s8346_s18 }
   0xc   :  { %p8353_p6 = por %p8352_p5, %p8351_p4 }
   0xe   :  { %p8354_p7 = pnand %p8353_p6, %p8347_p3 }
  0x10   :  { %8357 = shalt.err (!%p8354_p7)
}
  0x11   :  { %s8409_s19 = smov 512   ;;  %s8410_s20 = smov 32  }
  0x12   :  { %21 = dma.hbm_to_vmem [thread:$0]  %s9232_s0, 8192, %s16_s10, [#allocation5], %s8409_s19, %s8409_s19, %s8410_s20  }
  0x13   :  { %s8411_s23 = smov [#allocation7]   ;;  %s8358_s27 = scalar_lea.hbm %s9233_s1, 4096 }
  0x14   :  { %s27_s24 = sshll.u32 %s8411_s23, 4  ;;  %p8359_p8 = scmp.ne.s32.totalorder %s9233_s1, %s8358_s27  ;;  %s28_s24 = int_to_ptr.vmem [resolvable:$true] %s27_s24 }
  0x15   :  { %p8362_p9 = scmp.lt.u32.totalorder %s8358_s27, %s9233_s1 }
  0x17   :  { %p8364_p10 = pnand %p8362_p9, %p8359_p8 }
  0x19   :  { %8367 = shalt.err (!%p8364_p10)
}
  0x1a   :  { %s8368_s4 = scalar_lea.vmem %s28_s24, 4096  ;;  %p8373_p12 = scmp.lt.s32.totalorder %s28_s24, %s28_s24 }
  0x1b   :  { %p8369_p11 = scmp.ne.s32.totalorder %s28_s24, %s8368_s4  ;;  %p8374_p13 = scmp.lt.s32.totalorder %s8368_s4, %s8368_s4 }
  0x1d   :  { %p8375_p0 = por %p8374_p13, %p8373_p12 }
  0x1f   :  { %p8376_p1 = pnand %p8375_p0, %p8369_p11 }
  0x21   :  { %8379 = shalt.err (!%p8376_p1)
}
  0x22   :  { %s8412_s0 = smov 256   ;;  %s8413_s5 = smov 16  }
  0x23   :  { %33 = dma.hbm_to_vmem [thread:$0]  %s9233_s1, 4096, %s28_s24, [#allocation8], %s8412_s0, %s8412_s0, %s8413_s5  }
  0x24   :  { %8402 = dma.done.wait [#allocation5], 8192  }
  0x25   :  { %8403 = vsyncadd [#allocation5], 4294959104 }
  0x26   :  { %8404 = dma.done.wait [#allocation8], 4096  }
  0x27   :  { %8405 = vsyncadd [#allocation8], 4294963200  ;;  %v8414_v0 = vmov 0.0   ;;  %v8415_v1 = vmov 0   ;;  %vm8416_vm0 = vmmov 0   ;;  %v8417_v28 = vmov 0.0|0.0  }
  0x28   :  { %7011 = vmatprep.subr.bf16.mxu1 %v8414_v0  ;;  %182 = vmatprep.mubr.bf16.mxu0 %v8415_v1  ;;  %v8464_v2 = vld [vmem:[#allocation7 + $0x4] ss:$16 sps:$4 sm:$0xff]   ;;  %v8466_v3 = vld [vmem:[#allocation7] ss:$16 sps:$4 sm:$0xff]   ;;  %v7679_v8 = vld [vmem:[#allocation7 + $0x8] ss:$16 sps:$4 sm:$0xff]  }
  0x29   :  { %7027 = vmatprep.mubr.msk.bf16.mxu1 %vm8416_vm0, %v8414_v0  ;;  %150 = vmatprep.subr.bf16.mxu0 %v8464_v2  ;;  %v8469_v4 = vld [vmem:[#allocation7 + $0x24] ss:$16 sps:$4 sm:$0xff]   ;;  %v8472_v5 = vld [vmem:[#allocation7 + $0x20] ss:$16 sps:$4 sm:$0xff]   ;;  %v7683_v10 = vld [vmem:[#allocation7 + $0x28] ss:$16 sps:$4 sm:$0xff]  }
  0x2a   :  { %151 = vmatpush1.bf16.msra.mxu0 %v8466_v3  ;;  %v8475_v6 = vld [vmem:[#allocation7 + $0x44] ss:$16 sps:$4 sm:$0xff]   ;;  %v8477_v7 = vld [vmem:[#allocation7 + $0x40] ss:$16 sps:$4 sm:$0xff]   ;;  %7012 = vmatpush3.bf16.msra.mxu1 %v7679_v8  ;;  %v7687_v13 = vld [vmem:[#allocation7 + $0x48] ss:$16 sps:$4 sm:$0xff]  }
  0x2b   :  { %152 = vmatprep.subr.bf16.mxu0 %v8469_v4  ;;  %v8481_v9 = vld [vmem:[#allocation7 + $0x64] ss:$16 sps:$4 sm:$0xff]   ;;  %7013 = vmatprep.subr.bf16.mxu1 %v8414_v0  ;;  %v8485_v11 = vld [vmem:[#allocation7 + $0x60] ss:$16 sps:$4 sm:$0xff]   ;;  %v7691_v16 = vld [vmem:[#allocation7 + $0x68] ss:$16 sps:$4 sm:$0xff]  }
  0x2c   :  { %v8488_v12 = vld [vmem:[#allocation7 + $0x84] ss:$16 sps:$4 sm:$0xff]   ;;  %v8492_v14 = vld [vmem:[#allocation7 + $0x80] ss:$16 sps:$4 sm:$0xff]   ;;  %v7692_v19 = vld [vmem:[#allocation7 + $0x88] ss:$16 sps:$4 sm:$0xff]  }
  0x2d   :  { %v8495_v15 = vld [vmem:[#allocation7 + $0xa4] ss:$16 sps:$4 sm:$0xff]   ;;  %v7682_v17 = vld [vmem:[#allocation7 + $0xa0] ss:$16 sps:$4 sm:$0xff]   ;;  %v7694_v22 = vld [vmem:[#allocation7 + $0xa8] ss:$16 sps:$4 sm:$0xff]  }
  0x2e   :  { %153 = vmatpush1.bf16.msra.mxu0 %v8472_v5  ;;  %7014 = vmatpush3.bf16.msra.mxu1 %v7683_v10  ;;  %v7684_v18 = vld [vmem:[#allocation7 + $0xc4] ss:$16 sps:$4 sm:$0xff]   ;;  %v7686_v20 = vld [vmem:[#allocation7 + $0xc0] ss:$16 sps:$4 sm:$0xff]   ;;  %v7696_v24 = vld [vmem:[#allocation7 + $0xc8] ss:$16 sps:$4 sm:$0xff]  }
  0x2f   :  { %154 = vmatprep.subr.bf16.mxu0 %v8475_v6  ;;  %7015 = vmatprep.subr.bf16.mxu1 %v8414_v0  ;;  %v7688_v21 = vld [vmem:[#allocation7 + $0xe4] ss:$16 sps:$4 sm:$0xff]   ;;  %v7690_v23 = vld [vmem:[#allocation7 + $0xe0] ss:$16 sps:$4 sm:$0xff]   ;;  %v7693_v25 = vld [vmem:[#allocation7 + $0xc] ss:$16 sps:$4 sm:$0xff]  }
  0x30   :  { %v7698_v26 = vld [vmem:[#allocation7 + $0xe8] ss:$16 sps:$4 sm:$0xff]   ;;  %v7695_v27 = vld [vmem:[#allocation7 + $0x2c] ss:$16 sps:$4 sm:$0xff]   ;;  %v8320_v43 = vld [vmem:[#allocation7 + $0x4] ss:$16 sps:$4 sm:$0xff]  }
  0x31   :  { %v7697_v29 = vld [vmem:[#allocation7 + $0x4c] ss:$16 sps:$4 sm:$0xff]   ;;  %v7704_v35 = vld [vmem:[#allocation7 + $0x8] ss:$16 sps:$4 sm:$0xff]   ;;  %v49_v44 = vld [vmem:[#allocation4] sm:$0xff]  ;;  %s8418_s1 = smov [#allocation9]  }
  0x32   :  { %155 = vmatpush1.bf16.msra.mxu0 %v8477_v7  ;;  %7016 = vmatpush3.bf16.msra.mxu1 %v7687_v13  ;;  %v7699_v30 = vld [vmem:[#allocation7 + $0x6c] ss:$16 sps:$4 sm:$0xff]   ;;  %v7705_v36 = vld [vmem:[#allocation7 + $0x28] ss:$16 sps:$4 sm:$0xff]   ;;  %v51_v57 = vld [vmem:[#allocation4 + $0x10] sm:$0xff]  ;;  %s6150_s8 = sshll.u32 %s8418_s1, 4  ;;  %s6151_s8 = int_to_ptr.vmem [resolvable:$true] %s6150_s8 }
  0x33   :  { %156 = vmatprep.subr.bf16.mxu0 %v8481_v9  ;;  %7017 = vmatprep.subr.bf16.mxu1 %v8414_v0  ;;  %v7700_v31 = vld [vmem:[#allocation7 + $0x8c] ss:$16 sps:$4 sm:$0xff]   ;;  %v7706_v37 = vld [vmem:[#allocation7 + $0x48] ss:$16 sps:$4 sm:$0xff]   ;;  %s8380_s9 = scalar_lea.vmem %s6151_s8, 2048  ;;  %p8385_p3 = scmp.lt.s32.totalorder %s6151_s8, %s6151_s8 }
  0x34   :  { %v7701_v32 = vld [vmem:[#allocation7 + $0xac] ss:$16 sps:$4 sm:$0xff]   ;;  %v7707_v38 = vld [vmem:[#allocation7 + $0x68] ss:$16 sps:$4 sm:$0xff]   ;;  %p8381_p2 = scmp.ne.s32.totalorder %s6151_s8, %s8380_s9  ;;  %p8386_p4 = scmp.lt.s32.totalorder %s8380_s9, %s8380_s9 }
  0x35   :  { %v7702_v33 = vld [vmem:[#allocation7 + $0xcc] ss:$16 sps:$4 sm:$0xff]   ;;  %v7708_v39 = vld [vmem:[#allocation7 + $0x88] ss:$16 sps:$4 sm:$0xff]  }
  0x36   :  { %157 = vmatpush1.bf16.msra.mxu0 %v8485_v11  ;;  %7018 = vmatpush3.bf16.msra.mxu1 %v7691_v16  ;;  %v7703_v34 = vld [vmem:[#allocation7 + $0xec] ss:$16 sps:$4 sm:$0xff]   ;;  %v7709_v40 = vld [vmem:[#allocation7 + $0xa8] ss:$16 sps:$4 sm:$0xff]   ;;  %p8387_p5 = por %p8386_p4, %p8385_p3 }
  0x37   :  { %158 = vmatprep.subr.bf16.mxu0 %v8488_v12  ;;  %7019 = vmatprep.subr.bf16.mxu1 %v8414_v0  ;;  %v7710_v41 = vld [vmem:[#allocation7 + $0xc8] ss:$16 sps:$4 sm:$0xff]  }
  0x38   :  { %v7711_v42 = vld [vmem:[#allocation7 + $0xe8] ss:$16 sps:$4 sm:$0xff]   ;;  %p8388_p6 = pnand %p8387_p5, %p8381_p2 }
  0x39   :  { %v50_v45 = vld [vmem:[#allocation4 + $0x8] sm:$0xff] }
  0x3a   :  { %159 = vmatpush1.bf16.msra.mxu0 %v8492_v14  ;;  %7020 = vmatpush3.bf16.msra.mxu1 %v7692_v19 }
  0x3b   :  { %160 = vmatprep.subr.bf16.mxu0 %v8495_v15  ;;  %7021 = vmatprep.subr.bf16.mxu1 %v8414_v0 }
  0x3e   :  { %161 = vmatpush1.bf16.msra.mxu0 %v7682_v17  ;;  %7022 = vmatpush3.bf16.msra.mxu1 %v7694_v22  ;;  %v7713_v22 = vld [vmem:[#allocation7 + $0x2c] ss:$16 sps:$4 sm:$0xff]  }
  0x3f   :  { %162 = vmatprep.subr.bf16.mxu0 %v7684_v18  ;;  %7023 = vmatprep.subr.bf16.mxu1 %v8414_v0 }
  0x42   :  { %163 = vmatpush1.bf16.msra.mxu0 %v7686_v20  ;;  %7024 = vmatpush3.bf16.msra.mxu1 %v7696_v24  ;;  %v8322_v24 = vld [vmem:[#allocation7 + $0x24] ss:$16 sps:$4 sm:$0xff]  }
  0x43   :  { %164 = vmatprep.subr.bf16.mxu0 %v7688_v21  ;;  %7025 = vmatprep.subr.bf16.mxu1 %v8414_v0 }
  0x46   :  { %165 = vmatpush1.bf16.msra.mxu0 %v7690_v23  ;;  %7026 = vmatpush3.bf16.msra.mxu1 %v7698_v26  ;;  %v8323_v26 = vld [vmem:[#allocation7 + $0x20] ss:$16 sps:$4 sm:$0xff]  }
  0x47   :  { %7031 = vmatprep.subr.bf16.mxu0 %v8414_v0  ;;  %530 = vmatprep.subr.bf16.mxu1 %v8464_v2 }
  0x49   :  { %183 = vmatmul.mubr.bf16.vlgmr.msra.gmra.mrb[0].mxu0 %v8417_v28  ;;  %7028 = vmatmul.mubr.bf16.vlgmr.msra.gmra.mrb[0].mxu1 %v8417_v28 }
  0x4a   :  { %7032 = vmatpush3.bf16.msra.mxu0 %v7693_v25  ;;  %7047 = vmatprep.mubr.msk.bf16.mxu0 %vm8416_vm0, %v8414_v0  ;;  %v7714_v25 = vld [vmem:[#allocation7 + $0x4c] ss:$16 sps:$4 sm:$0xff]  }
  0x4b   :  { %7033 = vmatprep.subr.bf16.mxu0 %v8414_v0  ;;  %531 = vmatpush1.bf16.msra.mxu1 %v8466_v3 }
  0x4c   :  { %562 = vmatprep.mubr.bf16.mxu1 %v8415_v1  ;;  %532 = vmatprep.subr.bf16.mxu1 %v8469_v4 }
  0x4e   :  { %7034 = vmatpush3.bf16.msra.mxu0 %v7695_v27  ;;  %v8324_v27 = vld [vmem:[#allocation7 + $0x44] ss:$16 sps:$4 sm:$0xff]  }
  0x4f   :  { %7035 = vmatprep.subr.bf16.mxu0 %v8414_v0  ;;  %533 = vmatpush1.bf16.msra.mxu1 %v8472_v5 }
  0x50   :  { %534 = vmatprep.subr.bf16.mxu1 %v8475_v6 }
  0x52   :  { %7036 = vmatpush3.bf16.msra.mxu0 %v7697_v29  ;;  %v8325_v29 = vld [vmem:[#allocation7 + $0x40] ss:$16 sps:$4 sm:$0xff]  }
  0x53   :  { %7037 = vmatprep.subr.bf16.mxu0 %v8414_v0  ;;  %535 = vmatpush1.bf16.msra.mxu1 %v8477_v7  ;;  %v52_v7 = vld [vmem:[#allocation4 + $0x18] sm:$0xff] }
  0x54   :  { %536 = vmatprep.subr.bf16.mxu1 %v8481_v9 }
  0x56   :  { %7038 = vmatpush3.bf16.msra.mxu0 %v7699_v30  ;;  %v8326_v30 = vld [vmem:[#allocation7 + $0x64] ss:$16 sps:$4 sm:$0xff]  }
  0x57   :  { %7039 = vmatprep.subr.bf16.mxu0 %v8414_v0  ;;  %537 = vmatpush1.bf16.msra.mxu1 %v8485_v11 }
  0x58   :  { %538 = vmatprep.subr.bf16.mxu1 %v8488_v12 }
  0x5a   :  { %7040 = vmatpush3.bf16.msra.mxu0 %v7700_v31  ;;  %v7716_v31 = vld [vmem:[#allocation7 + $0x8c] ss:$16 sps:$4 sm:$0xff]  }
  0x5b   :  { %7041 = vmatprep.subr.bf16.mxu0 %v8414_v0  ;;  %539 = vmatpush1.bf16.msra.mxu1 %v8492_v14 }
  0x5c   :  { %540 = vmatprep.subr.bf16.mxu1 %v8495_v15 }
  0x5e   :  { %7042 = vmatpush3.bf16.msra.mxu0 %v7701_v32  ;;  %v8327_v32 = vld [vmem:[#allocation7 + $0x60] ss:$16 sps:$4 sm:$0xff]  }
  0x5f   :  { %7043 = vmatprep.subr.bf16.mxu0 %v8414_v0  ;;  %541 = vmatpush1.bf16.msra.mxu1 %v7682_v17 }
  0x60   :  { %542 = vmatprep.subr.bf16.mxu1 %v7684_v18 }
  0x62   :  { %7044 = vmatpush3.bf16.msra.mxu0 %v7702_v33  ;;  %v8328_v33 = vld [vmem:[#allocation7 + $0x84] ss:$16 sps:$4 sm:$0xff]  }
  0x63   :  { %7045 = vmatprep.subr.bf16.mxu0 %v8414_v0  ;;  %543 = vmatpush1.bf16.msra.mxu1 %v7686_v20  ;;  %v7712_v20 = vld [vmem:[#allocation7 + $0xc] ss:$16 sps:$4 sm:$0xff]  }
  0x64   :  { %544 = vmatprep.subr.bf16.mxu1 %v7688_v21 }
  0x66   :  { %7046 = vmatpush3.bf16.msra.mxu0 %v7703_v34  ;;  %v7717_v34 = vld [vmem:[#allocation7 + $0xac] ss:$16 sps:$4 sm:$0xff]  }
  0x67   :  { %7051 = vmatprep.subr.bf16.mxu0 %v8414_v0  ;;  %545 = vmatpush1.bf16.msra.mxu1 %v7690_v23  ;;  %v8321_v23 = vld [vmem:[#allocation7] ss:$16 sps:$4 sm:$0xff]  }
  0x68   :  { %7071 = vmatprep.subr.bf16.mxu1 %v8414_v0 }
  0x69   :  { %7048 = vmatmul.mubr.bf16.vlgmr.msra.gmra.mrb[4].mxu0 %v8417_v28  ;;  %v7715_v28 = vld [vmem:[#allocation7 + $0x6c] ss:$16 sps:$4 sm:$0xff]  }
  0x6a   :  { %7067 = vmatprep.mubr.msk.bf16.mxu0 %vm8416_vm0, %v8414_v0  ;;  %7052 = vmatpush3.bf16.msra.mxu0 %v7704_v35  ;;  %v8329_v35 = vld [vmem:[#allocation7 + $0x80] ss:$16 sps:$4 sm:$0xff]  }
  0x6b   :  { %7053 = vmatprep.subr.bf16.mxu0 %v8414_v0 }
  0x6e   :  { %7054 = vmatpush3.bf16.msra.mxu0 %v7705_v36  ;;  %v8330_v36 = vld [vmem:[#allocation7 + $0xa4] ss:$16 sps:$4 sm:$0xff]  }
  0x6f   :  { %7055 = vmatprep.subr.bf16.mxu0 %v8414_v0 }
  0x72   :  { %7056 = vmatpush3.bf16.msra.mxu0 %v7706_v37  ;;  %v7718_v37 = vld [vmem:[#allocation7 + $0xcc] ss:$16 sps:$4 sm:$0xff]  }
  0x73   :  { %7057 = vmatprep.subr.bf16.mxu0 %v8414_v0 }
  0x76   :  { %7058 = vmatpush3.bf16.msra.mxu0 %v7707_v38  ;;  %v8331_v38 = vld [vmem:[#allocation7 + $0xa0] ss:$16 sps:$4 sm:$0xff]  }
  0x77   :  { %7059 = vmatprep.subr.bf16.mxu0 %v8414_v0 }
  0x7a   :  { %7060 = vmatpush3.bf16.msra.mxu0 %v7708_v39  ;;  %v8332_v39 = vld [vmem:[#allocation7 + $0xc4] ss:$16 sps:$4 sm:$0xff]  }
  0x7b   :  { %7061 = vmatprep.subr.bf16.mxu0 %v8414_v0 }
  0x7e   :  { %7062 = vmatpush3.bf16.msra.mxu0 %v7709_v40  ;;  %v7719_v40 = vld [vmem:[#allocation7 + $0xec] ss:$16 sps:$4 sm:$0xff]  }
  0x7f   :  { %7063 = vmatprep.subr.bf16.mxu0 %v8414_v0 }
  0x82   :  { %7064 = vmatpush3.bf16.msra.mxu0 %v7710_v41  ;;  %v8333_v41 = vld [vmem:[#allocation7 + $0xc0] ss:$16 sps:$4 sm:$0xff]  }
  0x83   :  { %7065 = vmatprep.subr.bf16.mxu0 %v8414_v0 }
  0x86   :  { %7066 = vmatpush3.bf16.msra.mxu0 %v7711_v42  ;;  %v8334_v42 = vld [vmem:[#allocation7 + $0xe4] ss:$16 sps:$4 sm:$0xff]  }
  0x87   :  { %911 = vmatprep.subr.bf16.mxu0 %v8320_v43  ;;  %v8335_v43 = vld [vmem:[#allocation7 + $0xe0] ss:$16 sps:$4 sm:$0xff]  }
 0x11c   :  { %v184_v46 = vpop.f32.mrb[0].mxu0  ;;  %v303_v54 = vpop.f32.mrb[0].mxu1 }
 0x11d   :  { %v191_v47 = vadd.f32 %v184_v46, %v49_v44  ;;  %v186_v48 = vpop.f32.mrb[1].mxu0  ;;  %v7029_v55 = vpop.f32.mrb[1].mxu1  ;;  %v309_v59 = vadd.f32 %v303_v54, %v51_v57  ;;  %v7720_v44 = vld [vmem:[#allocation7 + $0x8] ss:$16 sps:$4 sm:$0xff]  }
 0x11e   :  { %v192_v49 = vadd.f32 %v186_v48, %v50_v45  ;;  %v188_v50 = vpop.f32.mrb[2].mxu0  ;;  %v306_v56 = vpop.f32.mrb[2].mxu1  ;;  %v7721_v45 = vld [vmem:[#allocation7 + $0x28] ss:$16 sps:$4 sm:$0xff]  }
 0x11f   :  { %v6179_v51 = vmul.f32 -1.442695, %v191_v47  ;;  %v189_v52 = vpop.f32.mrb[3].mxu0  ;;  %v7030_v58 = vpop.f32.mrb[3].mxu1  ;;  %v7722_v46 = vld [vmem:[#allocation7 + $0x48] ss:$16 sps:$4 sm:$0xff]  }
 0x120   :  { %v6180_v53 = vmul.f32 -1.442695, %v192_v49  ;;  %v7723_v47 = vld [vmem:[#allocation7 + $0x68] ss:$16 sps:$4 sm:$0xff]   ;;  %v429_v52 = vld [vmem:[#allocation4 + $0x20] sm:$0xff] }
 0x121   :  { %8064 = vpow2.f32 %v6179_v51  ;;  %v7724_v48 = vld [vmem:[#allocation7 + $0x88] ss:$16 sps:$4 sm:$0xff]  }
 0x122   :  { %8066 = vpow2.f32 %v6180_v53  ;;  %v7725_v49 = vld [vmem:[#allocation7 + $0xa8] ss:$16 sps:$4 sm:$0xff]  }
 0x123   :  { %8068 = vtanh.f32 %v309_v59  ;;  %v7726_v50 = vld [vmem:[#allocation7 + $0xc8] ss:$16 sps:$4 sm:$0xff]  }
 0x124   :  { %v7727_v51 = vld [vmem:[#allocation7 + $0xe8] ss:$16 sps:$4 sm:$0xff]  }
 0x125   :  { %v430_v53 = vld [vmem:[#allocation4 + $0x28] sm:$0xff] }
 0x12b   :  { %v8065_v60 = vpop.eup %8064 }
 0x12c   :  { %v8067_v61 = vpop.eup %8066  ;;  %v199_v62 = vadd.f32 1.0, %v8065_v60 }
 0x12d   :  { %v200_v63 = vadd.f32 1.0, %v8067_v61  ;;  %v8069_v2 = vpop.eup %8068 }
 0x12e   :  { %8070 = vrcp.f32 %v199_v62 }
 0x12f   :  { %8072 = vrcp.f32 %v200_v63 }
 0x138   :  { %v8071_v3 = vpop.eup %8070 }
 0x139   :  { %v8073_v4 = vpop.eup %8072  ;;  %v423_v5 = vmul.f32 %v8071_v3, %v8069_v2 }
 0x13a   :  { %v422_v6 = vmul.f32 0.0, %v8073_v4  ;;  %v431_v4 = vld [vmem:[#allocation4 + $0x30] sm:$0xff] }
 0x13c   :  { %v8537_v8 = vadd.f32 %v423_v5, %v422_v6  ;;  %v409_v9 = vpop.f32.mrb[4].mxu0 }
 0x13d   :  { %v415_v10 = vadd.f32 %v409_v9, %v52_v7  ;;  %v7049_v11 = vpop.f32.mrb[5].mxu0 }
 0x13e   :  { %v412_v12 = vpop.f32.mrb[6].mxu0 }
 0x13f   :  { %v6197_v13 = vmul.f32 -1.442695, %v415_v10  ;;  %v7050_v14 = vpop.f32.mrb[7].mxu0 }
 0x141   :  { %8074 = vpow2.f32 %v6197_v13 }
 0x142   :  { %8076 = vtanh.f32 %v8537_v8 }
 0x14b   :  { %v8075_v15 = vpop.eup %8074 }
 0x14c   :  { %v419_v16 = vadd.f32 1.0, %v8075_v15  ;;  %v8077_v17 = vpop.eup %8076 }
 0x14e   :  { %8078 = vrcp.f32 %v419_v16  ;;  %v432_v16 = vld [vmem:[#allocation4 + $0x38] sm:$0xff] }
 0x158   :  { %v8079_v18 = vpop.eup %8078 }
 0x159   :  { %v426_v19 = vmul.f32 %v8079_v18, %v8077_v17 }
 0x15b   :  { %427 = vst [vmem:[#allocation9] sm:$0xff] %v426_v19  ;;  %v433_v21 = vpack.c.bf16 %v426_v19, %v426_v19 }
 0x15d   :  { %563 = vmatmul.mubr.bf16.vlgmr.msra.gmra.mrb[4].mxu1 %v433_v21  ;;  %7068 = vmatmul.mubr.bf16.vlgmr.msra.gmra.mrb[8].mxu0 %v433_v21 }
 0x15e   :  { %7072 = vmatpush3.bf16.msra.mxu1 %v7712_v20  ;;  %7087 = vmatprep.mubr.msk.bf16.mxu1 %vm8416_vm0, %v8414_v0 }
 0x15f   :  { %7073 = vmatprep.subr.bf16.mxu1 %v8414_v0  ;;  %912 = vmatpush1.bf16.msra.mxu0 %v8321_v23 }
 0x160   :  { %913 = vmatprep.subr.bf16.mxu0 %v8322_v24  ;;  %943 = vmatprep.mubr.bf16.mxu0 %v8415_v1 }
 0x162   :  { %7074 = vmatpush3.bf16.msra.mxu1 %v7713_v22 }
 0x163   :  { %7075 = vmatprep.subr.bf16.mxu1 %v8414_v0  ;;  %914 = vmatpush1.bf16.msra.mxu0 %v8323_v26 }
 0x164   :  { %915 = vmatprep.subr.bf16.mxu0 %v8324_v27 }
 0x166   :  { %7076 = vmatpush3.bf16.msra.mxu1 %v7714_v25 }
 0x167   :  { %7077 = vmatprep.subr.bf16.mxu1 %v8414_v0  ;;  %916 = vmatpush1.bf16.msra.mxu0 %v8325_v29  ;;  %v7728_v29 = vld [vmem:[#allocation7 + $0xc] ss:$16 sps:$4 sm:$0xff]  }
 0x168   :  { %917 = vmatprep.subr.bf16.mxu0 %v8326_v30  ;;  %v7729_v30 = vld [vmem:[#allocation7 + $0x2c] ss:$16 sps:$4 sm:$0xff]  }
 0x16a   :  { %7078 = vmatpush3.bf16.msra.mxu1 %v7715_v28 }
 0x16b   :  { %7079 = vmatprep.subr.bf16.mxu1 %v8414_v0  ;;  %918 = vmatpush1.bf16.msra.mxu0 %v8327_v32  ;;  %v7731_v32 = vld [vmem:[#allocation7 + $0x6c] ss:$16 sps:$4 sm:$0xff]  }
 0x16c   :  { %919 = vmatprep.subr.bf16.mxu0 %v8328_v33  ;;  %v7732_v33 = vld [vmem:[#allocation7 + $0x8c] ss:$16 sps:$4 sm:$0xff]  }
 0x16e   :  { %7080 = vmatpush3.bf16.msra.mxu1 %v7716_v31  ;;  %v7730_v31 = vld [vmem:[#allocation7 + $0x4c] ss:$16 sps:$4 sm:$0xff]  }
 0x16f   :  { %7081 = vmatprep.subr.bf16.mxu1 %v8414_v0  ;;  %920 = vmatpush1.bf16.msra.mxu0 %v8329_v35  ;;  %v7734_v35 = vld [vmem:[#allocation7 + $0xcc] ss:$16 sps:$4 sm:$0xff]  }
 0x170   :  { %921 = vmatprep.subr.bf16.mxu0 %v8330_v36  ;;  %v7735_v36 = vld [vmem:[#allocation7 + $0xec] ss:$16 sps:$4 sm:$0xff]  }
 0x172   :  { %7082 = vmatpush3.bf16.msra.mxu1 %v7717_v34  ;;  %v7733_v34 = vld [vmem:[#allocation7 + $0xac] ss:$16 sps:$4 sm:$0xff]  }
 0x173   :  { %7083 = vmatprep.subr.bf16.mxu1 %v8414_v0  ;;  %922 = vmatpush1.bf16.msra.mxu0 %v8331_v38  ;;  %v8580_v38 = vld [vmem:[#allocation7] ss:$16 sps:$4 sm:$0xff]  }
 0x174   :  { %923 = vmatprep.subr.bf16.mxu0 %v8332_v39  ;;  %v7739_v39 = vld [vmem:[#allocation7 + $0x8] ss:$16 sps:$4 sm:$0xff]  }
 0x176   :  { %7084 = vmatpush3.bf16.msra.mxu1 %v7718_v37  ;;  %v8578_v37 = vld [vmem:[#allocation7 + $0x4] ss:$16 sps:$4 sm:$0xff]  }
 0x177   :  { %7085 = vmatprep.subr.bf16.mxu1 %v8414_v0  ;;  %924 = vmatpush1.bf16.msra.mxu0 %v8333_v41  ;;  %v8586_v41 = vld [vmem:[#allocation7 + $0x20] ss:$16 sps:$4 sm:$0xff]  }
 0x178   :  { %925 = vmatprep.subr.bf16.mxu0 %v8334_v42  ;;  %v7743_v42 = vld [vmem:[#allocation7 + $0x28] ss:$16 sps:$4 sm:$0xff]  }
 0x17a   :  { %7086 = vmatpush3.bf16.msra.mxu1 %v7719_v40  ;;  %v8584_v40 = vld [vmem:[#allocation7 + $0x24] ss:$16 sps:$4 sm:$0xff]  }
 0x17b   :  { %7091 = vmatprep.subr.bf16.mxu1 %v8414_v0  ;;  %926 = vmatpush1.bf16.msra.mxu0 %v8335_v43  ;;  %v8591_v43 = vld [vmem:[#allocation7 + $0x44] ss:$16 sps:$4 sm:$0xff]  }
 0x17c   :  { %7111 = vmatprep.subr.bf16.mxu0 %v8414_v0 }
 0x17d   :  { %7088 = vmatmul.mubr.bf16.vlgmr.msra.gmra.mrb[8].mxu1 %v433_v21 }
 0x17e   :  { %7107 = vmatprep.mubr.msk.bf16.mxu1 %vm8416_vm0, %v8414_v0  ;;  %7092 = vmatpush3.bf16.msra.mxu1 %v7720_v44  ;;  %v8593_v44 = vld [vmem:[#allocation7 + $0x40] ss:$16 sps:$4 sm:$0xff]  }
 0x17f   :  { %7093 = vmatprep.subr.bf16.mxu1 %v8414_v0 }
 0x182   :  { %7094 = vmatpush3.bf16.msra.mxu1 %v7721_v45  ;;  %v7747_v45 = vld [vmem:[#allocation7 + $0x48] ss:$16 sps:$4 sm:$0xff]  }
 0x183   :  { %7095 = vmatprep.subr.bf16.mxu1 %v8414_v0 }
 0x186   :  { %7096 = vmatpush3.bf16.msra.mxu1 %v7722_v46  ;;  %v8598_v46 = vld [vmem:[#allocation7 + $0x64] ss:$16 sps:$4 sm:$0xff]  }
 0x187   :  { %7097 = vmatprep.subr.bf16.mxu1 %v8414_v0 }
 0x18a   :  { %7098 = vmatpush3.bf16.msra.mxu1 %v7723_v47  ;;  %v8600_v47 = vld [vmem:[#allocation7 + $0x60] ss:$16 sps:$4 sm:$0xff]  }
 0x18b   :  { %7099 = vmatprep.subr.bf16.mxu1 %v8414_v0 }
 0x18e   :  { %7100 = vmatpush3.bf16.msra.mxu1 %v7724_v48  ;;  %v7751_v48 = vld [vmem:[#allocation7 + $0x68] ss:$16 sps:$4 sm:$0xff]  }
 0x18f   :  { %7101 = vmatprep.subr.bf16.mxu1 %v8414_v0 }
 0x192   :  { %7102 = vmatpush3.bf16.msra.mxu1 %v7725_v49  ;;  %v8605_v49 = vld [vmem:[#allocation7 + $0x84] ss:$16 sps:$4 sm:$0xff]  }
 0x193   :  { %7103 = vmatprep.subr.bf16.mxu1 %v8414_v0 }
 0x196   :  { %7104 = vmatpush3.bf16.msra.mxu1 %v7726_v50  ;;  %v8607_v50 = vld [vmem:[#allocation7 + $0x80] ss:$16 sps:$4 sm:$0xff]  }
 0x197   :  { %7105 = vmatprep.subr.bf16.mxu1 %v8414_v0 }
 0x19a   :  { %7106 = vmatpush3.bf16.msra.mxu1 %v7727_v51  ;;  %v7755_v51 = vld [vmem:[#allocation7 + $0x88] ss:$16 sps:$4 sm:$0xff]  }
 0x19b   :  { %1292 = vmatprep.subr.bf16.mxu1 %v8578_v37 }
 0x230   :  { %v564_v54 = vpop.f32.mrb[4].mxu1  ;;  %v683_v55 = vpop.f32.mrb[8].mxu0 }
 0x231   :  { %v571_v56 = vadd.f32 %v564_v54, %v429_v52  ;;  %v566_v57 = vpop.f32.mrb[5].mxu1  ;;  %v7069_v58 = vpop.f32.mrb[9].mxu0  ;;  %v689_v5 = vadd.f32 %v683_v55, %v431_v4  ;;  %v8612_v52 = vld [vmem:[#allocation7 + $0xa0] ss:$16 sps:$4 sm:$0xff]   ;;  %v7759_v54 = vld [vmem:[#allocation7 + $0xa8] ss:$16 sps:$4 sm:$0xff]  }
 0x232   :  { %v572_v59 = vadd.f32 %v566_v57, %v430_v53  ;;  %v568_v60 = vpop.f32.mrb[6].mxu1  ;;  %v686_v61 = vpop.f32.mrb[10].mxu0  ;;  %v8614_v53 = vld [vmem:[#allocation7 + $0xa4] ss:$16 sps:$4 sm:$0xff]   ;;  %v7763_v57 = vld [vmem:[#allocation7 + $0xc8] ss:$16 sps:$4 sm:$0xff]  }
 0x233   :  { %v6214_v62 = vmul.f32 -1.442695, %v571_v56  ;;  %v569_v63 = vpop.f32.mrb[7].mxu1  ;;  %v7070_v2 = vpop.f32.mrb[11].mxu0  ;;  %v8617_v55 = vld [vmem:[#allocation7 + $0xc4] ss:$16 sps:$4 sm:$0xff]  }
 0x234   :  { %v6215_v3 = vmul.f32 -1.442695, %v572_v59  ;;  %v8621_v56 = vld [vmem:[#allocation7 + $0xc0] ss:$16 sps:$4 sm:$0xff]   ;;  %v8624_v58 = vld [vmem:[#allocation7 + $0xe4] ss:$16 sps:$4 sm:$0xff]  }
 0x235   :  { %8080 = vpow2.f32 %v6214_v62  ;;  %v8628_v59 = vld [vmem:[#allocation7 + $0xe0] ss:$16 sps:$4 sm:$0xff]   ;;  %v7767_v60 = vld [vmem:[#allocation7 + $0xe8] ss:$16 sps:$4 sm:$0xff]  }
 0x236   :  { %8082 = vpow2.f32 %v6215_v3  ;;  %v810_v61 = vld [vmem:[#allocation4 + $0x40] sm:$0xff]  ;;  %v811_v62 = vld [vmem:[#allocation4 + $0x48] sm:$0xff] }
 0x237   :  { %8084 = vtanh.f32 %v689_v5 }
 0x23f   :  { %v8081_v6 = vpop.eup %8080 }
 0x240   :  { %v8083_v7 = vpop.eup %8082  ;;  %v579_v9 = vadd.f32 1.0, %v8081_v6 }
 0x241   :  { %v580_v10 = vadd.f32 1.0, %v8083_v7  ;;  %v8085_v11 = vpop.eup %8084 }
 0x242   :  { %8086 = vrcp.f32 %v579_v9 }
 0x243   :  { %8088 = vrcp.f32 %v580_v10 }
 0x24c   :  { %v8087_v12 = vpop.eup %8086 }
 0x24d   :  { %v8089_v13 = vpop.eup %8088  ;;  %v803_v14 = vmul.f32 %v8087_v12, %v8085_v11 }
 0x24e   :  { %v802_v15 = vmul.f32 %v8089_v13, %v8537_v8 }
 0x250   :  { %v8562_v17 = vadd.f32 %v803_v14, %v802_v15  ;;  %v789_v18 = vpop.f32.mrb[8].mxu1  ;;  %v812_v14 = vld [vmem:[#allocation4 + $0x50] sm:$0xff] }
 0x251   :  { %v795_v19 = vadd.f32 %v789_v18, %v432_v16  ;;  %v7089_v20 = vpop.f32.mrb[9].mxu1 }
 0x252   :  { %v792_v21 = vpop.f32.mrb[10].mxu1 }
 0x253   :  { %v6232_v22 = vmul.f32 -1.442695, %v795_v19  ;;  %v7090_v23 = vpop.f32.mrb[11].mxu1 }
 0x255   :  { %8090 = vpow2.f32 %v6232_v22 }
 0x256   :  { %8092 = vtanh.f32 %v8562_v17 }
 0x25f   :  { %v8091_v24 = vpop.eup %8090 }
 0x260   :  { %v799_v25 = vadd.f32 1.0, %v8091_v24  ;;  %v8093_v26 = vpop.eup %8092 }
 0x262   :  { %8094 = vrcp.f32 %v799_v25 }
 0x26c   :  { %v8095_v27 = vpop.eup %8094 }
 0x26d   :  { %v806_v28 = vmul.f32 %v8095_v27, %v8093_v26  ;;  %v813_v26 = vld [vmem:[#allocation4 + $0x58] sm:$0xff] }
 0x26f   :  { %808 = vst [vmem:[#allocation9 + $0x8] sm:$0xff] %v806_v28  ;;  %v814_v8 = vpack.c.bf16 %v806_v28, %v806_v28 }
 0x271   :  { %944 = vmatmul.mubr.bf16.vlgmr.msra.gmra.mrb[12].mxu0 %v814_v8  ;;  %7108 = vmatmul.mubr.bf16.vlgmr.msra.gmra.mrb[12].mxu1 %v814_v8 }
 0x272   :  { %7112 = vmatpush3.bf16.msra.mxu0 %v7728_v29  ;;  %7127 = vmatprep.mubr.msk.bf16.mxu0 %vm8416_vm0, %v8414_v0 }
 0x273   :  { %7113 = vmatprep.subr.bf16.mxu0 %v8414_v0  ;;  %1324 = vmatprep.mubr.bf16.mxu1 %v8415_v1 }
 0x274   :  { %1293 = vmatpush1.bf16.msra.mxu1 %v8580_v38 }
 0x275   :  { %1294 = vmatprep.subr.bf16.mxu1 %v8584_v40 }
 0x276   :  { %7114 = vmatpush3.bf16.msra.mxu0 %v7729_v30 }
 0x277   :  { %7115 = vmatprep.subr.bf16.mxu0 %v8414_v0 }
 0x278   :  { %1295 = vmatpush1.bf16.msra.mxu1 %v8586_v41 }
 0x279   :  { %1296 = vmatprep.subr.bf16.mxu1 %v8591_v43 }
 0x27a   :  { %7116 = vmatpush3.bf16.msra.mxu0 %v7730_v31 }
 0x27b   :  { %7117 = vmatprep.subr.bf16.mxu0 %v8414_v0 }
 0x27c   :  { %1297 = vmatpush1.bf16.msra.mxu1 %v8593_v44 }
 0x27d   :  { %1298 = vmatprep.subr.bf16.mxu1 %v8598_v46 }
 0x27e   :  { %7118 = vmatpush3.bf16.msra.mxu0 %v7731_v32 }
 0x27f   :  { %7119 = vmatprep.subr.bf16.mxu0 %v8414_v0 }
 0x280   :  { %1299 = vmatpush1.bf16.msra.mxu1 %v8600_v47 }
 0x281   :  { %1300 = vmatprep.subr.bf16.mxu1 %v8605_v49 }
 0x282   :  { %7120 = vmatpush3.bf16.msra.mxu0 %v7732_v33 }
 0x283   :  { %7121 = vmatprep.subr.bf16.mxu0 %v8414_v0 }
 0x284   :  { %1301 = vmatpush1.bf16.msra.mxu1 %v8607_v50 }
 0x285   :  { %1302 = vmatprep.subr.bf16.mxu1 %v8614_v53 }
 0x286   :  { %7122 = vmatpush3.bf16.msra.mxu0 %v7733_v34 }
 0x287   :  { %7123 = vmatprep.subr.bf16.mxu0 %v8414_v0 }
 0x288   :  { %1303 = vmatpush1.bf16.msra.mxu1 %v8612_v52 }
 0x289   :  { %1304 = vmatprep.subr.bf16.mxu1 %v8617_v55 }
 0x28a   :  { %7124 = vmatpush3.bf16.msra.mxu0 %v7734_v35 }
 0x28b   :  { %7125 = vmatprep.subr.bf16.mxu0 %v8414_v0 }
 0x28c   :  { %1305 = vmatpush1.bf16.msra.mxu1 %v8621_v56 }
 0x28d   :  { %1306 = vmatprep.subr.bf16.mxu1 %v8624_v58 }
 0x28e   :  { %7126 = vmatpush3.bf16.msra.mxu0 %v7735_v36 }
 0x28f   :  { %7131 = vmatprep.subr.bf16.mxu0 %v8414_v0 }
 0x290   :  { %1307 = vmatpush1.bf16.msra.mxu1 %v8628_v59 }
 0x291   :  { %7128 = vmatmul.mubr.bf16.vlgmr.msra.gmra.mrb[16].mxu0 %v814_v8  ;;  %7151 = vmatprep.subr.bf16.mxu1 %v8414_v0 }
 0x292   :  { %7147 = vmatprep.mubr.msk.bf16.mxu0 %vm8416_vm0, %v8414_v0  ;;  %7132 = vmatpush3.bf16.msra.mxu0 %v7739_v39 }
 0x293   :  { %7133 = vmatprep.subr.bf16.mxu0 %v8414_v0 }
 0x296   :  { %7134 = vmatpush3.bf16.msra.mxu0 %v7743_v42  ;;  %v7768_v42 = vld [vmem:[#allocation7 + $0xc] ss:$16 sps:$4 sm:$0xff]  }
 0x297   :  { %7135 = vmatprep.subr.bf16.mxu0 %v8414_v0 }
 0x29a   :  { %7136 = vmatpush3.bf16.msra.mxu0 %v7747_v45  ;;  %v7769_v45 = vld [vmem:[#allocation7 + $0x2c] ss:$16 sps:$4 sm:$0xff]  }
 0x29b   :  { %7137 = vmatprep.subr.bf16.mxu0 %v8414_v0 }
 0x29e   :  { %7138 = vmatpush3.bf16.msra.mxu0 %v7751_v48  ;;  %v7770_v48 = vld [vmem:[#allocation7 + $0x4c] ss:$16 sps:$4 sm:$0xff]  }
 0x29f   :  { %7139 = vmatprep.subr.bf16.mxu0 %v8414_v0 }
 0x2a2   :  { %7140 = vmatpush3.bf16.msra.mxu0 %v7755_v51  ;;  %v7771_v51 = vld [vmem:[#allocation7 + $0x6c] ss:$16 sps:$4 sm:$0xff]  }
 0x2a3   :  { %7141 = vmatprep.subr.bf16.mxu0 %v8414_v0 }
 0x2a6   :  { %7142 = vmatpush3.bf16.msra.mxu0 %v7759_v54  ;;  %v7772_v54 = vld [vmem:[#allocation7 + $0x8c] ss:$16 sps:$4 sm:$0xff]  }
 0x2a7   :  { %7143 = vmatprep.subr.bf16.mxu0 %v8414_v0 }
 0x2aa   :  { %7144 = vmatpush3.bf16.msra.mxu0 %v7763_v57  ;;  %v7773_v57 = vld [vmem:[#allocation7 + $0xac] ss:$16 sps:$4 sm:$0xff]  }
 0x2ab   :  { %7145 = vmatprep.subr.bf16.mxu0 %v8414_v0 }
 0x2ae   :  { %7146 = vmatpush3.bf16.msra.mxu0 %v7767_v60  ;;  %v7774_v60 = vld [vmem:[#allocation7 + $0xcc] ss:$16 sps:$4 sm:$0xff]  }
 0x2af   :  { %1673 = vmatprep.subr.bf16.mxu0 %v8578_v37 }
 0x344   :  { %v945_v63 = vpop.f32.mrb[12].mxu0  ;;  %v1064_v2 = vpop.f32.mrb[12].mxu1 }
 0x345   :  { %v952_v3 = vadd.f32 %v945_v63, %v810_v61  ;;  %v947_v4 = vpop.f32.mrb[13].mxu0  ;;  %v7109_v5 = vpop.f32.mrb[13].mxu1  ;;  %v1070_v15 = vadd.f32 %v1064_v2, %v812_v14  ;;  %v7775_v61 = vld [vmem:[#allocation7 + $0xec] ss:$16 sps:$4 sm:$0xff]   ;;  %v7777_v63 = vld [vmem:[#allocation7 + $0x28] ss:$16 sps:$4 sm:$0xff]  }
 0x346   :  { %v953_v6 = vadd.f32 %v947_v4, %v811_v62  ;;  %v949_v7 = vpop.f32.mrb[14].mxu0  ;;  %v1067_v9 = vpop.f32.mrb[14].mxu1  ;;  %v7776_v62 = vld [vmem:[#allocation7 + $0x8] ss:$16 sps:$4 sm:$0xff]  }
 0x347   :  { %v6249_v10 = vmul.f32 -1.442695, %v952_v3  ;;  %v950_v11 = vpop.f32.mrb[15].mxu0  ;;  %v7110_v12 = vpop.f32.mrb[15].mxu1  ;;  %v7778_v2 = vld [vmem:[#allocation7 + $0x48] ss:$16 sps:$4 sm:$0xff]  }
 0x348   :  { %v6250_v13 = vmul.f32 -1.442695, %v953_v6  ;;  %v7779_v3 = vld [vmem:[#allocation7 + $0x68] ss:$16 sps:$4 sm:$0xff]   ;;  %v1191_v9 = vld [vmem:[#allocation4 + $0x60] sm:$0xff] }
 0x349   :  { %8096 = vpow2.f32 %v6249_v10  ;;  %v7780_v4 = vld [vmem:[#allocation7 + $0x88] ss:$16 sps:$4 sm:$0xff]  }
 0x34a   :  { %8098 = vpow2.f32 %v6250_v13  ;;  %v7781_v5 = vld [vmem:[#allocation7 + $0xa8] ss:$16 sps:$4 sm:$0xff]  }
 0x34b   :  { %8100 = vtanh.f32 %v1070_v15  ;;  %v7782_v6 = vld [vmem:[#allocation7 + $0xc8] ss:$16 sps:$4 sm:$0xff]  }
 0x34c   :  { %v7783_v7 = vld [vmem:[#allocation7 + $0xe8] ss:$16 sps:$4 sm:$0xff]  }
 0x34d   :  { %v1192_v10 = vld [vmem:[#allocation4 + $0x68] sm:$0xff] }
 0x353   :  { %v8097_v16 = vpop.eup %8096 }
 0x354   :  { %v8099_v18 = vpop.eup %8098  ;;  %v960_v19 = vadd.f32 1.0, %v8097_v16 }
 0x355   :  { %v961_v20 = vadd.f32 1.0, %v8099_v18  ;;  %v8101_v21 = vpop.eup %8100 }
 0x356   :  { %8102 = vrcp.f32 %v960_v19 }
 0x357   :  { %8104 = vrcp.f32 %v961_v20 }
 0x360   :  { %v8103_v22 = vpop.eup %8102 }
 0x361   :  { %v8105_v23 = vpop.eup %8104  ;;  %v1184_v24 = vmul.f32 %v8103_v22, %v8101_v21 }
 0x362   :  { %v1183_v25 = vmul.f32 %v8105_v23, %v8562_v17 }
 0x364   :  { %v8636_v27 = vadd.f32 %v1184_v24, %v1183_v25  ;;  %v1170_v28 = vpop.f32.mrb[16].mxu0  ;;  %v1193_v24 = vld [vmem:[#allocation4 + $0x70] sm:$0xff] }
 0x365   :  { %v1176_v29 = vadd.f32 %v1170_v28, %v813_v26  ;;  %v7129_v8 = vpop.f32.mrb[17].mxu0 }
 0x366   :  { %v1173_v30 = vpop.f32.mrb[18].mxu0 }
 0x367   :  { %v6267_v31 = vmul.f32 -1.442695, %v1176_v29  ;;  %v7130_v32 = vpop.f32.mrb[19].mxu0 }
 0x369   :  { %8106 = vpow2.f32 %v6267_v31 }
 0x36a   :  { %8108 = vtanh.f32 %v8636_v27 }
 0x373   :  { %v8107_v33 = vpop.eup %8106 }
 0x374   :  { %v1180_v34 = vadd.f32 1.0, %v8107_v33  ;;  %v8109_v35 = vpop.eup %8108 }
 0x376   :  { %8110 = vrcp.f32 %v1180_v34  ;;  %v1194_v34 = vld [vmem:[#allocation4 + $0x78] sm:$0xff] }
 0x380   :  { %v8111_v36 = vpop.eup %8110 }
 0x381   :  { %v1187_v39 = vmul.f32 %v8111_v36, %v8109_v35 }
 0x383   :  { %1189 = vst [vmem:[#allocation9 + $0x10] sm:$0xff] %v1187_v39  ;;  %v1195_v17 = vpack.c.bf16 %v1187_v39, %v1187_v39 }
 0x385   :  { %1325 = vmatmul.mubr.bf16.vlgmr.msra.gmra.mrb[16].mxu1 %v1195_v17  ;;  %7148 = vmatmul.mubr.bf16.vlgmr.msra.gmra.mrb[20].mxu0 %v1195_v17 }
 0x386   :  { %7152 = vmatpush3.bf16.msra.mxu1 %v7768_v42  ;;  %7167 = vmatprep.mubr.msk.bf16.mxu1 %vm8416_vm0, %v8414_v0 }
 0x387   :  { %7153 = vmatprep.subr.bf16.mxu1 %v8414_v0  ;;  %1674 = vmatpush1.bf16.msra.mxu0 %v8580_v38 }
 0x388   :  { %1675 = vmatprep.subr.bf16.mxu0 %v8584_v40  ;;  %1705 = vmatprep.mubr.bf16.mxu0 %v8415_v1 }
 0x38a   :  { %7154 = vmatpush3.bf16.msra.mxu1 %v7769_v45 }
 0x38b   :  { %7155 = vmatprep.subr.bf16.mxu1 %v8414_v0  ;;  %1676 = vmatpush1.bf16.msra.mxu0 %v8586_v41 }
 0x38c   :  { %1677 = vmatprep.subr.bf16.mxu0 %v8591_v43 }
 0x38e   :  { %7156 = vmatpush3.bf16.msra.mxu1 %v7770_v48 }
 0x38f   :  { %7157 = vmatprep.subr.bf16.mxu1 %v8414_v0  ;;  %1678 = vmatpush1.bf16.msra.mxu0 %v8593_v44 }
 0x390   :  { %1679 = vmatprep.subr.bf16.mxu0 %v8598_v46 }
 0x392   :  { %7158 = vmatpush3.bf16.msra.mxu1 %v7771_v51 }
 0x393   :  { %7159 = vmatprep.subr.bf16.mxu1 %v8414_v0  ;;  %1680 = vmatpush1.bf16.msra.mxu0 %v8600_v47 }
 0x394   :  { %1681 = vmatprep.subr.bf16.mxu0 %v8605_v49 }
 0x396   :  { %7160 = vmatpush3.bf16.msra.mxu1 %v7772_v54 }
 0x397   :  { %7161 = vmatprep.subr.bf16.mxu1 %v8414_v0  ;;  %1682 = vmatpush1.bf16.msra.mxu0 %v8607_v50 }
 0x398   :  { %1683 = vmatprep.subr.bf16.mxu0 %v8614_v53 }
 0x39a   :  { %7162 = vmatpush3.bf16.msra.mxu1 %v7773_v57 }
 0x39b   :  { %7163 = vmatprep.subr.bf16.mxu1 %v8414_v0  ;;  %1684 = vmatpush1.bf16.msra.mxu0 %v8612_v52 }
 0x39c   :  { %1685 = vmatprep.subr.bf16.mxu0 %v8617_v55 }
 0x39e   :  { %7164 = vmatpush3.bf16.msra.mxu1 %v7774_v60 }
 0x39f   :  { %7165 = vmatprep.subr.bf16.mxu1 %v8414_v0  ;;  %1686 = vmatpush1.bf16.msra.mxu0 %v8621_v56 }
 0x3a0   :  { %1687 = vmatprep.subr.bf16.mxu0 %v8624_v58 }
 0x3a2   :  { %7166 = vmatpush3.bf16.msra.mxu1 %v7775_v61 }
 0x3a3   :  { %7171 = vmatprep.subr.bf16.mxu1 %v8414_v0  ;;  %1688 = vmatpush1.bf16.msra.mxu0 %v8628_v59 }
 0x3a4   :  { %7191 = vmatprep.subr.bf16.mxu0 %v8414_v0 }
 0x3a5   :  { %7168 = vmatmul.mubr.bf16.vlgmr.msra.gmra.mrb[20].mxu1 %v1195_v17 }
 0x3a6   :  { %7187 = vmatprep.mubr.msk.bf16.mxu1 %vm8416_vm0, %v8414_v0  ;;  %7172 = vmatpush3.bf16.msra.mxu1 %v7776_v62  ;;  %v7784_v62 = vld [vmem:[#allocation7 + $0xc] ss:$16 sps:$4 sm:$0xff]  }
 0x3a7   :  { %7173 = vmatprep.subr.bf16.mxu1 %v8414_v0 }
 0x3aa   :  { %7174 = vmatpush3.bf16.msra.mxu1 %v7777_v63  ;;  %v7785_v63 = vld [vmem:[#allocation7 + $0x2c] ss:$16 sps:$4 sm:$0xff]  }
 0x3ab   :  { %7175 = vmatprep.subr.bf16.mxu1 %v8414_v0 }
 0x3ae   :  { %7176 = vmatpush3.bf16.msra.mxu1 %v7778_v2  ;;  %v7786_v2 = vld [vmem:[#allocation7 + $0x4c] ss:$16 sps:$4 sm:$0xff]  }
 0x3af   :  { %7177 = vmatprep.subr.bf16.mxu1 %v8414_v0 }
 0x3b2   :  { %7178 = vmatpush3.bf16.msra.mxu1 %v7779_v3  ;;  %v7787_v3 = vld [vmem:[#allocation7 + $0x6c] ss:$16 sps:$4 sm:$0xff]  }
 0x3b3   :  { %7179 = vmatprep.subr.bf16.mxu1 %v8414_v0 }
 0x3b6   :  { %7180 = vmatpush3.bf16.msra.mxu1 %v7780_v4 }
 0x3b7   :  { %7181 = vmatprep.subr.bf16.mxu1 %v8414_v0 }
 0x3ba   :  { %7182 = vmatpush3.bf16.msra.mxu1 %v7781_v5 }
 0x3bb   :  { %7183 = vmatprep.subr.bf16.mxu1 %v8414_v0 }
 0x3be   :  { %7184 = vmatpush3.bf16.msra.mxu1 %v7782_v6 }
 0x3bf   :  { %7185 = vmatprep.subr.bf16.mxu1 %v8414_v0 }
 0x3c2   :  { %7186 = vmatpush3.bf16.msra.mxu1 %v7783_v7 }
 0x3c3   :  { %2054 = vmatprep.subr.bf16.mxu1 %v8578_v37 }
 0x458   :  { %v1326_v11 = vpop.f32.mrb[16].mxu1  ;;  %v1445_v12 = vpop.f32.mrb[20].mxu0 }
 0x459   :  { %v1333_v13 = vadd.f32 %v1326_v11, %v1191_v9  ;;  %v1328_v14 = vpop.f32.mrb[17].mxu1  ;;  %v7149_v15 = vpop.f32.mrb[21].mxu0  ;;  %v1451_v25 = vadd.f32 %v1445_v12, %v1193_v24 }
 0x45a   :  { %v1334_v16 = vadd.f32 %v1328_v14, %v1192_v10  ;;  %v1330_v18 = vpop.f32.mrb[18].mxu1  ;;  %v1448_v19 = vpop.f32.mrb[22].mxu0 }
 0x45b   :  { %v6284_v20 = vmul.f32 -1.442695, %v1333_v13  ;;  %v1331_v21 = vpop.f32.mrb[19].mxu1  ;;  %v7150_v22 = vpop.f32.mrb[23].mxu0 }
 0x45c   :  { %v6285_v23 = vmul.f32 -1.442695, %v1334_v16  ;;  %v1574_v16 = vld [vmem:[#allocation4 + $0x90] sm:$0xff] }
 0x45d   :  { %8112 = vpow2.f32 %v6284_v20 }
 0x45e   :  { %8114 = vpow2.f32 %v6285_v23 }
 0x45f   :  { %8116 = vtanh.f32 %v1451_v25 }
 0x467   :  { %v8113_v26 = vpop.eup %8112 }
 0x468   :  { %v8115_v37 = vpop.eup %8114  ;;  %v1341_v28 = vadd.f32 1.0, %v8113_v26 }
 0x469   :  { %v1342_v29 = vadd.f32 1.0, %v8115_v37  ;;  %v8117_v8 = vpop.eup %8116 }
 0x46a   :  { %8118 = vrcp.f32 %v1341_v28  ;;  %v1575_v28 = vld [vmem:[#allocation4 + $0x98] sm:$0xff] }
 0x46b   :  { %8120 = vrcp.f32 %v1342_v29 }
 0x474   :  { %v8119_v30 = vpop.eup %8118 }
 0x475   :  { %v8121_v31 = vpop.eup %8120  ;;  %v1565_v32 = vmul.f32 %v8119_v30, %v8117_v8 }
 0x476   :  { %v1564_v33 = vmul.f32 %v8121_v31, %v8636_v27 }
 0x478   :  { %v8677_v35 = vadd.f32 %v1565_v32, %v1564_v33  ;;  %v1551_v36 = vpop.f32.mrb[20].mxu1 }
 0x479   :  { %v1557_v39 = vadd.f32 %v1551_v36, %v1194_v34  ;;  %v7169_v42 = vpop.f32.mrb[21].mxu1 }
 0x47a   :  { %v1554_v17 = vpop.f32.mrb[22].mxu1 }
 0x47b   :  { %v6302_v45 = vmul.f32 -1.442695, %v1557_v39  ;;  %v7170_v48 = vpop.f32.mrb[23].mxu1 }
 0x47c   :  { %v7800_v48 = vld [vmem:[#allocation7 + $0xc] ss:$16 sps:$4 sm:$0xff]  }
 0x47d   :  { %8122 = vpow2.f32 %v6302_v45 }
 0x47e   :  { %8124 = vtanh.f32 %v8677_v35 }
 0x487   :  { %v8123_v51 = vpop.eup %8122 }
 0x488   :  { %v1561_v54 = vadd.f32 1.0, %v8123_v51  ;;  %v8125_v57 = vpop.eup %8124  ;;  %v7801_v51 = vld [vmem:[#allocation7 + $0x2c] ss:$16 sps:$4 sm:$0xff]  }
 0x48a   :  { %8126 = vrcp.f32 %v1561_v54  ;;  %v7802_v54 = vld [vmem:[#allocation7 + $0x4c] ss:$16 sps:$4 sm:$0xff]  }
 0x494   :  { %v8127_v60 = vpop.eup %8126 }
 0x495   :  { %v1568_v61 = vmul.f32 %v8127_v60, %v8125_v57  ;;  %v7803_v57 = vld [vmem:[#allocation7 + $0x6c] ss:$16 sps:$4 sm:$0xff]  }
 0x496   :  { %v7804_v60 = vld [vmem:[#allocation7 + $0x8c] ss:$16 sps:$4 sm:$0xff]  }
 0x497   :  { %1570 = vst [vmem:[#allocation9 + $0x18] sm:$0xff] %v1568_v61  ;;  %v1576_v27 = vpack.c.bf16 %v1568_v61, %v1568_v61  ;;  %v7805_v61 = vld [vmem:[#allocation7 + $0xac] ss:$16 sps:$4 sm:$0xff]  }
 0x499   :  { %1706 = vmatmul.mubr.bf16.vlgmr.msra.gmra.mrb[24].mxu0 %v1576_v27  ;;  %7188 = vmatmul.mubr.bf16.vlgmr.msra.gmra.mrb[24].mxu1 %v1576_v27 }
 0x49a   :  { %7192 = vmatpush3.bf16.msra.mxu0 %v7784_v62  ;;  %7207 = vmatprep.mubr.msk.bf16.mxu0 %vm8416_vm0, %v8414_v0  ;;  %v7806_v62 = vld [vmem:[#allocation7 + $0xcc] ss:$16 sps:$4 sm:$0xff]  }
 0x49b   :  { %7193 = vmatprep.subr.bf16.mxu0 %v8414_v0  ;;  %2055 = vmatpush1.bf16.msra.mxu1 %v8580_v38  ;;  %v7788_v38 = vld [vmem:[#allocation7 + $0x8c] ss:$16 sps:$4 sm:$0xff]  }
 0x49c   :  { %2056 = vmatprep.subr.bf16.mxu1 %v8584_v40  ;;  %2086 = vmatprep.mubr.bf16.mxu1 %v8415_v1  ;;  %v7789_v40 = vld [vmem:[#allocation7 + $0xac] ss:$16 sps:$4 sm:$0xff]  }
 0x49e   :  { %7194 = vmatpush3.bf16.msra.mxu0 %v7785_v63  ;;  %v8733_v63 = vld [vmem:[#allocation7 + $0x4] ss:$16 sps:$4 sm:$0xff]  }
 0x49f   :  { %7195 = vmatprep.subr.bf16.mxu0 %v8414_v0  ;;  %2057 = vmatpush1.bf16.msra.mxu1 %v8586_v41  ;;  %v7790_v41 = vld [vmem:[#allocation7 + $0xcc] ss:$16 sps:$4 sm:$0xff]  }
 0x4a0   :  { %2058 = vmatprep.subr.bf16.mxu1 %v8591_v43  ;;  %v7791_v43 = vld [vmem:[#allocation7 + $0xec] ss:$16 sps:$4 sm:$0xff]  }
 0x4a2   :  { %7196 = vmatpush3.bf16.msra.mxu0 %v7786_v2  ;;  %v8735_v2 = vld [vmem:[#allocation7] ss:$16 sps:$4 sm:$0xff]  }
 0x4a3   :  { %7197 = vmatprep.subr.bf16.mxu0 %v8414_v0  ;;  %2059 = vmatpush1.bf16.msra.mxu1 %v8593_v44  ;;  %v7792_v44 = vld [vmem:[#allocation7 + $0x8] ss:$16 sps:$4 sm:$0xff]  }
 0x4a4   :  { %2060 = vmatprep.subr.bf16.mxu1 %v8598_v46  ;;  %v7793_v46 = vld [vmem:[#allocation7 + $0x28] ss:$16 sps:$4 sm:$0xff]  }
 0x4a6   :  { %7198 = vmatpush3.bf16.msra.mxu0 %v7787_v3  ;;  %v7811_v3 = vld [vmem:[#allocation7 + $0x8] ss:$16 sps:$4 sm:$0xff]  }
 0x4a7   :  { %7199 = vmatprep.subr.bf16.mxu0 %v8414_v0  ;;  %2061 = vmatpush1.bf16.msra.mxu1 %v8600_v47  ;;  %v7794_v47 = vld [vmem:[#allocation7 + $0x48] ss:$16 sps:$4 sm:$0xff]  }
 0x4a8   :  { %2062 = vmatprep.subr.bf16.mxu1 %v8605_v49  ;;  %v7795_v49 = vld [vmem:[#allocation7 + $0x68] ss:$16 sps:$4 sm:$0xff]  }
 0x4aa   :  { %7200 = vmatpush3.bf16.msra.mxu0 %v7788_v38  ;;  %v8739_v38 = vld [vmem:[#allocation7 + $0x24] ss:$16 sps:$4 sm:$0xff]  }
 0x4ab   :  { %7201 = vmatprep.subr.bf16.mxu0 %v8414_v0  ;;  %2063 = vmatpush1.bf16.msra.mxu1 %v8607_v50  ;;  %v7796_v50 = vld [vmem:[#allocation7 + $0x88] ss:$16 sps:$4 sm:$0xff]  }
 0x4ac   :  { %2064 = vmatprep.subr.bf16.mxu1 %v8614_v53  ;;  %v7798_v53 = vld [vmem:[#allocation7 + $0xc8] ss:$16 sps:$4 sm:$0xff]  }
 0x4ae   :  { %7202 = vmatpush3.bf16.msra.mxu0 %v7789_v40  ;;  %v8741_v40 = vld [vmem:[#allocation7 + $0x20] ss:$16 sps:$4 sm:$0xff]  }
 0x4af   :  { %7203 = vmatprep.subr.bf16.mxu0 %v8414_v0  ;;  %2065 = vmatpush1.bf16.msra.mxu1 %v8612_v52  ;;  %v7797_v52 = vld [vmem:[#allocation7 + $0xa8] ss:$16 sps:$4 sm:$0xff]  }
 0x4b0   :  { %2066 = vmatprep.subr.bf16.mxu1 %v8617_v55  ;;  %v7799_v55 = vld [vmem:[#allocation7 + $0xe8] ss:$16 sps:$4 sm:$0xff]  }
 0x4b2   :  { %7204 = vmatpush3.bf16.msra.mxu0 %v7790_v41  ;;  %v7815_v41 = vld [vmem:[#allocation7 + $0x28] ss:$16 sps:$4 sm:$0xff]  }
 0x4b3   :  { %7205 = vmatprep.subr.bf16.mxu0 %v8414_v0  ;;  %2067 = vmatpush1.bf16.msra.mxu1 %v8621_v56  ;;  %v1572_v56 = vld [vmem:[#allocation4 + $0x80] sm:$0xff] }
 0x4b4   :  { %2068 = vmatprep.subr.bf16.mxu1 %v8624_v58  ;;  %v1573_v58 = vld [vmem:[#allocation4 + $0x88] sm:$0xff] }
 0x4b6   :  { %7206 = vmatpush3.bf16.msra.mxu0 %v7791_v43  ;;  %v8746_v43 = vld [vmem:[#allocation7 + $0x44] ss:$16 sps:$4 sm:$0xff]  }
 0x4b7   :  { %7211 = vmatprep.subr.bf16.mxu0 %v8414_v0  ;;  %2069 = vmatpush1.bf16.msra.mxu1 %v8628_v59 }
 0x4b8   :  { %7231 = vmatprep.subr.bf16.mxu1 %v8414_v0 }
 0x4b9   :  { %7208 = vmatmul.mubr.bf16.vlgmr.msra.gmra.mrb[28].mxu0 %v1576_v27  ;;  %v7807_v27 = vld [vmem:[#allocation7 + $0xec] ss:$16 sps:$4 sm:$0xff]  }
 0x4ba   :  { %7227 = vmatprep.mubr.msk.bf16.mxu0 %vm8416_vm0, %v8414_v0  ;;  %7212 = vmatpush3.bf16.msra.mxu0 %v7792_v44  ;;  %v8748_v44 = vld [vmem:[#allocation7 + $0x40] ss:$16 sps:$4 sm:$0xff]  }
 0x4bb   :  { %7213 = vmatprep.subr.bf16.mxu0 %v8414_v0 }
 0x4be   :  { %7214 = vmatpush3.bf16.msra.mxu0 %v7793_v46  ;;  %v7819_v46 = vld [vmem:[#allocation7 + $0x48] ss:$16 sps:$4 sm:$0xff]  }
 0x4bf   :  { %7215 = vmatprep.subr.bf16.mxu0 %v8414_v0 }
 0x4c2   :  { %7216 = vmatpush3.bf16.msra.mxu0 %v7794_v47  ;;  %v8753_v47 = vld [vmem:[#allocation7 + $0x64] ss:$16 sps:$4 sm:$0xff]  }
 0x4c3   :  { %7217 = vmatprep.subr.bf16.mxu0 %v8414_v0 }
 0x4c6   :  { %7218 = vmatpush3.bf16.msra.mxu0 %v7795_v49  ;;  %v8755_v49 = vld [vmem:[#allocation7 + $0x60] ss:$16 sps:$4 sm:$0xff]  }
 0x4c7   :  { %7219 = vmatprep.subr.bf16.mxu0 %v8414_v0 }
 0x4ca   :  { %7220 = vmatpush3.bf16.msra.mxu0 %v7796_v50  ;;  %v7823_v50 = vld [vmem:[#allocation7 + $0x68] ss:$16 sps:$4 sm:$0xff]  }
 0x4cb   :  { %7221 = vmatprep.subr.bf16.mxu0 %v8414_v0 }
 0x4ce   :  { %7222 = vmatpush3.bf16.msra.mxu0 %v7797_v52  ;;  %v8760_v52 = vld [vmem:[#allocation7 + $0x84] ss:$16 sps:$4 sm:$0xff]  }
 0x4cf   :  { %7223 = vmatprep.subr.bf16.mxu0 %v8414_v0 }
 0x4d2   :  { %7224 = vmatpush3.bf16.msra.mxu0 %v7798_v53  ;;  %v8762_v53 = vld [vmem:[#allocation7 + $0x80] ss:$16 sps:$4 sm:$0xff]  }
 0x4d3   :  { %7225 = vmatprep.subr.bf16.mxu0 %v8414_v0 }
 0x4d6   :  { %7226 = vmatpush3.bf16.msra.mxu0 %v7799_v55  ;;  %v7827_v55 = vld [vmem:[#allocation7 + $0x88] ss:$16 sps:$4 sm:$0xff]  }
 0x4d7   :  { %2435 = vmatprep.subr.bf16.mxu0 %v8733_v63 }
 0x56c   :  { %v1707_v59 = vpop.f32.mrb[24].mxu0  ;;  %v1826_v4 = vpop.f32.mrb[24].mxu1 }
 0x56d   :  { %v1714_v5 = vadd.f32 %v1707_v59, %v1572_v56  ;;  %v1709_v6 = vpop.f32.mrb[25].mxu0  ;;  %v7189_v7 = vpop.f32.mrb[25].mxu1  ;;  %v1832_v18 = vadd.f32 %v1826_v4, %v1574_v16  ;;  %v8767_v56 = vld [vmem:[#allocation7 + $0xa0] ss:$16 sps:$4 sm:$0xff]   ;;  %v7831_v59 = vld [vmem:[#allocation7 + $0xa8] ss:$16 sps:$4 sm:$0xff]  }
 0x56e   :  { %v1715_v9 = vadd.f32 %v1709_v6, %v1573_v58  ;;  %v1711_v10 = vpop.f32.mrb[26].mxu0  ;;  %v1829_v11 = vpop.f32.mrb[26].mxu1  ;;  %v8769_v58 = vld [vmem:[#allocation7 + $0xa4] ss:$16 sps:$4 sm:$0xff]   ;;  %v7835_v6 = vld [vmem:[#allocation7 + $0xc8] ss:$16 sps:$4 sm:$0xff]  }
 0x56f   :  { %v6319_v12 = vmul.f32 -1.442695, %v1714_v5  ;;  %v1712_v13 = vpop.f32.mrb[27].mxu0  ;;  %v7190_v14 = vpop.f32.mrb[27].mxu1  ;;  %v8772_v4 = vld [vmem:[#allocation7 + $0xc4] ss:$16 sps:$4 sm:$0xff]  }
 0x570   :  { %v6320_v15 = vmul.f32 -1.442695, %v1715_v9  ;;  %v8776_v5 = vld [vmem:[#allocation7 + $0xc0] ss:$16 sps:$4 sm:$0xff]   ;;  %v8779_v7 = vld [vmem:[#allocation7 + $0xe4] ss:$16 sps:$4 sm:$0xff]  }
 0x571   :  { %8128 = vpow2.f32 %v6319_v12  ;;  %v8783_v9 = vld [vmem:[#allocation7 + $0xe0] ss:$16 sps:$4 sm:$0xff]   ;;  %v7839_v10 = vld [vmem:[#allocation7 + $0xe8] ss:$16 sps:$4 sm:$0xff]  }
 0x572   :  { %8130 = vpow2.f32 %v6320_v15  ;;  %v1953_v11 = vld [vmem:[#allocation4 + $0xa0] sm:$0xff]  ;;  %v1954_v12 = vld [vmem:[#allocation4 + $0xa8] sm:$0xff] }
 0x573   :  { %8132 = vtanh.f32 %v1832_v18 }
 0x57b   :  { %v8129_v19 = vpop.eup %8128 }
 0x57c   :  { %v8131_v20 = vpop.eup %8130  ;;  %v1722_v21 = vadd.f32 1.0, %v8129_v19 }
 0x57d   :  { %v1723_v22 = vadd.f32 1.0, %v8131_v20  ;;  %v8133_v23 = vpop.eup %8132 }
 0x57e   :  { %8134 = vrcp.f32 %v1722_v21 }
 0x57f   :  { %8136 = vrcp.f32 %v1723_v22 }
 0x588   :  { %v8135_v24 = vpop.eup %8134 }
 0x589   :  { %v8137_v25 = vpop.eup %8136  ;;  %v1946_v26 = vmul.f32 %v8135_v24, %v8133_v23 }
 0x58a   :  { %v1945_v37 = vmul.f32 %v8137_v25, %v8677_v35 }
 0x58c   :  { %v8717_v29 = vadd.f32 %v1946_v26, %v1945_v37  ;;  %v1932_v8 = vpop.f32.mrb[28].mxu0  ;;  %v1955_v26 = vld [vmem:[#allocation4 + $0xb0] sm:$0xff] }
 0x58d   :  { %v1938_v30 = vadd.f32 %v1932_v8, %v1575_v28  ;;  %v7209_v31 = vpop.f32.mrb[29].mxu0 }
 0x58e   :  { %v1935_v32 = vpop.f32.mrb[30].mxu0 }
 0x58f   :  { %v6337_v33 = vmul.f32 -1.442695, %v1938_v30  ;;  %v7210_v34 = vpop.f32.mrb[31].mxu0 }
 0x591   :  { %8138 = vpow2.f32 %v6337_v33 }
 0x592   :  { %8140 = vtanh.f32 %v8717_v29 }
 0x59b   :  { %v8139_v36 = vpop.eup %8138 }
 0x59c   :  { %v1942_v39 = vadd.f32 1.0, %v8139_v36  ;;  %v8141_v42 = vpop.eup %8140 }
 0x59e   :  { %8142 = vrcp.f32 %v1942_v39 }
 0x5a8   :  { %v8143_v17 = vpop.eup %8142 }
 0x5a9   :  { %v1949_v45 = vmul.f32 %v8143_v17, %v8141_v42  ;;  %v1956_v42 = vld [vmem:[#allocation4 + $0xb8] sm:$0xff] }
 0x5ab   :  { %1951 = vst [vmem:[#allocation9 + $0x20] sm:$0xff] %v1949_v45  ;;  %v1957_v35 = vpack.c.bf16 %v1949_v45, %v1949_v45 }
 0x5ad   :  { %2087 = vmatmul.mubr.bf16.vlgmr.msra.gmra.mrb[28].mxu1 %v1957_v35  ;;  %7228 = vmatmul.mubr.bf16.vlgmr.msra.gmra.mrb[32].mxu0 %v1957_v35 }
 0x5ae   :  { %7232 = vmatpush3.bf16.msra.mxu1 %v7800_v48  ;;  %7247 = vmatprep.mubr.msk.bf16.mxu1 %vm8416_vm0, %v8414_v0 }
 0x5af   :  { %7233 = vmatprep.subr.bf16.mxu1 %v8414_v0  ;;  %2467 = vmatprep.mubr.bf16.mxu0 %v8415_v1 }
 0x5b0   :  { %2436 = vmatpush1.bf16.msra.mxu0 %v8735_v2 }
 0x5b1   :  { %2437 = vmatprep.subr.bf16.mxu0 %v8739_v38 }
 0x5b2   :  { %7234 = vmatpush3.bf16.msra.mxu1 %v7801_v51 }
 0x5b3   :  { %7235 = vmatprep.subr.bf16.mxu1 %v8414_v0 }
 0x5b4   :  { %2438 = vmatpush1.bf16.msra.mxu0 %v8741_v40 }
 0x5b5   :  { %2439 = vmatprep.subr.bf16.mxu0 %v8746_v43 }
 0x5b6   :  { %7236 = vmatpush3.bf16.msra.mxu1 %v7802_v54 }
 0x5b7   :  { %7237 = vmatprep.subr.bf16.mxu1 %v8414_v0 }
 0x5b8   :  { %2440 = vmatpush1.bf16.msra.mxu0 %v8748_v44 }
 0x5b9   :  { %2441 = vmatprep.subr.bf16.mxu0 %v8753_v47 }
 0x5ba   :  { %7238 = vmatpush3.bf16.msra.mxu1 %v7803_v57 }
 0x5bb   :  { %7239 = vmatprep.subr.bf16.mxu1 %v8414_v0 }
 0x5bc   :  { %2442 = vmatpush1.bf16.msra.mxu0 %v8755_v49 }
 0x5bd   :  { %2443 = vmatprep.subr.bf16.mxu0 %v8760_v52 }
 0x5be   :  { %7240 = vmatpush3.bf16.msra.mxu1 %v7804_v60 }
 0x5bf   :  { %7241 = vmatprep.subr.bf16.mxu1 %v8414_v0 }
 0x5c0   :  { %2444 = vmatpush1.bf16.msra.mxu0 %v8762_v53 }
 0x5c1   :  { %2445 = vmatprep.subr.bf16.mxu0 %v8769_v58 }
 0x5c2   :  { %7242 = vmatpush3.bf16.msra.mxu1 %v7805_v61 }
 0x5c3   :  { %7243 = vmatprep.subr.bf16.mxu1 %v8414_v0 }
 0x5c4   :  { %2446 = vmatpush1.bf16.msra.mxu0 %v8767_v56 }
 0x5c5   :  { %2447 = vmatprep.subr.bf16.mxu0 %v8772_v4 }
 0x5c6   :  { %7244 = vmatpush3.bf16.msra.mxu1 %v7806_v62 }
 0x5c7   :  { %7245 = vmatprep.subr.bf16.mxu1 %v8414_v0 }
 0x5c8   :  { %2448 = vmatpush1.bf16.msra.mxu0 %v8776_v5 }
 0x5c9   :  { %2449 = vmatprep.subr.bf16.mxu0 %v8779_v7 }
 0x5ca   :  { %7246 = vmatpush3.bf16.msra.mxu1 %v7807_v27 }
 0x5cb   :  { %7251 = vmatprep.subr.bf16.mxu1 %v8414_v0 }
 0x5cc   :  { %2450 = vmatpush1.bf16.msra.mxu0 %v8783_v9 }
 0x5cd   :  { %7248 = vmatmul.mubr.bf16.vlgmr.msra.gmra.mrb[32].mxu1 %v1957_v35  ;;  %7271 = vmatprep.subr.bf16.mxu0 %v8414_v0 }
 0x5ce   :  { %7267 = vmatprep.mubr.msk.bf16.mxu1 %vm8416_vm0, %v8414_v0  ;;  %7252 = vmatpush3.bf16.msra.mxu1 %v7811_v3 }
 0x5cf   :  { %7253 = vmatprep.subr.bf16.mxu1 %v8414_v0 }
 0x5d2   :  { %7254 = vmatpush3.bf16.msra.mxu1 %v7815_v41  ;;  %v7840_v41 = vld [vmem:[#allocation7 + $0xc] ss:$16 sps:$4 sm:$0xff]  }
 0x5d3   :  { %7255 = vmatprep.subr.bf16.mxu1 %v8414_v0 }
 0x5d6   :  { %7256 = vmatpush3.bf16.msra.mxu1 %v7819_v46  ;;  %v7841_v46 = vld [vmem:[#allocation7 + $0x2c] ss:$16 sps:$4 sm:$0xff]  }
 0x5d7   :  { %7257 = vmatprep.subr.bf16.mxu1 %v8414_v0 }
 0x5da   :  { %7258 = vmatpush3.bf16.msra.mxu1 %v7823_v50  ;;  %v7842_v50 = vld [vmem:[#allocation7 + $0x4c] ss:$16 sps:$4 sm:$0xff]  }
 0x5db   :  { %7259 = vmatprep.subr.bf16.mxu1 %v8414_v0 }
 0x5de   :  { %7260 = vmatpush3.bf16.msra.mxu1 %v7827_v55  ;;  %v7843_v55 = vld [vmem:[#allocation7 + $0x6c] ss:$16 sps:$4 sm:$0xff]  }
 0x5df   :  { %7261 = vmatprep.subr.bf16.mxu1 %v8414_v0 }
 0x5e2   :  { %7262 = vmatpush3.bf16.msra.mxu1 %v7831_v59  ;;  %v7844_v59 = vld [vmem:[#allocation7 + $0x8c] ss:$16 sps:$4 sm:$0xff]  }
 0x5e3   :  { %7263 = vmatprep.subr.bf16.mxu1 %v8414_v0 }
 0x5e6   :  { %7264 = vmatpush3.bf16.msra.mxu1 %v7835_v6  ;;  %v7845_v6 = vld [vmem:[#allocation7 + $0xac] ss:$16 sps:$4 sm:$0xff]  }
 0x5e7   :  { %7265 = vmatprep.subr.bf16.mxu1 %v8414_v0 }
 0x5ea   :  { %7266 = vmatpush3.bf16.msra.mxu1 %v7839_v10  ;;  %v7846_v10 = vld [vmem:[#allocation7 + $0xcc] ss:$16 sps:$4 sm:$0xff]  }
 0x5eb   :  { %2816 = vmatprep.subr.bf16.mxu1 %v8733_v63 }
 0x680   :  { %v2088_v13 = vpop.f32.mrb[28].mxu1  ;;  %v2207_v14 = vpop.f32.mrb[32].mxu0 }
 0x681   :  { %v2095_v15 = vadd.f32 %v2088_v13, %v1953_v11  ;;  %v2090_v16 = vpop.f32.mrb[29].mxu1  ;;  %v7229_v18 = vpop.f32.mrb[33].mxu0  ;;  %v2213_v37 = vadd.f32 %v2207_v14, %v1955_v26  ;;  %v7847_v11 = vld [vmem:[#allocation7 + $0xec] ss:$16 sps:$4 sm:$0xff]   ;;  %v7849_v13 = vld [vmem:[#allocation7 + $0x28] ss:$16 sps:$4 sm:$0xff]  }
 0x682   :  { %v2096_v19 = vadd.f32 %v2090_v16, %v1954_v12  ;;  %v2092_v20 = vpop.f32.mrb[30].mxu1  ;;  %v2210_v21 = vpop.f32.mrb[34].mxu0  ;;  %v7848_v12 = vld [vmem:[#allocation7 + $0x8] ss:$16 sps:$4 sm:$0xff]  }
 0x683   :  { %v6354_v22 = vmul.f32 -1.442695, %v2095_v15  ;;  %v2093_v23 = vpop.f32.mrb[31].mxu1  ;;  %v7230_v24 = vpop.f32.mrb[35].mxu0  ;;  %v7850_v14 = vld [vmem:[#allocation7 + $0x48] ss:$16 sps:$4 sm:$0xff]  }
 0x684   :  { %v6355_v25 = vmul.f32 -1.442695, %v2096_v19  ;;  %v7851_v15 = vld [vmem:[#allocation7 + $0x68] ss:$16 sps:$4 sm:$0xff]   ;;  %v2334_v21 = vld [vmem:[#allocation4 + $0xc0] sm:$0xff] }
 0x685   :  { %8144 = vpow2.f32 %v6354_v22  ;;  %v7852_v16 = vld [vmem:[#allocation7 + $0x88] ss:$16 sps:$4 sm:$0xff]  }
 0x686   :  { %8146 = vpow2.f32 %v6355_v25  ;;  %v7853_v18 = vld [vmem:[#allocation7 + $0xa8] ss:$16 sps:$4 sm:$0xff]  }
 0x687   :  { %8148 = vtanh.f32 %v2213_v37  ;;  %v7854_v19 = vld [vmem:[#allocation7 + $0xc8] ss:$16 sps:$4 sm:$0xff]  }
 0x688   :  { %v7855_v20 = vld [vmem:[#allocation7 + $0xe8] ss:$16 sps:$4 sm:$0xff]  }
 0x689   :  { %v2335_v22 = vld [vmem:[#allocation4 + $0xc8] sm:$0xff] }
 0x68f   :  { %v8145_v28 = vpop.eup %8144 }
 0x690   :  { %v8147_v8 = vpop.eup %8146  ;;  %v2103_v30 = vadd.f32 1.0, %v8145_v28 }
 0x691   :  { %v2104_v31 = vadd.f32 1.0, %v8147_v8  ;;  %v8149_v32 = vpop.eup %8148 }
 0x692   :  { %8150 = vrcp.f32 %v2103_v30 }
 0x693   :  { %8152 = vrcp.f32 %v2104_v31 }
 0x69c   :  { %v8151_v33 = vpop.eup %8150 }
 0x69d   :  { %v8153_v34 = vpop.eup %8152  ;;  %v2327_v36 = vmul.f32 %v8151_v33, %v8149_v32 }
 0x69e   :  { %v2326_v39 = vmul.f32 %v8153_v34, %v8717_v29 }
 0x6a0   :  { %v8791_v17 = vadd.f32 %v2327_v36, %v2326_v39  ;;  %v2313_v45 = vpop.f32.mrb[32].mxu1  ;;  %v2336_v36 = vld [vmem:[#allocation4 + $0xd0] sm:$0xff] }
 0x6a1   :  { %v2319_v48 = vadd.f32 %v2313_v45, %v1956_v42  ;;  %v7249_v35 = vpop.f32.mrb[33].mxu1 }
 0x6a2   :  { %v2316_v51 = vpop.f32.mrb[34].mxu1 }
 0x6a3   :  { %v6372_v54 = vmul.f32 -1.442695, %v2319_v48  ;;  %v7250_v57 = vpop.f32.mrb[35].mxu1 }
 0x6a5   :  { %8154 = vpow2.f32 %v6372_v54 }
 0x6a6   :  { %8156 = vtanh.f32 %v8791_v17 }
 0x6af   :  { %v8155_v60 = vpop.eup %8154 }
 0x6b0   :  { %v2323_v61 = vadd.f32 1.0, %v8155_v60  ;;  %v8157_v62 = vpop.eup %8156 }
 0x6b2   :  { %8158 = vrcp.f32 %v2323_v61  ;;  %v2337_v61 = vld [vmem:[#allocation4 + $0xd8] sm:$0xff] }
 0x6bc   :  { %v8159_v27 = vpop.eup %8158 }
 0x6bd   :  { %v2330_v3 = vmul.f32 %v8159_v27, %v8157_v62 }
 0x6bf   :  { %2332 = vst [vmem:[#allocation9 + $0x28] sm:$0xff] %v2330_v3  ;;  %v2338_v29 = vpack.c.bf16 %v2330_v3, %v2330_v3 }
 0x6c1   :  { %2468 = vmatmul.mubr.bf16.vlgmr.msra.gmra.mrb[36].mxu0 %v2338_v29  ;;  %7268 = vmatmul.mubr.bf16.vlgmr.msra.gmra.mrb[36].mxu1 %v2338_v29 }
 0x6c2   :  { %7272 = vmatpush3.bf16.msra.mxu0 %v7840_v41  ;;  %7287 = vmatprep.mubr.msk.bf16.mxu0 %vm8416_vm0, %v8414_v0 }
 0x6c3   :  { %7273 = vmatprep.subr.bf16.mxu0 %v8414_v0  ;;  %2817 = vmatpush1.bf16.msra.mxu1 %v8735_v2 }
 0x6c4   :  { %2818 = vmatprep.subr.bf16.mxu1 %v8739_v38  ;;  %2848 = vmatprep.mubr.bf16.mxu1 %v8415_v1 }
 0x6c6   :  { %7274 = vmatpush3.bf16.msra.mxu0 %v7841_v46 }
 0x6c7   :  { %7275 = vmatprep.subr.bf16.mxu0 %v8414_v0  ;;  %2819 = vmatpush1.bf16.msra.mxu1 %v8741_v40 }
 0x6c8   :  { %2820 = vmatprep.subr.bf16.mxu1 %v8746_v43 }
 0x6ca   :  { %7276 = vmatpush3.bf16.msra.mxu0 %v7842_v50 }
 0x6cb   :  { %7277 = vmatprep.subr.bf16.mxu0 %v8414_v0  ;;  %2821 = vmatpush1.bf16.msra.mxu1 %v8748_v44 }
 0x6cc   :  { %2822 = vmatprep.subr.bf16.mxu1 %v8753_v47 }
 0x6ce   :  { %7278 = vmatpush3.bf16.msra.mxu0 %v7843_v55 }
 0x6cf   :  { %7279 = vmatprep.subr.bf16.mxu0 %v8414_v0  ;;  %2823 = vmatpush1.bf16.msra.mxu1 %v8755_v49 }
 0x6d0   :  { %2824 = vmatprep.subr.bf16.mxu1 %v8760_v52 }
 0x6d2   :  { %7280 = vmatpush3.bf16.msra.mxu0 %v7844_v59 }
 0x6d3   :  { %7281 = vmatprep.subr.bf16.mxu0 %v8414_v0  ;;  %2825 = vmatpush1.bf16.msra.mxu1 %v8762_v53 }
 0x6d4   :  { %2826 = vmatprep.subr.bf16.mxu1 %v8769_v58 }
 0x6d6   :  { %7282 = vmatpush3.bf16.msra.mxu0 %v7845_v6 }
 0x6d7   :  { %7283 = vmatprep.subr.bf16.mxu0 %v8414_v0  ;;  %2827 = vmatpush1.bf16.msra.mxu1 %v8767_v56 }
 0x6d8   :  { %2828 = vmatprep.subr.bf16.mxu1 %v8772_v4 }
 0x6da   :  { %7284 = vmatpush3.bf16.msra.mxu0 %v7846_v10 }
 0x6db   :  { %7285 = vmatprep.subr.bf16.mxu0 %v8414_v0  ;;  %2829 = vmatpush1.bf16.msra.mxu1 %v8776_v5 }
 0x6dc   :  { %2830 = vmatprep.subr.bf16.mxu1 %v8779_v7 }
 0x6de   :  { %7286 = vmatpush3.bf16.msra.mxu0 %v7847_v11 }
 0x6df   :  { %7291 = vmatprep.subr.bf16.mxu0 %v8414_v0  ;;  %2831 = vmatpush1.bf16.msra.mxu1 %v8783_v9 }
 0x6e0   :  { %7311 = vmatprep.subr.bf16.mxu1 %v8414_v0 }
 0x6e1   :  { %7288 = vmatmul.mubr.bf16.vlgmr.msra.gmra.mrb[40].mxu0 %v2338_v29 }
 0x6e2   :  { %7307 = vmatprep.mubr.msk.bf16.mxu0 %vm8416_vm0, %v8414_v0  ;;  %7292 = vmatpush3.bf16.msra.mxu0 %v7848_v12  ;;  %v7856_v12 = vld [vmem:[#allocation7 + $0xc] ss:$16 sps:$4 sm:$0xff]  }
 0x6e3   :  { %7293 = vmatprep.subr.bf16.mxu0 %v8414_v0 }
 0x6e6   :  { %7294 = vmatpush3.bf16.msra.mxu0 %v7849_v13  ;;  %v7857_v13 = vld [vmem:[#allocation7 + $0x2c] ss:$16 sps:$4 sm:$0xff]  }
 0x6e7   :  { %7295 = vmatprep.subr.bf16.mxu0 %v8414_v0 }
 0x6ea   :  { %7296 = vmatpush3.bf16.msra.mxu0 %v7850_v14  ;;  %v7858_v14 = vld [vmem:[#allocation7 + $0x4c] ss:$16 sps:$4 sm:$0xff]  }
 0x6eb   :  { %7297 = vmatprep.subr.bf16.mxu0 %v8414_v0 }
 0x6ee   :  { %7298 = vmatpush3.bf16.msra.mxu0 %v7851_v15  ;;  %v7859_v15 = vld [vmem:[#allocation7 + $0x6c] ss:$16 sps:$4 sm:$0xff]  }
 0x6ef   :  { %7299 = vmatprep.subr.bf16.mxu0 %v8414_v0 }
 0x6f2   :  { %7300 = vmatpush3.bf16.msra.mxu0 %v7852_v16 }
 0x6f3   :  { %7301 = vmatprep.subr.bf16.mxu0 %v8414_v0 }
 0x6f6   :  { %7302 = vmatpush3.bf16.msra.mxu0 %v7853_v18 }
 0x6f7   :  { %7303 = vmatprep.subr.bf16.mxu0 %v8414_v0 }
 0x6fa   :  { %7304 = vmatpush3.bf16.msra.mxu0 %v7854_v19 }
 0x6fb   :  { %7305 = vmatprep.subr.bf16.mxu0 %v8414_v0 }
 0x6fe   :  { %7306 = vmatpush3.bf16.msra.mxu0 %v7855_v20 }
 0x6ff   :  { %3197 = vmatprep.subr.bf16.mxu0 %v8733_v63 }
 0x794   :  { %v2469_v23 = vpop.f32.mrb[36].mxu0  ;;  %v2588_v24 = vpop.f32.mrb[36].mxu1 }
 0x795   :  { %v2476_v25 = vadd.f32 %v2469_v23, %v2334_v21  ;;  %v2471_v26 = vpop.f32.mrb[37].mxu0  ;;  %v7269_v37 = vpop.f32.mrb[37].mxu1  ;;  %v2594_v39 = vadd.f32 %v2588_v24, %v2336_v36 }
 0x796   :  { %v2477_v28 = vadd.f32 %v2471_v26, %v2335_v22  ;;  %v2473_v8 = vpop.f32.mrb[38].mxu0  ;;  %v2591_v30 = vpop.f32.mrb[38].mxu1 }
 0x797   :  { %v6389_v31 = vmul.f32 -1.442695, %v2476_v25  ;;  %v2474_v32 = vpop.f32.mrb[39].mxu0  ;;  %v7270_v33 = vpop.f32.mrb[39].mxu1 }
 0x798   :  { %v6390_v34 = vmul.f32 -1.442695, %v2477_v28  ;;  %v2717_v28 = vld [vmem:[#allocation4 + $0xf0] sm:$0xff] }
 0x799   :  { %8160 = vpow2.f32 %v6389_v31 }
 0x79a   :  { %8162 = vpow2.f32 %v6390_v34 }
 0x79b   :  { %8164 = vtanh.f32 %v2594_v39 }
 0x7a3   :  { %v8161_v42 = vpop.eup %8160 }
 0x7a4   :  { %v8163_v63 = vpop.eup %8162  ;;  %v2484_v45 = vadd.f32 1.0, %v8161_v42 }
 0x7a5   :  { %v2485_v48 = vadd.f32 1.0, %v8163_v63  ;;  %v8165_v35 = vpop.eup %8164 }
 0x7a6   :  { %8166 = vrcp.f32 %v2484_v45  ;;  %v2718_v45 = vld [vmem:[#allocation4 + $0xf8] sm:$0xff] }
 0x7a7   :  { %8168 = vrcp.f32 %v2485_v48 }
 0x7b0   :  { %v8167_v51 = vpop.eup %8166 }
 0x7b1   :  { %v8169_v54 = vpop.eup %8168  ;;  %v2708_v57 = vmul.f32 %v8167_v51, %v8165_v35 }
 0x7b2   :  { %v2707_v60 = vmul.f32 %v8169_v54, %v8791_v17 }
 0x7b4   :  { %v8832_v62 = vadd.f32 %v2708_v57, %v2707_v60  ;;  %v2694_v27 = vpop.f32.mrb[40].mxu0 }
 0x7b5   :  { %v2700_v3 = vadd.f32 %v2694_v27, %v2337_v61  ;;  %v7289_v41 = vpop.f32.mrb[41].mxu0 }
 0x7b6   :  { %v2697_v29 = vpop.f32.mrb[42].mxu0 }
 0x7b7   :  { %v6407_v46 = vmul.f32 -1.442695, %v2700_v3  ;;  %v7290_v50 = vpop.f32.mrb[43].mxu0 }
 0x7b8   :  { %v7872_v50 = vld [vmem:[#allocation7 + $0xc] ss:$16 sps:$4 sm:$0xff]  }
 0x7b9   :  { %8170 = vpow2.f32 %v6407_v46 }
 0x7ba   :  { %8172 = vtanh.f32 %v8832_v62 }
 0x7c3   :  { %v8171_v55 = vpop.eup %8170 }
 0x7c4   :  { %v2704_v59 = vadd.f32 1.0, %v8171_v55  ;;  %v8173_v6 = vpop.eup %8172  ;;  %v7873_v55 = vld [vmem:[#allocation7 + $0x2c] ss:$16 sps:$4 sm:$0xff]  }
 0x7c6   :  { %8174 = vrcp.f32 %v2704_v59  ;;  %v7874_v59 = vld [vmem:[#allocation7 + $0x4c] ss:$16 sps:$4 sm:$0xff]  }
 0x7d0   :  { %v8175_v10 = vpop.eup %8174 }
 0x7d1   :  { %v2711_v11 = vmul.f32 %v8175_v10, %v8173_v6  ;;  %v7875_v6 = vld [vmem:[#allocation7 + $0x6c] ss:$16 sps:$4 sm:$0xff]  }
 0x7d2   :  { %v7876_v10 = vld [vmem:[#allocation7 + $0x8c] ss:$16 sps:$4 sm:$0xff]  }
 0x7d3   :  { %2713 = vst [vmem:[#allocation9 + $0x30] sm:$0xff] %v2711_v11  ;;  %v2719_v17 = vpack.c.bf16 %v2711_v11, %v2711_v11  ;;  %v7877_v11 = vld [vmem:[#allocation7 + $0xac] ss:$16 sps:$4 sm:$0xff]  }
 0x7d5   :  { %2849 = vmatmul.mubr.bf16.vlgmr.msra.gmra.mrb[40].mxu1 %v2719_v17  ;;  %7308 = vmatmul.mubr.bf16.vlgmr.msra.gmra.mrb[44].mxu0 %v2719_v17 }
 0x7d6   :  { %7312 = vmatpush3.bf16.msra.mxu1 %v7856_v12  ;;  %7327 = vmatprep.mubr.msk.bf16.mxu1 %vm8416_vm0, %v8414_v0  ;;  %v7878_v12 = vld [vmem:[#allocation7 + $0xcc] ss:$16 sps:$4 sm:$0xff]  }
 0x7d7   :  { %7313 = vmatprep.subr.bf16.mxu1 %v8414_v0  ;;  %3198 = vmatpush1.bf16.msra.mxu0 %v8735_v2  ;;  %v7860_v2 = vld [vmem:[#allocation7 + $0x8c] ss:$16 sps:$4 sm:$0xff]  }
 0x7d8   :  { %3199 = vmatprep.subr.bf16.mxu0 %v8739_v38  ;;  %3229 = vmatprep.mubr.bf16.mxu0 %v8415_v1  ;;  %v7861_v38 = vld [vmem:[#allocation7 + $0xac] ss:$16 sps:$4 sm:$0xff]  }
 0x7da   :  { %7314 = vmatpush3.bf16.msra.mxu1 %v7857_v13  ;;  %v8888_v13 = vld [vmem:[#allocation7 + $0x4] ss:$16 sps:$4 sm:$0xff]  }
 0x7db   :  { %7315 = vmatprep.subr.bf16.mxu1 %v8414_v0  ;;  %3200 = vmatpush1.bf16.msra.mxu0 %v8741_v40  ;;  %v7862_v40 = vld [vmem:[#allocation7 + $0xcc] ss:$16 sps:$4 sm:$0xff]  }
 0x7dc   :  { %3201 = vmatprep.subr.bf16.mxu0 %v8746_v43  ;;  %v7863_v43 = vld [vmem:[#allocation7 + $0xec] ss:$16 sps:$4 sm:$0xff]  }
 0x7de   :  { %7316 = vmatpush3.bf16.msra.mxu1 %v7858_v14  ;;  %v8890_v14 = vld [vmem:[#allocation7] ss:$16 sps:$4 sm:$0xff]  }
 0x7df   :  { %7317 = vmatprep.subr.bf16.mxu1 %v8414_v0  ;;  %3202 = vmatpush1.bf16.msra.mxu0 %v8748_v44  ;;  %v7864_v44 = vld [vmem:[#allocation7 + $0x8] ss:$16 sps:$4 sm:$0xff]  }
 0x7e0   :  { %3203 = vmatprep.subr.bf16.mxu0 %v8753_v47  ;;  %v7865_v47 = vld [vmem:[#allocation7 + $0x28] ss:$16 sps:$4 sm:$0xff]  }
 0x7e2   :  { %7318 = vmatpush3.bf16.msra.mxu1 %v7859_v15  ;;  %v7883_v15 = vld [vmem:[#allocation7 + $0x8] ss:$16 sps:$4 sm:$0xff]  }
 0x7e3   :  { %7319 = vmatprep.subr.bf16.mxu1 %v8414_v0  ;;  %3204 = vmatpush1.bf16.msra.mxu0 %v8755_v49  ;;  %v7866_v49 = vld [vmem:[#allocation7 + $0x48] ss:$16 sps:$4 sm:$0xff]  }
 0x7e4   :  { %3205 = vmatprep.subr.bf16.mxu0 %v8760_v52  ;;  %v7867_v52 = vld [vmem:[#allocation7 + $0x68] ss:$16 sps:$4 sm:$0xff]  }
 0x7e6   :  { %7320 = vmatpush3.bf16.msra.mxu1 %v7860_v2  ;;  %v8894_v2 = vld [vmem:[#allocation7 + $0x24] ss:$16 sps:$4 sm:$0xff]  }
 0x7e7   :  { %7321 = vmatprep.subr.bf16.mxu1 %v8414_v0  ;;  %3206 = vmatpush1.bf16.msra.mxu0 %v8762_v53  ;;  %v7868_v53 = vld [vmem:[#allocation7 + $0x88] ss:$16 sps:$4 sm:$0xff]  }
 0x7e8   :  { %3207 = vmatprep.subr.bf16.mxu0 %v8769_v58  ;;  %v7870_v58 = vld [vmem:[#allocation7 + $0xc8] ss:$16 sps:$4 sm:$0xff]  }
 0x7ea   :  { %7322 = vmatpush3.bf16.msra.mxu1 %v7861_v38  ;;  %v8896_v38 = vld [vmem:[#allocation7 + $0x20] ss:$16 sps:$4 sm:$0xff]  }
 0x7eb   :  { %7323 = vmatprep.subr.bf16.mxu1 %v8414_v0  ;;  %3208 = vmatpush1.bf16.msra.mxu0 %v8767_v56  ;;  %v7869_v56 = vld [vmem:[#allocation7 + $0xa8] ss:$16 sps:$4 sm:$0xff]  }
 0x7ec   :  { %3209 = vmatprep.subr.bf16.mxu0 %v8772_v4  ;;  %v7871_v4 = vld [vmem:[#allocation7 + $0xe8] ss:$16 sps:$4 sm:$0xff]  }
 0x7ee   :  { %7324 = vmatpush3.bf16.msra.mxu1 %v7862_v40  ;;  %v7887_v40 = vld [vmem:[#allocation7 + $0x28] ss:$16 sps:$4 sm:$0xff]  }
 0x7ef   :  { %7325 = vmatprep.subr.bf16.mxu1 %v8414_v0  ;;  %3210 = vmatpush1.bf16.msra.mxu0 %v8776_v5  ;;  %v2715_v5 = vld [vmem:[#allocation4 + $0xe0] sm:$0xff] }
 0x7f0   :  { %3211 = vmatprep.subr.bf16.mxu0 %v8779_v7  ;;  %v2716_v7 = vld [vmem:[#allocation4 + $0xe8] sm:$0xff] }
 0x7f2   :  { %7326 = vmatpush3.bf16.msra.mxu1 %v7863_v43  ;;  %v8901_v43 = vld [vmem:[#allocation7 + $0x44] ss:$16 sps:$4 sm:$0xff]  }
 0x7f3   :  { %7331 = vmatprep.subr.bf16.mxu1 %v8414_v0  ;;  %3212 = vmatpush1.bf16.msra.mxu0 %v8783_v9 }
 0x7f4   :  { %7351 = vmatprep.subr.bf16.mxu0 %v8414_v0 }
 0x7f5   :  { %7328 = vmatmul.mubr.bf16.vlgmr.msra.gmra.mrb[44].mxu1 %v2719_v17  ;;  %v7879_v17 = vld [vmem:[#allocation7 + $0xec] ss:$16 sps:$4 sm:$0xff]  }
 0x7f6   :  { %7347 = vmatprep.mubr.msk.bf16.mxu1 %vm8416_vm0, %v8414_v0  ;;  %7332 = vmatpush3.bf16.msra.mxu1 %v7864_v44  ;;  %v8903_v44 = vld [vmem:[#allocation7 + $0x40] ss:$16 sps:$4 sm:$0xff]  }
 0x7f7   :  { %7333 = vmatprep.subr.bf16.mxu1 %v8414_v0 }
 0x7fa   :  { %7334 = vmatpush3.bf16.msra.mxu1 %v7865_v47  ;;  %v7891_v47 = vld [vmem:[#allocation7 + $0x48] ss:$16 sps:$4 sm:$0xff]  }
 0x7fb   :  { %7335 = vmatprep.subr.bf16.mxu1 %v8414_v0 }
 0x7fe   :  { %7336 = vmatpush3.bf16.msra.mxu1 %v7866_v49  ;;  %v8908_v49 = vld [vmem:[#allocation7 + $0x64] ss:$16 sps:$4 sm:$0xff]  }
 0x7ff   :  { %7337 = vmatprep.subr.bf16.mxu1 %v8414_v0 }
 0x802   :  { %7338 = vmatpush3.bf16.msra.mxu1 %v7867_v52  ;;  %v8910_v52 = vld [vmem:[#allocation7 + $0x60] ss:$16 sps:$4 sm:$0xff]  }
 0x803   :  { %7339 = vmatprep.subr.bf16.mxu1 %v8414_v0 }
 0x806   :  { %7340 = vmatpush3.bf16.msra.mxu1 %v7868_v53  ;;  %v7895_v53 = vld [vmem:[#allocation7 + $0x68] ss:$16 sps:$4 sm:$0xff]  }
 0x807   :  { %7341 = vmatprep.subr.bf16.mxu1 %v8414_v0 }
 0x80a   :  { %7342 = vmatpush3.bf16.msra.mxu1 %v7869_v56  ;;  %v8915_v56 = vld [vmem:[#allocation7 + $0x84] ss:$16 sps:$4 sm:$0xff]  }
 0x80b   :  { %7343 = vmatprep.subr.bf16.mxu1 %v8414_v0 }
 0x80e   :  { %7344 = vmatpush3.bf16.msra.mxu1 %v7870_v58  ;;  %v8917_v58 = vld [vmem:[#allocation7 + $0x80] ss:$16 sps:$4 sm:$0xff]  }
 0x80f   :  { %7345 = vmatprep.subr.bf16.mxu1 %v8414_v0 }
 0x812   :  { %7346 = vmatpush3.bf16.msra.mxu1 %v7871_v4  ;;  %v7899_v4 = vld [vmem:[#allocation7 + $0x88] ss:$16 sps:$4 sm:$0xff]  }
 0x813   :  { %3578 = vmatprep.subr.bf16.mxu1 %v8888_v13 }
 0x8a8   :  { %v2850_v9 = vpop.f32.mrb[40].mxu1  ;;  %v2969_v16 = vpop.f32.mrb[44].mxu0 }
 0x8a9   :  { %v2857_v18 = vadd.f32 %v2850_v9, %v2715_v5  ;;  %v2852_v19 = vpop.f32.mrb[41].mxu1  ;;  %v7309_v20 = vpop.f32.mrb[45].mxu0  ;;  %v2975_v8 = vadd.f32 %v2969_v16, %v2717_v28  ;;  %v8922_v5 = vld [vmem:[#allocation7 + $0xa0] ss:$16 sps:$4 sm:$0xff]   ;;  %v7903_v9 = vld [vmem:[#allocation7 + $0xa8] ss:$16 sps:$4 sm:$0xff]  }
 0x8aa   :  { %v2858_v21 = vadd.f32 %v2852_v19, %v2716_v7  ;;  %v2854_v22 = vpop.f32.mrb[42].mxu1  ;;  %v2972_v23 = vpop.f32.mrb[46].mxu0  ;;  %v8924_v7 = vld [vmem:[#allocation7 + $0xa4] ss:$16 sps:$4 sm:$0xff]   ;;  %v7907_v19 = vld [vmem:[#allocation7 + $0xc8] ss:$16 sps:$4 sm:$0xff]  }
 0x8ab   :  { %v6424_v24 = vmul.f32 -1.442695, %v2857_v18  ;;  %v2855_v25 = vpop.f32.mrb[43].mxu1  ;;  %v7310_v26 = vpop.f32.mrb[47].mxu0  ;;  %v8927_v16 = vld [vmem:[#allocation7 + $0xc4] ss:$16 sps:$4 sm:$0xff]  }
 0x8ac   :  { %v6425_v37 = vmul.f32 -1.442695, %v2858_v21  ;;  %v8931_v18 = vld [vmem:[#allocation7 + $0xc0] ss:$16 sps:$4 sm:$0xff]   ;;  %v8934_v20 = vld [vmem:[#allocation7 + $0xe4] ss:$16 sps:$4 sm:$0xff]  }
 0x8ad   :  { %8176 = vpow2.f32 %v6424_v24  ;;  %v8938_v21 = vld [vmem:[#allocation7 + $0xe0] ss:$16 sps:$4 sm:$0xff]   ;;  %v7911_v22 = vld [vmem:[#allocation7 + $0xe8] ss:$16 sps:$4 sm:$0xff]  }
 0x8ae   :  { %8178 = vpow2.f32 %v6425_v37  ;;  %v3096_v23 = vld [vmem:[#allocation4 + $0x100] sm:$0xff]  ;;  %v3097_v24 = vld [vmem:[#allocation4 + $0x108] sm:$0xff] }
 0x8af   :  { %8180 = vtanh.f32 %v2975_v8 }
 0x8b7   :  { %v8177_v30 = vpop.eup %8176 }
 0x8b8   :  { %v8179_v31 = vpop.eup %8178  ;;  %v2865_v32 = vadd.f32 1.0, %v8177_v30 }
 0x8b9   :  { %v2866_v33 = vadd.f32 1.0, %v8179_v31  ;;  %v8181_v34 = vpop.eup %8180 }
 0x8ba   :  { %8182 = vrcp.f32 %v2865_v32 }
 0x8bb   :  { %8184 = vrcp.f32 %v2866_v33 }
 0x8c4   :  { %v8183_v36 = vpop.eup %8182 }
 0x8c5   :  { %v8185_v39 = vpop.eup %8184  ;;  %v3089_v42 = vmul.f32 %v8183_v36, %v8181_v34 }
 0x8c6   :  { %v3088_v63 = vmul.f32 %v8185_v39, %v8832_v62 }
 0x8c8   :  { %v8872_v48 = vadd.f32 %v3089_v42, %v3088_v63  ;;  %v3075_v35 = vpop.f32.mrb[44].mxu1  ;;  %v3098_v42 = vld [vmem:[#allocation4 + $0x110] sm:$0xff] }
 0x8c9   :  { %v3081_v51 = vadd.f32 %v3075_v35, %v2718_v45  ;;  %v7329_v54 = vpop.f32.mrb[45].mxu1 }
 0x8ca   :  { %v3078_v57 = vpop.f32.mrb[46].mxu1 }
 0x8cb   :  { %v6442_v60 = vmul.f32 -1.442695, %v3081_v51  ;;  %v7330_v61 = vpop.f32.mrb[47].mxu1 }
 0x8cd   :  { %8186 = vpow2.f32 %v6442_v60 }
 0x8ce   :  { %8188 = vtanh.f32 %v8872_v48 }
 0x8d7   :  { %v8187_v27 = vpop.eup %8186 }
 0x8d8   :  { %v3085_v3 = vadd.f32 1.0, %v8187_v27  ;;  %v8189_v41 = vpop.eup %8188 }
 0x8da   :  { %8190 = vrcp.f32 %v3085_v3 }
 0x8e4   :  { %v8191_v29 = vpop.eup %8190 }
 0x8e5   :  { %v3092_v46 = vmul.f32 %v8191_v29, %v8189_v41  ;;  %v3099_v41 = vld [vmem:[#allocation4 + $0x118] sm:$0xff] }
 0x8e7   :  { %3094 = vst [vmem:[#allocation9 + $0x38] sm:$0xff] %v3092_v46  ;;  %v3100_v62 = vpack.c.bf16 %v3092_v46, %v3092_v46 }
 0x8e9   :  { %3230 = vmatmul.mubr.bf16.vlgmr.msra.gmra.mrb[48].mxu0 %v3100_v62  ;;  %7348 = vmatmul.mubr.bf16.vlgmr.msra.gmra.mrb[48].mxu1 %v3100_v62 }
 0x8ea   :  { %7352 = vmatpush3.bf16.msra.mxu0 %v7872_v50  ;;  %7367 = vmatprep.mubr.msk.bf16.mxu0 %vm8416_vm0, %v8414_v0 }
 0x8eb   :  { %7353 = vmatprep.subr.bf16.mxu0 %v8414_v0  ;;  %3610 = vmatprep.mubr.bf16.mxu1 %v8415_v1 }
 0x8ec   :  { %3579 = vmatpush1.bf16.msra.mxu1 %v8890_v14 }
 0x8ed   :  { %3580 = vmatprep.subr.bf16.mxu1 %v8894_v2 }
 0x8ee   :  { %7354 = vmatpush3.bf16.msra.mxu0 %v7873_v55 }
 0x8ef   :  { %7355 = vmatprep.subr.bf16.mxu0 %v8414_v0 }
 0x8f0   :  { %3581 = vmatpush1.bf16.msra.mxu1 %v8896_v38 }
 0x8f1   :  { %3582 = vmatprep.subr.bf16.mxu1 %v8901_v43 }
 0x8f2   :  { %7356 = vmatpush3.bf16.msra.mxu0 %v7874_v59 }
 0x8f3   :  { %7357 = vmatprep.subr.bf16.mxu0 %v8414_v0 }
 0x8f4   :  { %3583 = vmatpush1.bf16.msra.mxu1 %v8903_v44 }
 0x8f5   :  { %3584 = vmatprep.subr.bf16.mxu1 %v8908_v49 }
 0x8f6   :  { %7358 = vmatpush3.bf16.msra.mxu0 %v7875_v6 }
 0x8f7   :  { %7359 = vmatprep.subr.bf16.mxu0 %v8414_v0 }
 0x8f8   :  { %3585 = vmatpush1.bf16.msra.mxu1 %v8910_v52 }
 0x8f9   :  { %3586 = vmatprep.subr.bf16.mxu1 %v8915_v56 }
 0x8fa   :  { %7360 = vmatpush3.bf16.msra.mxu0 %v7876_v10 }
 0x8fb   :  { %7361 = vmatprep.subr.bf16.mxu0 %v8414_v0 }
 0x8fc   :  { %3587 = vmatpush1.bf16.msra.mxu1 %v8917_v58 }
 0x8fd   :  { %3588 = vmatprep.subr.bf16.mxu1 %v8924_v7 }
 0x8fe   :  { %7362 = vmatpush3.bf16.msra.mxu0 %v7877_v11 }
 0x8ff   :  { %7363 = vmatprep.subr.bf16.mxu0 %v8414_v0 }
 0x900   :  { %3589 = vmatpush1.bf16.msra.mxu1 %v8922_v5 }
 0x901   :  { %3590 = vmatprep.subr.bf16.mxu1 %v8927_v16 }
 0x902   :  { %7364 = vmatpush3.bf16.msra.mxu0 %v7878_v12 }
 0x903   :  { %7365 = vmatprep.subr.bf16.mxu0 %v8414_v0 }
 0x904   :  { %3591 = vmatpush1.bf16.msra.mxu1 %v8931_v18 }
 0x905   :  { %3592 = vmatprep.subr.bf16.mxu1 %v8934_v20 }
 0x906   :  { %7366 = vmatpush3.bf16.msra.mxu0 %v7879_v17 }
 0x907   :  { %7371 = vmatprep.subr.bf16.mxu0 %v8414_v0 }
 0x908   :  { %3593 = vmatpush1.bf16.msra.mxu1 %v8938_v21 }
 0x909   :  { %7368 = vmatmul.mubr.bf16.vlgmr.msra.gmra.mrb[52].mxu0 %v3100_v62  ;;  %7391 = vmatprep.subr.bf16.mxu1 %v8414_v0 }
 0x90a   :  { %7387 = vmatprep.mubr.msk.bf16.mxu0 %vm8416_vm0, %v8414_v0  ;;  %7372 = vmatpush3.bf16.msra.mxu0 %v7883_v15 }
 0x90b   :  { %7373 = vmatprep.subr.bf16.mxu0 %v8414_v0 }
 0x90e   :  { %7374 = vmatpush3.bf16.msra.mxu0 %v7887_v40  ;;  %v7912_v40 = vld [vmem:[#allocation7 + $0xc] ss:$16 sps:$4 sm:$0xff]  }
 0x90f   :  { %7375 = vmatprep.subr.bf16.mxu0 %v8414_v0 }
 0x912   :  { %7376 = vmatpush3.bf16.msra.mxu0 %v7891_v47  ;;  %v7913_v47 = vld [vmem:[#allocation7 + $0x2c] ss:$16 sps:$4 sm:$0xff]  }
 0x913   :  { %7377 = vmatprep.subr.bf16.mxu0 %v8414_v0 }
 0x916   :  { %7378 = vmatpush3.bf16.msra.mxu0 %v7895_v53  ;;  %v7914_v53 = vld [vmem:[#allocation7 + $0x4c] ss:$16 sps:$4 sm:$0xff]  }
 0x917   :  { %7379 = vmatprep.subr.bf16.mxu0 %v8414_v0 }
 0x91a   :  { %7380 = vmatpush3.bf16.msra.mxu0 %v7899_v4  ;;  %v7915_v4 = vld [vmem:[#allocation7 + $0x6c] ss:$16 sps:$4 sm:$0xff]  }
 0x91b   :  { %7381 = vmatprep.subr.bf16.mxu0 %v8414_v0 }
 0x91e   :  { %7382 = vmatpush3.bf16.msra.mxu0 %v7903_v9  ;;  %v7916_v9 = vld [vmem:[#allocation7 + $0x8c] ss:$16 sps:$4 sm:$0xff]  }
 0x91f   :  { %7383 = vmatprep.subr.bf16.mxu0 %v8414_v0 }
 0x922   :  { %7384 = vmatpush3.bf16.msra.mxu0 %v7907_v19  ;;  %v7917_v19 = vld [vmem:[#allocation7 + $0xac] ss:$16 sps:$4 sm:$0xff]  }
 0x923   :  { %7385 = vmatprep.subr.bf16.mxu0 %v8414_v0 }
 0x926   :  { %7386 = vmatpush3.bf16.msra.mxu0 %v7911_v22  ;;  %v7918_v22 = vld [vmem:[#allocation7 + $0xcc] ss:$16 sps:$4 sm:$0xff]  }
 0x927   :  { %3959 = vmatprep.subr.bf16.mxu0 %v8888_v13 }
 0x9bc   :  { %v3231_v25 = vpop.f32.mrb[48].mxu0  ;;  %v3350_v26 = vpop.f32.mrb[48].mxu1 }
 0x9bd   :  { %v3238_v37 = vadd.f32 %v3231_v25, %v3096_v23  ;;  %v3233_v28 = vpop.f32.mrb[49].mxu0  ;;  %v7349_v8 = vpop.f32.mrb[49].mxu1  ;;  %v3356_v63 = vadd.f32 %v3350_v26, %v3098_v42  ;;  %v7919_v23 = vld [vmem:[#allocation7 + $0xec] ss:$16 sps:$4 sm:$0xff]   ;;  %v7921_v25 = vld [vmem:[#allocation7 + $0x28] ss:$16 sps:$4 sm:$0xff]  }
 0x9be   :  { %v3239_v30 = vadd.f32 %v3233_v28, %v3097_v24  ;;  %v3235_v31 = vpop.f32.mrb[50].mxu0  ;;  %v3353_v32 = vpop.f32.mrb[50].mxu1  ;;  %v7920_v24 = vld [vmem:[#allocation7 + $0x8] ss:$16 sps:$4 sm:$0xff]  }
 0x9bf   :  { %v6459_v33 = vmul.f32 -1.442695, %v3238_v37  ;;  %v3236_v34 = vpop.f32.mrb[51].mxu0  ;;  %v7350_v36 = vpop.f32.mrb[51].mxu1  ;;  %v7922_v26 = vld [vmem:[#allocation7 + $0x48] ss:$16 sps:$4 sm:$0xff]  }
 0x9c0   :  { %v6460_v39 = vmul.f32 -1.442695, %v3239_v30  ;;  %v7923_v37 = vld [vmem:[#allocation7 + $0x68] ss:$16 sps:$4 sm:$0xff]   ;;  %v3477_v32 = vld [vmem:[#allocation4 + $0x120] sm:$0xff] }
 0x9c1   :  { %8192 = vpow2.f32 %v6459_v33  ;;  %v7924_v28 = vld [vmem:[#allocation7 + $0x88] ss:$16 sps:$4 sm:$0xff]  }
 0x9c2   :  { %8194 = vpow2.f32 %v6460_v39  ;;  %v7925_v8 = vld [vmem:[#allocation7 + $0xa8] ss:$16 sps:$4 sm:$0xff]  }
 0x9c3   :  { %8196 = vtanh.f32 %v3356_v63  ;;  %v7926_v30 = vld [vmem:[#allocation7 + $0xc8] ss:$16 sps:$4 sm:$0xff]  }
 0x9c4   :  { %v7927_v31 = vld [vmem:[#allocation7 + $0xe8] ss:$16 sps:$4 sm:$0xff]  }
 0x9c5   :  { %v3478_v33 = vld [vmem:[#allocation4 + $0x128] sm:$0xff] }
 0x9cb   :  { %v8193_v45 = vpop.eup %8192 }
 0x9cc   :  { %v8195_v35 = vpop.eup %8194  ;;  %v3246_v51 = vadd.f32 1.0, %v8193_v45 }
 0x9cd   :  { %v3247_v54 = vadd.f32 1.0, %v8195_v35  ;;  %v8197_v57 = vpop.eup %8196 }
 0x9ce   :  { %8198 = vrcp.f32 %v3246_v51 }
 0x9cf   :  { %8200 = vrcp.f32 %v3247_v54 }
 0x9d8   :  { %v8199_v60 = vpop.eup %8198 }
 0x9d9   :  { %v8201_v61 = vpop.eup %8200  ;;  %v3470_v27 = vmul.f32 %v8199_v60, %v8197_v57 }
 0x9da   :  { %v3469_v3 = vmul.f32 %v8201_v61, %v8872_v48 }
 0x9dc   :  { %v8946_v29 = vadd.f32 %v3470_v27, %v3469_v3  ;;  %v3456_v46 = vpop.f32.mrb[52].mxu0  ;;  %v3479_v27 = vld [vmem:[#allocation4 + $0x130] sm:$0xff] }
 0x9dd   :  { %v3462_v50 = vadd.f32 %v3456_v46, %v3099_v41  ;;  %v7369_v62 = vpop.f32.mrb[53].mxu0 }
 0x9de   :  { %v3459_v55 = vpop.f32.mrb[54].mxu0 }
 0x9df   :  { %v6477_v59 = vmul.f32 -1.442695, %v3462_v50  ;;  %v7370_v6 = vpop.f32.mrb[55].mxu0 }
 0x9e1   :  { %8202 = vpow2.f32 %v6477_v59 }
 0x9e2   :  { %8204 = vtanh.f32 %v8946_v29 }
 0x9eb   :  { %v8203_v10 = vpop.eup %8202 }
 0x9ec   :  { %v3466_v11 = vadd.f32 1.0, %v8203_v10  ;;  %v8205_v12 = vpop.eup %8204 }
 0x9ee   :  { %8206 = vrcp.f32 %v3466_v11  ;;  %v3480_v11 = vld [vmem:[#allocation4 + $0x138] sm:$0xff] }
 0x9f8   :  { %v8207_v17 = vpop.eup %8206 }
 0x9f9   :  { %v3473_v15 = vmul.f32 %v8207_v17, %v8205_v12 }
 0x9fb   :  { %3475 = vst [vmem:[#allocation9 + $0x40] sm:$0xff] %v3473_v15  ;;  %v3481_v48 = vpack.c.bf16 %v3473_v15, %v3473_v15 }
 0x9fd   :  { %3611 = vmatmul.mubr.bf16.vlgmr.msra.gmra.mrb[52].mxu1 %v3481_v48  ;;  %7388 = vmatmul.mubr.bf16.vlgmr.msra.gmra.mrb[56].mxu0 %v3481_v48 }
 0x9fe   :  { %7392 = vmatpush3.bf16.msra.mxu1 %v7912_v40  ;;  %7407 = vmatprep.mubr.msk.bf16.mxu1 %vm8416_vm0, %v8414_v0 }
 0x9ff   :  { %7393 = vmatprep.subr.bf16.mxu1 %v8414_v0  ;;  %3960 = vmatpush1.bf16.msra.mxu0 %v8890_v14 }
 0xa00   :  { %3961 = vmatprep.subr.bf16.mxu0 %v8894_v2  ;;  %3991 = vmatprep.mubr.bf16.mxu0 %v8415_v1 }
 0xa02   :  { %7394 = vmatpush3.bf16.msra.mxu1 %v7913_v47 }
 0xa03   :  { %7395 = vmatprep.subr.bf16.mxu1 %v8414_v0  ;;  %3962 = vmatpush1.bf16.msra.mxu0 %v8896_v38 }
 0xa04   :  { %3963 = vmatprep.subr.bf16.mxu0 %v8901_v43 }
 0xa06   :  { %7396 = vmatpush3.bf16.msra.mxu1 %v7914_v53 }
 0xa07   :  { %7397 = vmatprep.subr.bf16.mxu1 %v8414_v0  ;;  %3964 = vmatpush1.bf16.msra.mxu0 %v8903_v44 }
 0xa08   :  { %3965 = vmatprep.subr.bf16.mxu0 %v8908_v49 }
 0xa0a   :  { %7398 = vmatpush3.bf16.msra.mxu1 %v7915_v4 }
 0xa0b   :  { %7399 = vmatprep.subr.bf16.mxu1 %v8414_v0  ;;  %3966 = vmatpush1.bf16.msra.mxu0 %v8910_v52 }
 0xa0c   :  { %3967 = vmatprep.subr.bf16.mxu0 %v8915_v56 }
 0xa0e   :  { %7400 = vmatpush3.bf16.msra.mxu1 %v7916_v9 }
 0xa0f   :  { %7401 = vmatprep.subr.bf16.mxu1 %v8414_v0  ;;  %3968 = vmatpush1.bf16.msra.mxu0 %v8917_v58 }
 0xa10   :  { %3969 = vmatprep.subr.bf16.mxu0 %v8924_v7 }
 0xa12   :  { %7402 = vmatpush3.bf16.msra.mxu1 %v7917_v19 }
 0xa13   :  { %7403 = vmatprep.subr.bf16.mxu1 %v8414_v0  ;;  %3970 = vmatpush1.bf16.msra.mxu0 %v8922_v5 }
 0xa14   :  { %3971 = vmatprep.subr.bf16.mxu0 %v8927_v16 }
 0xa16   :  { %7404 = vmatpush3.bf16.msra.mxu1 %v7918_v22 }
 0xa17   :  { %7405 = vmatprep.subr.bf16.mxu1 %v8414_v0  ;;  %3972 = vmatpush1.bf16.msra.mxu0 %v8931_v18 }
 0xa18   :  { %3973 = vmatprep.subr.bf16.mxu0 %v8934_v20 }
 0xa1a   :  { %7406 = vmatpush3.bf16.msra.mxu1 %v7919_v23 }
 0xa1b   :  { %7411 = vmatprep.subr.bf16.mxu1 %v8414_v0  ;;  %3974 = vmatpush1.bf16.msra.mxu0 %v8938_v21 }
 0xa1c   :  { %7431 = vmatprep.subr.bf16.mxu0 %v8414_v0 }
 0xa1d   :  { %7408 = vmatmul.mubr.bf16.vlgmr.msra.gmra.mrb[56].mxu1 %v3481_v48 }
 0xa1e   :  { %7427 = vmatprep.mubr.msk.bf16.mxu1 %vm8416_vm0, %v8414_v0  ;;  %7412 = vmatpush3.bf16.msra.mxu1 %v7920_v24  ;;  %v7928_v24 = vld [vmem:[#allocation7 + $0xc] ss:$16 sps:$4 sm:$0xff]  }
 0xa1f   :  { %7413 = vmatprep.subr.bf16.mxu1 %v8414_v0 }
 0xa22   :  { %7414 = vmatpush3.bf16.msra.mxu1 %v7921_v25  ;;  %v7929_v25 = vld [vmem:[#allocation7 + $0x2c] ss:$16 sps:$4 sm:$0xff]  }
 0xa23   :  { %7415 = vmatprep.subr.bf16.mxu1 %v8414_v0 }
 0xa26   :  { %7416 = vmatpush3.bf16.msra.mxu1 %v7922_v26  ;;  %v7930_v26 = vld [vmem:[#allocation7 + $0x4c] ss:$16 sps:$4 sm:$0xff]  }
 0xa27   :  { %7417 = vmatprep.subr.bf16.mxu1 %v8414_v0 }
 0xa2a   :  { %7418 = vmatpush3.bf16.msra.mxu1 %v7923_v37  ;;  %v7931_v37 = vld [vmem:[#allocation7 + $0x6c] ss:$16 sps:$4 sm:$0xff]  }
 0xa2b   :  { %7419 = vmatprep.subr.bf16.mxu1 %v8414_v0 }
 0xa2e   :  { %7420 = vmatpush3.bf16.msra.mxu1 %v7924_v28 }
 0xa2f   :  { %7421 = vmatprep.subr.bf16.mxu1 %v8414_v0 }
 0xa32   :  { %7422 = vmatpush3.bf16.msra.mxu1 %v7925_v8 }
 0xa33   :  { %7423 = vmatprep.subr.bf16.mxu1 %v8414_v0 }
 0xa36   :  { %7424 = vmatpush3.bf16.msra.mxu1 %v7926_v30 }
 0xa37   :  { %7425 = vmatprep.subr.bf16.mxu1 %v8414_v0 }
 0xa3a   :  { %7426 = vmatpush3.bf16.msra.mxu1 %v7927_v31 }
 0xa3b   :  { %4340 = vmatprep.subr.bf16.mxu1 %v8888_v13 }
 0xad0   :  { %v3612_v34 = vpop.f32.mrb[52].mxu1  ;;  %v3731_v36 = vpop.f32.mrb[56].mxu0 }
 0xad1   :  { %v3619_v39 = vadd.f32 %v3612_v34, %v3477_v32  ;;  %v3614_v42 = vpop.f32.mrb[53].mxu1  ;;  %v7389_v63 = vpop.f32.mrb[57].mxu0  ;;  %v3737_v3 = vadd.f32 %v3731_v36, %v3479_v27 }
 0xad2   :  { %v3620_v45 = vadd.f32 %v3614_v42, %v3478_v33  ;;  %v3616_v35 = vpop.f32.mrb[54].mxu1  ;;  %v3734_v51 = vpop.f32.mrb[58].mxu0 }
 0xad3   :  { %v6494_v54 = vmul.f32 -1.442695, %v3619_v39  ;;  %v3617_v57 = vpop.f32.mrb[55].mxu1  ;;  %v7390_v60 = vpop.f32.mrb[59].mxu0 }
 0xad4   :  { %v6495_v61 = vmul.f32 -1.442695, %v3620_v45  ;;  %v3860_v45 = vld [vmem:[#allocation4 + $0x150] sm:$0xff] }
 0xad5   :  { %8208 = vpow2.f32 %v6494_v54 }
 0xad6   :  { %8210 = vpow2.f32 %v6495_v61 }
 0xad7   :  { %8212 = vtanh.f32 %v3737_v3 }
 0xadf   :  { %v8209_v41 = vpop.eup %8208 }
 0xae0   :  { %v8211_v13 = vpop.eup %8210  ;;  %v3627_v46 = vadd.f32 1.0, %v8209_v41 }
 0xae1   :  { %v3628_v50 = vadd.f32 1.0, %v8211_v13  ;;  %v8213_v62 = vpop.eup %8212 }
 0xae2   :  { %8214 = vrcp.f32 %v3627_v46  ;;  %v3861_v46 = vld [vmem:[#allocation4 + $0x158] sm:$0xff] }
 0xae3   :  { %8216 = vrcp.f32 %v3628_v50 }
 0xaec   :  { %v8215_v55 = vpop.eup %8214 }
 0xaed   :  { %v8217_v59 = vpop.eup %8216  ;;  %v3851_v6 = vmul.f32 %v8215_v55, %v8213_v62 }
 0xaee   :  { %v3850_v10 = vmul.f32 %v8217_v59, %v8946_v29 }
 0xaf0   :  { %v8987_v12 = vadd.f32 %v3851_v6, %v3850_v10  ;;  %v3837_v17 = vpop.f32.mrb[56].mxu1 }
 0xaf1   :  { %v3843_v15 = vadd.f32 %v3837_v17, %v3480_v11  ;;  %v7409_v40 = vpop.f32.mrb[57].mxu1 }
 0xaf2   :  { %v3840_v48 = vpop.f32.mrb[58].mxu1 }
 0xaf3   :  { %v6512_v47 = vmul.f32 -1.442695, %v3843_v15  ;;  %v7410_v53 = vpop.f32.mrb[59].mxu1 }
 0xaf4   :  { %v7944_v53 = vld [vmem:[#allocation7 + $0xc] ss:$16 sps:$4 sm:$0xff]  }
 0xaf5   :  { %8218 = vpow2.f32 %v6512_v47 }
 0xaf6   :  { %8220 = vtanh.f32 %v8987_v12 }
 0xaff   :  { %v8219_v4 = vpop.eup %8218 }
 0xb00   :  { %v3847_v9 = vadd.f32 1.0, %v8219_v4  ;;  %v8221_v19 = vpop.eup %8220  ;;  %v7945_v4 = vld [vmem:[#allocation7 + $0x2c] ss:$16 sps:$4 sm:$0xff]  }
 0xb02   :  { %8222 = vrcp.f32 %v3847_v9  ;;  %v7946_v9 = vld [vmem:[#allocation7 + $0x4c] ss:$16 sps:$4 sm:$0xff]  }
 0xb0c   :  { %v8223_v22 = vpop.eup %8222 }
 0xb0d   :  { %v3854_v23 = vmul.f32 %v8223_v22, %v8221_v19  ;;  %v7947_v19 = vld [vmem:[#allocation7 + $0x6c] ss:$16 sps:$4 sm:$0xff]  }
 0xb0e   :  { %v7948_v22 = vld [vmem:[#allocation7 + $0x8c] ss:$16 sps:$4 sm:$0xff]  }
 0xb0f   :  { %3856 = vst [vmem:[#allocation9 + $0x48] sm:$0xff] %v3854_v23  ;;  %v3862_v29 = vpack.c.bf16 %v3854_v23, %v3854_v23  ;;  %v7949_v23 = vld [vmem:[#allocation7 + $0xac] ss:$16 sps:$4 sm:$0xff]  }
 0xb11   :  { %3992 = vmatmul.mubr.bf16.vlgmr.msra.gmra.mrb[60].mxu0 %v3862_v29  ;;  %7428 = vmatmul.mubr.bf16.vlgmr.msra.gmra.mrb[60].mxu1 %v3862_v29 }
 0xb12   :  { %7432 = vmatpush3.bf16.msra.mxu0 %v7928_v24  ;;  %7447 = vmatprep.mubr.msk.bf16.mxu0 %vm8416_vm0, %v8414_v0  ;;  %v7950_v24 = vld [vmem:[#allocation7 + $0xcc] ss:$16 sps:$4 sm:$0xff]  }
 0xb13   :  { %7433 = vmatprep.subr.bf16.mxu0 %v8414_v0  ;;  %4341 = vmatpush1.bf16.msra.mxu1 %v8890_v14  ;;  %v7932_v14 = vld [vmem:[#allocation7 + $0x8c] ss:$16 sps:$4 sm:$0xff]  }
 0xb14   :  { %4342 = vmatprep.subr.bf16.mxu1 %v8894_v2  ;;  %4372 = vmatprep.mubr.bf16.mxu1 %v8415_v1  ;;  %v7933_v2 = vld [vmem:[#allocation7 + $0xac] ss:$16 sps:$4 sm:$0xff]  }
 0xb16   :  { %7434 = vmatpush3.bf16.msra.mxu0 %v7929_v25  ;;  %v9043_v25 = vld [vmem:[#allocation7 + $0x4] ss:$16 sps:$4 sm:$0xff]  }
 0xb17   :  { %7435 = vmatprep.subr.bf16.mxu0 %v8414_v0  ;;  %4343 = vmatpush1.bf16.msra.mxu1 %v8896_v38  ;;  %v7934_v38 = vld [vmem:[#allocation7 + $0xcc] ss:$16 sps:$4 sm:$0xff]  }
 0xb18   :  { %4344 = vmatprep.subr.bf16.mxu1 %v8901_v43  ;;  %v7935_v43 = vld [vmem:[#allocation7 + $0xec] ss:$16 sps:$4 sm:$0xff]  }
 0xb1a   :  { %7436 = vmatpush3.bf16.msra.mxu0 %v7930_v26  ;;  %v9045_v26 = vld [vmem:[#allocation7] ss:$16 sps:$4 sm:$0xff]  }
 0xb1b   :  { %7437 = vmatprep.subr.bf16.mxu0 %v8414_v0  ;;  %4345 = vmatpush1.bf16.msra.mxu1 %v8903_v44  ;;  %v7936_v44 = vld [vmem:[#allocation7 + $0x8] ss:$16 sps:$4 sm:$0xff]  }
 0xb1c   :  { %4346 = vmatprep.subr.bf16.mxu1 %v8908_v49  ;;  %v7937_v49 = vld [vmem:[#allocation7 + $0x28] ss:$16 sps:$4 sm:$0xff]  }
 0xb1e   :  { %7438 = vmatpush3.bf16.msra.mxu0 %v7931_v37  ;;  %v7955_v37 = vld [vmem:[#allocation7 + $0x8] ss:$16 sps:$4 sm:$0xff]  }
 0xb1f   :  { %7439 = vmatprep.subr.bf16.mxu0 %v8414_v0  ;;  %4347 = vmatpush1.bf16.msra.mxu1 %v8910_v52  ;;  %v7938_v52 = vld [vmem:[#allocation7 + $0x48] ss:$16 sps:$4 sm:$0xff]  }
 0xb20   :  { %4348 = vmatprep.subr.bf16.mxu1 %v8915_v56  ;;  %v7939_v56 = vld [vmem:[#allocation7 + $0x68] ss:$16 sps:$4 sm:$0xff]  }
 0xb22   :  { %7440 = vmatpush3.bf16.msra.mxu0 %v7932_v14  ;;  %v9049_v14 = vld [vmem:[#allocation7 + $0x24] ss:$16 sps:$4 sm:$0xff]  }
 0xb23   :  { %7441 = vmatprep.subr.bf16.mxu0 %v8414_v0  ;;  %4349 = vmatpush1.bf16.msra.mxu1 %v8917_v58  ;;  %v7940_v58 = vld [vmem:[#allocation7 + $0x88] ss:$16 sps:$4 sm:$0xff]  }
 0xb24   :  { %4350 = vmatprep.subr.bf16.mxu1 %v8924_v7  ;;  %v7942_v7 = vld [vmem:[#allocation7 + $0xc8] ss:$16 sps:$4 sm:$0xff]  }
 0xb26   :  { %7442 = vmatpush3.bf16.msra.mxu0 %v7933_v2  ;;  %v9051_v2 = vld [vmem:[#allocation7 + $0x20] ss:$16 sps:$4 sm:$0xff]  }
 0xb27   :  { %7443 = vmatprep.subr.bf16.mxu0 %v8414_v0  ;;  %4351 = vmatpush1.bf16.msra.mxu1 %v8922_v5  ;;  %v7941_v5 = vld [vmem:[#allocation7 + $0xa8] ss:$16 sps:$4 sm:$0xff]  }
 0xb28   :  { %4352 = vmatprep.subr.bf16.mxu1 %v8927_v16  ;;  %v7943_v16 = vld [vmem:[#allocation7 + $0xe8] ss:$16 sps:$4 sm:$0xff]  }
 0xb2a   :  { %7444 = vmatpush3.bf16.msra.mxu0 %v7934_v38  ;;  %v7959_v38 = vld [vmem:[#allocation7 + $0x28] ss:$16 sps:$4 sm:$0xff]  }
 0xb2b   :  { %7445 = vmatprep.subr.bf16.mxu0 %v8414_v0  ;;  %4353 = vmatpush1.bf16.msra.mxu1 %v8931_v18  ;;  %v3858_v18 = vld [vmem:[#allocation4 + $0x140] sm:$0xff] }
 0xb2c   :  { %4354 = vmatprep.subr.bf16.mxu1 %v8934_v20  ;;  %v3859_v20 = vld [vmem:[#allocation4 + $0x148] sm:$0xff] }
 0xb2e   :  { %7446 = vmatpush3.bf16.msra.mxu0 %v7935_v43  ;;  %v9056_v43 = vld [vmem:[#allocation7 + $0x44] ss:$16 sps:$4 sm:$0xff]  }
 0xb2f   :  { %7451 = vmatprep.subr.bf16.mxu0 %v8414_v0  ;;  %4355 = vmatpush1.bf16.msra.mxu1 %v8938_v21 }
 0xb30   :  { %7471 = vmatprep.subr.bf16.mxu1 %v8414_v0 }
 0xb31   :  { %7448 = vmatmul.mubr.bf16.vlgmr.msra.gmra.mrb[64].mxu0 %v3862_v29  ;;  %v7951_v29 = vld [vmem:[#allocation7 + $0xec] ss:$16 sps:$4 sm:$0xff]  }
 0xb32   :  { %7467 = vmatprep.mubr.msk.bf16.mxu0 %vm8416_vm0, %v8414_v0  ;;  %7452 = vmatpush3.bf16.msra.mxu0 %v7936_v44  ;;  %v9058_v44 = vld [vmem:[#allocation7 + $0x40] ss:$16 sps:$4 sm:$0xff]  }
 0xb33   :  { %7453 = vmatprep.subr.bf16.mxu0 %v8414_v0 }
 0xb36   :  { %7454 = vmatpush3.bf16.msra.mxu0 %v7937_v49  ;;  %v7963_v49 = vld [vmem:[#allocation7 + $0x48] ss:$16 sps:$4 sm:$0xff]  }
 0xb37   :  { %7455 = vmatprep.subr.bf16.mxu0 %v8414_v0 }
 0xb3a   :  { %7456 = vmatpush3.bf16.msra.mxu0 %v7938_v52  ;;  %v9063_v52 = vld [vmem:[#allocation7 + $0x64] ss:$16 sps:$4 sm:$0xff]  }
 0xb3b   :  { %7457 = vmatprep.subr.bf16.mxu0 %v8414_v0 }
 0xb3e   :  { %7458 = vmatpush3.bf16.msra.mxu0 %v7939_v56  ;;  %v9065_v56 = vld [vmem:[#allocation7 + $0x60] ss:$16 sps:$4 sm:$0xff]  }
 0xb3f   :  { %7459 = vmatprep.subr.bf16.mxu0 %v8414_v0 }
 0xb42   :  { %7460 = vmatpush3.bf16.msra.mxu0 %v7940_v58  ;;  %v7967_v58 = vld [vmem:[#allocation7 + $0x68] ss:$16 sps:$4 sm:$0xff]  }
 0xb43   :  { %7461 = vmatprep.subr.bf16.mxu0 %v8414_v0 }
 0xb46   :  { %7462 = vmatpush3.bf16.msra.mxu0 %v7941_v5  ;;  %v9070_v5 = vld [vmem:[#allocation7 + $0x84] ss:$16 sps:$4 sm:$0xff]  }
 0xb47   :  { %7463 = vmatprep.subr.bf16.mxu0 %v8414_v0 }
 0xb4a   :  { %7464 = vmatpush3.bf16.msra.mxu0 %v7942_v7  ;;  %v9072_v7 = vld [vmem:[#allocation7 + $0x80] ss:$16 sps:$4 sm:$0xff]  }
 0xb4b   :  { %7465 = vmatprep.subr.bf16.mxu0 %v8414_v0 }
 0xb4e   :  { %7466 = vmatpush3.bf16.msra.mxu0 %v7943_v16  ;;  %v7971_v16 = vld [vmem:[#allocation7 + $0x88] ss:$16 sps:$4 sm:$0xff]  }
 0xb4f   :  { %4721 = vmatprep.subr.bf16.mxu0 %v9043_v25 }
 0xbe4   :  { %v3993_v21 = vpop.f32.mrb[60].mxu0  ;;  %v4112_v28 = vpop.f32.mrb[60].mxu1 }
 0xbe5   :  { %v4000_v8 = vadd.f32 %v3993_v21, %v3858_v18  ;;  %v3995_v30 = vpop.f32.mrb[61].mxu0  ;;  %v7429_v31 = vpop.f32.mrb[61].mxu1  ;;  %v4118_v35 = vadd.f32 %v4112_v28, %v3860_v45  ;;  %v9077_v18 = vld [vmem:[#allocation7 + $0xa0] ss:$16 sps:$4 sm:$0xff]   ;;  %v7975_v21 = vld [vmem:[#allocation7 + $0xa8] ss:$16 sps:$4 sm:$0xff]  }
 0xbe6   :  { %v4001_v32 = vadd.f32 %v3995_v30, %v3859_v20  ;;  %v3997_v33 = vpop.f32.mrb[62].mxu0  ;;  %v4115_v34 = vpop.f32.mrb[62].mxu1  ;;  %v9079_v20 = vld [vmem:[#allocation7 + $0xa4] ss:$16 sps:$4 sm:$0xff]   ;;  %v7979_v30 = vld [vmem:[#allocation7 + $0xc8] ss:$16 sps:$4 sm:$0xff]  }
 0xbe7   :  { %v6529_v36 = vmul.f32 -1.442695, %v4000_v8  ;;  %v3998_v39 = vpop.f32.mrb[63].mxu0  ;;  %v7430_v42 = vpop.f32.mrb[63].mxu1  ;;  %v9082_v28 = vld [vmem:[#allocation7 + $0xc4] ss:$16 sps:$4 sm:$0xff]  }
 0xbe8   :  { %v6530_v63 = vmul.f32 -1.442695, %v4001_v32  ;;  %v9086_v8 = vld [vmem:[#allocation7 + $0xc0] ss:$16 sps:$4 sm:$0xff]   ;;  %v9089_v31 = vld [vmem:[#allocation7 + $0xe4] ss:$16 sps:$4 sm:$0xff]  }
 0xbe9   :  { %8224 = vpow2.f32 %v6529_v36  ;;  %v9093_v32 = vld [vmem:[#allocation7 + $0xe0] ss:$16 sps:$4 sm:$0xff]   ;;  %v7983_v33 = vld [vmem:[#allocation7 + $0xe8] ss:$16 sps:$4 sm:$0xff]  }
 0xbea   :  { %8226 = vpow2.f32 %v6530_v63  ;;  %v4239_v34 = vld [vmem:[#allocation4 + $0x160] sm:$0xff]  ;;  %v4240_v36 = vld [vmem:[#allocation4 + $0x168] sm:$0xff] }
 0xbeb   :  { %8228 = vtanh.f32 %v4118_v35 }
 0xbf3   :  { %v8225_v51 = vpop.eup %8224 }
 0xbf4   :  { %v8227_v54 = vpop.eup %8226  ;;  %v4008_v57 = vadd.f32 1.0, %v8225_v51 }
 0xbf5   :  { %v4009_v60 = vadd.f32 1.0, %v8227_v54  ;;  %v8229_v61 = vpop.eup %8228 }
 0xbf6   :  { %8230 = vrcp.f32 %v4008_v57 }
 0xbf7   :  { %8232 = vrcp.f32 %v4009_v60 }
 0xc00   :  { %v8231_v27 = vpop.eup %8230 }
 0xc01   :  { %v8233_v3 = vpop.eup %8232  ;;  %v4232_v41 = vmul.f32 %v8231_v27, %v8229_v61 }
 0xc02   :  { %v4231_v13 = vmul.f32 %v8233_v3, %v8987_v12 }
 0xc04   :  { %v9027_v50 = vadd.f32 %v4232_v41, %v4231_v13  ;;  %v4218_v62 = vpop.f32.mrb[64].mxu0  ;;  %v4241_v41 = vld [vmem:[#allocation4 + $0x170] sm:$0xff] }
 0xc05   :  { %v4224_v55 = vadd.f32 %v4218_v62, %v3861_v46  ;;  %v7449_v59 = vpop.f32.mrb[65].mxu0 }
 0xc06   :  { %v4221_v6 = vpop.f32.mrb[66].mxu0 }
 0xc07   :  { %v6547_v10 = vmul.f32 -1.442695, %v4224_v55  ;;  %v7450_v11 = vpop.f32.mrb[67].mxu0 }
 0xc09   :  { %8234 = vpow2.f32 %v6547_v10 }
 0xc0a   :  { %8236 = vtanh.f32 %v9027_v50 }
 0xc13   :  { %v8235_v17 = vpop.eup %8234 }
 0xc14   :  { %v4228_v15 = vadd.f32 1.0, %v8235_v17  ;;  %v8237_v40 = vpop.eup %8236 }
 0xc16   :  { %8238 = vrcp.f32 %v4228_v15 }
 0xc20   :  { %v8239_v48 = vpop.eup %8238 }
 0xc21   :  { %v4235_v47 = vmul.f32 %v8239_v48, %v8237_v40  ;;  %v4242_v40 = vld [vmem:[#allocation4 + $0x178] sm:$0xff] }
 0xc23   :  { %4237 = vst [vmem:[#allocation9 + $0x50] sm:$0xff] %v4235_v47  ;;  %v4243_v12 = vpack.c.bf16 %v4235_v47, %v4235_v47 }
 0xc25   :  { %4373 = vmatmul.mubr.bf16.vlgmr.msra.gmra.mrb[64].mxu1 %v4243_v12  ;;  %7468 = vmatmul.mubr.bf16.vlgmr.msra.gmra.mrb[68].mxu0 %v4243_v12 }
 0xc26   :  { %7472 = vmatpush3.bf16.msra.mxu1 %v7944_v53  ;;  %7487 = vmatprep.mubr.msk.bf16.mxu1 %vm8416_vm0, %v8414_v0 }
 0xc27   :  { %7473 = vmatprep.subr.bf16.mxu1 %v8414_v0  ;;  %4753 = vmatprep.mubr.bf16.mxu0 %v8415_v1 }
 0xc28   :  { %4722 = vmatpush1.bf16.msra.mxu0 %v9045_v26 }
 0xc29   :  { %4723 = vmatprep.subr.bf16.mxu0 %v9049_v14 }
 0xc2a   :  { %7474 = vmatpush3.bf16.msra.mxu1 %v7945_v4 }
 0xc2b   :  { %7475 = vmatprep.subr.bf16.mxu1 %v8414_v0 }
 0xc2c   :  { %4724 = vmatpush1.bf16.msra.mxu0 %v9051_v2 }
 0xc2d   :  { %4725 = vmatprep.subr.bf16.mxu0 %v9056_v43 }
 0xc2e   :  { %7476 = vmatpush3.bf16.msra.mxu1 %v7946_v9 }
 0xc2f   :  { %7477 = vmatprep.subr.bf16.mxu1 %v8414_v0 }
 0xc30   :  { %4726 = vmatpush1.bf16.msra.mxu0 %v9058_v44 }
 0xc31   :  { %4727 = vmatprep.subr.bf16.mxu0 %v9063_v52 }
 0xc32   :  { %7478 = vmatpush3.bf16.msra.mxu1 %v7947_v19 }
 0xc33   :  { %7479 = vmatprep.subr.bf16.mxu1 %v8414_v0 }
 0xc34   :  { %4728 = vmatpush1.bf16.msra.mxu0 %v9065_v56 }
 0xc35   :  { %4729 = vmatprep.subr.bf16.mxu0 %v9070_v5 }
 0xc36   :  { %7480 = vmatpush3.bf16.msra.mxu1 %v7948_v22 }
 0xc37   :  { %7481 = vmatprep.subr.bf16.mxu1 %v8414_v0 }
 0xc38   :  { %4730 = vmatpush1.bf16.msra.mxu0 %v9072_v7 }
 0xc39   :  { %4731 = vmatprep.subr.bf16.mxu0 %v9079_v20 }
 0xc3a   :  { %7482 = vmatpush3.bf16.msra.mxu1 %v7949_v23 }
 0xc3b   :  { %7483 = vmatprep.subr.bf16.mxu1 %v8414_v0 }
 0xc3c   :  { %4732 = vmatpush1.bf16.msra.mxu0 %v9077_v18 }
 0xc3d   :  { %4733 = vmatprep.subr.bf16.mxu0 %v9082_v28 }
 0xc3e   :  { %7484 = vmatpush3.bf16.msra.mxu1 %v7950_v24 }
 0xc3f   :  { %7485 = vmatprep.subr.bf16.mxu1 %v8414_v0 }
 0xc40   :  { %4734 = vmatpush1.bf16.msra.mxu0 %v9086_v8 }
 0xc41   :  { %4735 = vmatprep.subr.bf16.mxu0 %v9089_v31 }
 0xc42   :  { %7486 = vmatpush3.bf16.msra.mxu1 %v7951_v29 }
 0xc43   :  { %7491 = vmatprep.subr.bf16.mxu1 %v8414_v0 }
 0xc44   :  { %4736 = vmatpush1.bf16.msra.mxu0 %v9093_v32 }
 0xc45   :  { %7488 = vmatmul.mubr.bf16.vlgmr.msra.gmra.mrb[68].mxu1 %v4243_v12  ;;  %7511 = vmatprep.subr.bf16.mxu0 %v8414_v0 }
 0xc46   :  { %7507 = vmatprep.mubr.msk.bf16.mxu1 %vm8416_vm0, %v8414_v0  ;;  %7492 = vmatpush3.bf16.msra.mxu1 %v7955_v37 }
 0xc47   :  { %7493 = vmatprep.subr.bf16.mxu1 %v8414_v0 }
 0xc4a   :  { %7494 = vmatpush3.bf16.msra.mxu1 %v7959_v38  ;;  %v7984_v38 = vld [vmem:[#allocation7 + $0xc] ss:$16 sps:$4 sm:$0xff]  }
 0xc4b   :  { %7495 = vmatprep.subr.bf16.mxu1 %v8414_v0 }
 0xc4e   :  { %7496 = vmatpush3.bf16.msra.mxu1 %v7963_v49  ;;  %v7985_v49 = vld [vmem:[#allocation7 + $0x2c] ss:$16 sps:$4 sm:$0xff]  }
 0xc4f   :  { %7497 = vmatprep.subr.bf16.mxu1 %v8414_v0 }
 0xc52   :  { %7498 = vmatpush3.bf16.msra.mxu1 %v7967_v58  ;;  %v7986_v58 = vld [vmem:[#allocation7 + $0x4c] ss:$16 sps:$4 sm:$0xff]  }
 0xc53   :  { %7499 = vmatprep.subr.bf16.mxu1 %v8414_v0 }
 0xc56   :  { %7500 = vmatpush3.bf16.msra.mxu1 %v7971_v16  ;;  %v7987_v16 = vld [vmem:[#allocation7 + $0x6c] ss:$16 sps:$4 sm:$0xff]  }
 0xc57   :  { %7501 = vmatprep.subr.bf16.mxu1 %v8414_v0 }
 0xc5a   :  { %7502 = vmatpush3.bf16.msra.mxu1 %v7975_v21  ;;  %v7988_v21 = vld [vmem:[#allocation7 + $0x8c] ss:$16 sps:$4 sm:$0xff]  }
 0xc5b   :  { %7503 = vmatprep.subr.bf16.mxu1 %v8414_v0 }
 0xc5e   :  { %7504 = vmatpush3.bf16.msra.mxu1 %v7979_v30  ;;  %v7989_v30 = vld [vmem:[#allocation7 + $0xac] ss:$16 sps:$4 sm:$0xff]  }
 0xc5f   :  { %7505 = vmatprep.subr.bf16.mxu1 %v8414_v0 }
 0xc62   :  { %7506 = vmatpush3.bf16.msra.mxu1 %v7983_v33  ;;  %v7990_v33 = vld [vmem:[#allocation7 + $0xcc] ss:$16 sps:$4 sm:$0xff]  }
 0xc63   :  { %5102 = vmatprep.subr.bf16.mxu1 %v9043_v25 }
 0xcf8   :  { %v4374_v39 = vpop.f32.mrb[64].mxu1  ;;  %v4493_v42 = vpop.f32.mrb[68].mxu0 }
 0xcf9   :  { %v4381_v63 = vadd.f32 %v4374_v39, %v4239_v34  ;;  %v4376_v45 = vpop.f32.mrb[65].mxu1  ;;  %v7469_v35 = vpop.f32.mrb[69].mxu0  ;;  %v4499_v13 = vadd.f32 %v4493_v42, %v4241_v41  ;;  %v7991_v34 = vld [vmem:[#allocation7 + $0xec] ss:$16 sps:$4 sm:$0xff]   ;;  %v7993_v39 = vld [vmem:[#allocation7 + $0x28] ss:$16 sps:$4 sm:$0xff]  }
 0xcfa   :  { %v4382_v51 = vadd.f32 %v4376_v45, %v4240_v36  ;;  %v4378_v54 = vpop.f32.mrb[66].mxu1  ;;  %v4496_v57 = vpop.f32.mrb[70].mxu0  ;;  %v7992_v36 = vld [vmem:[#allocation7 + $0x8] ss:$16 sps:$4 sm:$0xff]  }
 0xcfb   :  { %v6564_v60 = vmul.f32 -1.442695, %v4381_v63  ;;  %v4379_v61 = vpop.f32.mrb[67].mxu1  ;;  %v7470_v27 = vpop.f32.mrb[71].mxu0  ;;  %v7994_v42 = vld [vmem:[#allocation7 + $0x48] ss:$16 sps:$4 sm:$0xff]  }
 0xcfc   :  { %v6565_v3 = vmul.f32 -1.442695, %v4382_v51  ;;  %v7995_v63 = vld [vmem:[#allocation7 + $0x68] ss:$16 sps:$4 sm:$0xff]   ;;  %v4620_v57 = vld [vmem:[#allocation4 + $0x180] sm:$0xff] }
 0xcfd   :  { %8240 = vpow2.f32 %v6564_v60  ;;  %v7996_v45 = vld [vmem:[#allocation7 + $0x88] ss:$16 sps:$4 sm:$0xff]  }
 0xcfe   :  { %8242 = vpow2.f32 %v6565_v3  ;;  %v7997_v35 = vld [vmem:[#allocation7 + $0xa8] ss:$16 sps:$4 sm:$0xff]  }
 0xcff   :  { %8244 = vtanh.f32 %v4499_v13  ;;  %v7998_v51 = vld [vmem:[#allocation7 + $0xc8] ss:$16 sps:$4 sm:$0xff]  }
 0xd00   :  { %v7999_v54 = vld [vmem:[#allocation7 + $0xe8] ss:$16 sps:$4 sm:$0xff]  }
 0xd01   :  { %v4621_v60 = vld [vmem:[#allocation4 + $0x188] sm:$0xff] }
 0xd07   :  { %v8241_v46 = vpop.eup %8240 }
 0xd08   :  { %v8243_v62 = vpop.eup %8242  ;;  %v4389_v55 = vadd.f32 1.0, %v8241_v46 }
 0xd09   :  { %v4390_v59 = vadd.f32 1.0, %v8243_v62  ;;  %v8245_v6 = vpop.eup %8244 }
 0xd0a   :  { %8246 = vrcp.f32 %v4389_v55 }
 0xd0b   :  { %8248 = vrcp.f32 %v4390_v59 }
 0xd14   :  { %v8247_v10 = vpop.eup %8246 }
 0xd15   :  { %v8249_v11 = vpop.eup %8248  ;;  %v4613_v17 = vmul.f32 %v8247_v10, %v8245_v6 }
 0xd16   :  { %v4612_v15 = vmul.f32 %v8249_v11, %v9027_v50 }
 0xd18   :  { %v9101_v48 = vadd.f32 %v4613_v17, %v4612_v15  ;;  %v4599_v47 = vpop.f32.mrb[68].mxu1  ;;  %v4622_v17 = vld [vmem:[#allocation4 + $0x190] sm:$0xff] }
 0xd19   :  { %v4605_v53 = vadd.f32 %v4599_v47, %v4242_v40  ;;  %v7489_v12 = vpop.f32.mrb[69].mxu1 }
 0xd1a   :  { %v4602_v4 = vpop.f32.mrb[70].mxu1 }
 0xd1b   :  { %v6582_v9 = vmul.f32 -1.442695, %v4605_v53  ;;  %v7490_v19 = vpop.f32.mrb[71].mxu1 }
 0xd1d   :  { %8250 = vpow2.f32 %v6582_v9 }
 0xd1e   :  { %8252 = vtanh.f32 %v9101_v48 }
 0xd27   :  { %v8251_v22 = vpop.eup %8250 }
 0xd28   :  { %v4609_v23 = vadd.f32 1.0, %v8251_v22  ;;  %v8253_v24 = vpop.eup %8252 }
 0xd2a   :  { %8254 = vrcp.f32 %v4609_v23  ;;  %v4623_v23 = vld [vmem:[#allocation4 + $0x198] sm:$0xff] }
 0xd34   :  { %v8255_v29 = vpop.eup %8254 }
 0xd35   :  { %v4616_v37 = vmul.f32 %v8255_v29, %v8253_v24 }
 0xd37   :  { %4618 = vst [vmem:[#allocation9 + $0x58] sm:$0xff] %v4616_v37  ;;  %v4624_v50 = vpack.c.bf16 %v4616_v37, %v4616_v37 }
 0xd39   :  { %4754 = vmatmul.mubr.bf16.vlgmr.msra.gmra.mrb[72].mxu0 %v4624_v50  ;;  %7508 = vmatmul.mubr.bf16.vlgmr.msra.gmra.mrb[72].mxu1 %v4624_v50 }
 0xd3a   :  { %7512 = vmatpush3.bf16.msra.mxu0 %v7984_v38  ;;  %7527 = vmatprep.mubr.msk.bf16.mxu0 %vm8416_vm0, %v8414_v0 }
 0xd3b   :  { %7513 = vmatprep.subr.bf16.mxu0 %v8414_v0  ;;  %5103 = vmatpush1.bf16.msra.mxu1 %v9045_v26 }
 0xd3c   :  { %5104 = vmatprep.subr.bf16.mxu1 %v9049_v14  ;;  %5134 = vmatprep.mubr.bf16.mxu1 %v8415_v1 }
 0xd3e   :  { %7514 = vmatpush3.bf16.msra.mxu0 %v7985_v49 }
 0xd3f   :  { %7515 = vmatprep.subr.bf16.mxu0 %v8414_v0  ;;  %5105 = vmatpush1.bf16.msra.mxu1 %v9051_v2 }
 0xd40   :  { %5106 = vmatprep.subr.bf16.mxu1 %v9056_v43 }
 0xd42   :  { %7516 = vmatpush3.bf16.msra.mxu0 %v7986_v58 }
 0xd43   :  { %7517 = vmatprep.subr.bf16.mxu0 %v8414_v0  ;;  %5107 = vmatpush1.bf16.msra.mxu1 %v9058_v44 }
 0xd44   :  { %5108 = vmatprep.subr.bf16.mxu1 %v9063_v52 }
 0xd46   :  { %7518 = vmatpush3.bf16.msra.mxu0 %v7987_v16 }
 0xd47   :  { %7519 = vmatprep.subr.bf16.mxu0 %v8414_v0  ;;  %5109 = vmatpush1.bf16.msra.mxu1 %v9065_v56 }
 0xd48   :  { %5110 = vmatprep.subr.bf16.mxu1 %v9070_v5 }
 0xd4a   :  { %7520 = vmatpush3.bf16.msra.mxu0 %v7988_v21 }
 0xd4b   :  { %7521 = vmatprep.subr.bf16.mxu0 %v8414_v0  ;;  %5111 = vmatpush1.bf16.msra.mxu1 %v9072_v7 }
 0xd4c   :  { %5112 = vmatprep.subr.bf16.mxu1 %v9079_v20 }
 0xd4e   :  { %7522 = vmatpush3.bf16.msra.mxu0 %v7989_v30 }
 0xd4f   :  { %7523 = vmatprep.subr.bf16.mxu0 %v8414_v0  ;;  %5113 = vmatpush1.bf16.msra.mxu1 %v9077_v18 }
 0xd50   :  { %5114 = vmatprep.subr.bf16.mxu1 %v9082_v28 }
 0xd52   :  { %7524 = vmatpush3.bf16.msra.mxu0 %v7990_v33 }
 0xd53   :  { %7525 = vmatprep.subr.bf16.mxu0 %v8414_v0  ;;  %5115 = vmatpush1.bf16.msra.mxu1 %v9086_v8 }
 0xd54   :  { %5116 = vmatprep.subr.bf16.mxu1 %v9089_v31 }
 0xd56   :  { %7526 = vmatpush3.bf16.msra.mxu0 %v7991_v34 }
 0xd57   :  { %7531 = vmatprep.subr.bf16.mxu0 %v8414_v0  ;;  %5117 = vmatpush1.bf16.msra.mxu1 %v9093_v32 }
 0xd58   :  { %7551 = vmatprep.subr.bf16.mxu1 %v8414_v0 }
 0xd59   :  { %7528 = vmatmul.mubr.bf16.vlgmr.msra.gmra.mrb[76].mxu0 %v4624_v50 }
 0xd5a   :  { %7547 = vmatprep.mubr.msk.bf16.mxu0 %vm8416_vm0, %v8414_v0  ;;  %7532 = vmatpush3.bf16.msra.mxu0 %v7992_v36  ;;  %v8000_v36 = vld [vmem:[#allocation7 + $0xc] ss:$16 sps:$4 sm:$0xff]  }
 0xd5b   :  { %7533 = vmatprep.subr.bf16.mxu0 %v8414_v0 }
 0xd5e   :  { %7534 = vmatpush3.bf16.msra.mxu0 %v7993_v39  ;;  %v8001_v39 = vld [vmem:[#allocation7 + $0x2c] ss:$16 sps:$4 sm:$0xff]  }
 0xd5f   :  { %7535 = vmatprep.subr.bf16.mxu0 %v8414_v0 }
 0xd62   :  { %7536 = vmatpush3.bf16.msra.mxu0 %v7994_v42  ;;  %v8002_v42 = vld [vmem:[#allocation7 + $0x4c] ss:$16 sps:$4 sm:$0xff]  }
 0xd63   :  { %7537 = vmatprep.subr.bf16.mxu0 %v8414_v0 }
 0xd66   :  { %7538 = vmatpush3.bf16.msra.mxu0 %v7995_v63  ;;  %v8003_v63 = vld [vmem:[#allocation7 + $0x6c] ss:$16 sps:$4 sm:$0xff]  }
 0xd67   :  { %7539 = vmatprep.subr.bf16.mxu0 %v8414_v0 }
 0xd6a   :  { %7540 = vmatpush3.bf16.msra.mxu0 %v7996_v45 }
 0xd6b   :  { %7541 = vmatprep.subr.bf16.mxu0 %v8414_v0 }
 0xd6e   :  { %7542 = vmatpush3.bf16.msra.mxu0 %v7997_v35 }
 0xd6f   :  { %7543 = vmatprep.subr.bf16.mxu0 %v8414_v0 }
 0xd72   :  { %7544 = vmatpush3.bf16.msra.mxu0 %v7998_v51 }
 0xd73   :  { %7545 = vmatprep.subr.bf16.mxu0 %v8414_v0 }
 0xd76   :  { %7546 = vmatpush3.bf16.msra.mxu0 %v7999_v54 }
 0xd77   :  { %5483 = vmatprep.subr.bf16.mxu0 %v9043_v25 }
 0xe0c   :  { %v4755_v61 = vpop.f32.mrb[72].mxu0  ;;  %v4874_v27 = vpop.f32.mrb[72].mxu1 }
 0xe0d   :  { %v4762_v3 = vadd.f32 %v4755_v61, %v4620_v57  ;;  %v4757_v41 = vpop.f32.mrb[73].mxu0  ;;  %v7509_v13 = vpop.f32.mrb[73].mxu1  ;;  %v4880_v15 = vadd.f32 %v4874_v27, %v4622_v17 }
 0xe0e   :  { %v4763_v46 = vadd.f32 %v4757_v41, %v4621_v60  ;;  %v4759_v62 = vpop.f32.mrb[74].mxu0  ;;  %v4877_v55 = vpop.f32.mrb[74].mxu1 }
 0xe0f   :  { %v6599_v59 = vmul.f32 -1.442695, %v4762_v3  ;;  %v4760_v6 = vpop.f32.mrb[75].mxu0  ;;  %v7510_v10 = vpop.f32.mrb[75].mxu1 }
 0xe10   :  { %v6600_v11 = vmul.f32 -1.442695, %v4763_v46  ;;  %v5003_v46 = vld [vmem:[#allocation4 + $0x1b0] sm:$0xff] }
 0xe11   :  { %8256 = vpow2.f32 %v6599_v59 }
 0xe12   :  { %8258 = vpow2.f32 %v6600_v11 }
 0xe13   :  { %8260 = vtanh.f32 %v4880_v15 }
 0xe1b   :  { %v8257_v40 = vpop.eup %8256 }
 0xe1c   :  { %v8259_v25 = vpop.eup %8258  ;;  %v4770_v47 = vadd.f32 1.0, %v8257_v40 }
 0xe1d   :  { %v4771_v53 = vadd.f32 1.0, %v8259_v25  ;;  %v8261_v12 = vpop.eup %8260 }
 0xe1e   :  { %8262 = vrcp.f32 %v4770_v47  ;;  %v5004_v47 = vld [vmem:[#allocation4 + $0x1b8] sm:$0xff] }
 0xe1f   :  { %8264 = vrcp.f32 %v4771_v53 }
 0xe28   :  { %v8263_v4 = vpop.eup %8262 }
 0xe29   :  { %v8265_v9 = vpop.eup %8264  ;;  %v4994_v19 = vmul.f32 %v8263_v4, %v8261_v12 }
 0xe2a   :  { %v4993_v22 = vmul.f32 %v8265_v9, %v9101_v48 }
 0xe2c   :  { %v9142_v24 = vadd.f32 %v4994_v19, %v4993_v22  ;;  %v4980_v29 = vpop.f32.mrb[76].mxu0 }
 0xe2d   :  { %v4986_v37 = vadd.f32 %v4980_v29, %v4623_v23  ;;  %v7529_v38 = vpop.f32.mrb[77].mxu0 }
 0xe2e   :  { %v4983_v50 = vpop.f32.mrb[78].mxu0 }
 0xe2f   :  { %v6617_v49 = vmul.f32 -1.442695, %v4986_v37  ;;  %v7530_v58 = vpop.f32.mrb[79].mxu0 }
 0xe30   :  { %v8016_v58 = vld [vmem:[#allocation7 + $0xc] ss:$16 sps:$4 sm:$0xff]  }
 0xe31   :  { %8266 = vpow2.f32 %v6617_v49 }
 0xe32   :  { %8268 = vtanh.f32 %v9142_v24 }
 0xe3b   :  { %v8267_v16 = vpop.eup %8266 }
 0xe3c   :  { %v4990_v21 = vadd.f32 1.0, %v8267_v16  ;;  %v8269_v30 = vpop.eup %8268  ;;  %v8017_v16 = vld [vmem:[#allocation7 + $0x2c] ss:$16 sps:$4 sm:$0xff]  }
 0xe3e   :  { %8270 = vrcp.f32 %v4990_v21  ;;  %v8018_v21 = vld [vmem:[#allocation7 + $0x4c] ss:$16 sps:$4 sm:$0xff]  }
 0xe48   :  { %v8271_v33 = vpop.eup %8270 }
 0xe49   :  { %v4997_v34 = vmul.f32 %v8271_v33, %v8269_v30  ;;  %v8019_v30 = vld [vmem:[#allocation7 + $0x6c] ss:$16 sps:$4 sm:$0xff]  }
 0xe4a   :  { %v8020_v33 = vld [vmem:[#allocation7 + $0x8c] ss:$16 sps:$4 sm:$0xff]  }
 0xe4b   :  { %4999 = vst [vmem:[#allocation9 + $0x60] sm:$0xff] %v4997_v34  ;;  %v5005_v48 = vpack.c.bf16 %v4997_v34, %v4997_v34  ;;  %v8021_v34 = vld [vmem:[#allocation7 + $0xac] ss:$16 sps:$4 sm:$0xff]  }
 0xe4d   :  { %5135 = vmatmul.mubr.bf16.vlgmr.msra.gmra.mrb[76].mxu1 %v5005_v48  ;;  %7548 = vmatmul.mubr.bf16.vlgmr.msra.gmra.mrb[80].mxu0 %v5005_v48 }
 0xe4e   :  { %7552 = vmatpush3.bf16.msra.mxu1 %v8000_v36  ;;  %7567 = vmatprep.mubr.msk.bf16.mxu1 %vm8416_vm0, %v8414_v0  ;;  %v8022_v36 = vld [vmem:[#allocation7 + $0xcc] ss:$16 sps:$4 sm:$0xff]  }
 0xe4f   :  { %7553 = vmatprep.subr.bf16.mxu1 %v8414_v0  ;;  %5484 = vmatpush1.bf16.msra.mxu0 %v9045_v26  ;;  %v8004_v26 = vld [vmem:[#allocation7 + $0x8c] ss:$16 sps:$4 sm:$0xff]  }
 0xe50   :  { %5485 = vmatprep.subr.bf16.mxu0 %v9049_v14  ;;  %5515 = vmatprep.mubr.bf16.mxu0 %v8415_v1  ;;  %v8005_v14 = vld [vmem:[#allocation7 + $0xac] ss:$16 sps:$4 sm:$0xff]  }
 0xe52   :  { %7554 = vmatpush3.bf16.msra.mxu1 %v8001_v39  ;;  %v8024_v39 = vld [vmem:[#allocation7] ss:$16 sps:$4 sm:$0xff]  }
 0xe53   :  { %7555 = vmatprep.subr.bf16.mxu1 %v8414_v0  ;;  %5486 = vmatpush1.bf16.msra.mxu0 %v9051_v2  ;;  %v8006_v2 = vld [vmem:[#allocation7 + $0xcc] ss:$16 sps:$4 sm:$0xff]  }
 0xe54   :  { %5487 = vmatprep.subr.bf16.mxu0 %v9056_v43  ;;  %v8007_v43 = vld [vmem:[#allocation7 + $0xec] ss:$16 sps:$4 sm:$0xff]  }
 0xe56   :  { %7556 = vmatpush3.bf16.msra.mxu1 %v8002_v42  ;;  %v8027_v42 = vld [vmem:[#allocation7 + $0x8] ss:$16 sps:$4 sm:$0xff]  }
 0xe57   :  { %7557 = vmatprep.subr.bf16.mxu1 %v8414_v0  ;;  %5488 = vmatpush1.bf16.msra.mxu0 %v9058_v44  ;;  %v8008_v44 = vld [vmem:[#allocation7 + $0x8] ss:$16 sps:$4 sm:$0xff]  }
 0xe58   :  { %5489 = vmatprep.subr.bf16.mxu0 %v9063_v52  ;;  %v8009_v52 = vld [vmem:[#allocation7 + $0x28] ss:$16 sps:$4 sm:$0xff]  }
 0xe5a   :  { %7558 = vmatpush3.bf16.msra.mxu1 %v8003_v63  ;;  %v8030_v63 = vld [vmem:[#allocation7 + $0x24] ss:$16 sps:$4 sm:$0xff]  }
 0xe5b   :  { %7559 = vmatprep.subr.bf16.mxu1 %v8414_v0  ;;  %5490 = vmatpush1.bf16.msra.mxu0 %v9065_v56  ;;  %v8010_v56 = vld [vmem:[#allocation7 + $0x48] ss:$16 sps:$4 sm:$0xff]  }
 0xe5c   :  { %5491 = vmatprep.subr.bf16.mxu0 %v9070_v5  ;;  %v8011_v5 = vld [vmem:[#allocation7 + $0x68] ss:$16 sps:$4 sm:$0xff]  }
 0xe5e   :  { %7560 = vmatpush3.bf16.msra.mxu1 %v8004_v26  ;;  %v8028_v26 = vld [vmem:[#allocation7 + $0x20] ss:$16 sps:$4 sm:$0xff]  }
 0xe5f   :  { %7561 = vmatprep.subr.bf16.mxu1 %v8414_v0  ;;  %5492 = vmatpush1.bf16.msra.mxu0 %v9072_v7  ;;  %v8012_v7 = vld [vmem:[#allocation7 + $0x88] ss:$16 sps:$4 sm:$0xff]  }
 0xe60   :  { %5493 = vmatprep.subr.bf16.mxu0 %v9079_v20  ;;  %v8014_v20 = vld [vmem:[#allocation7 + $0xc8] ss:$16 sps:$4 sm:$0xff]  }
 0xe62   :  { %7562 = vmatpush3.bf16.msra.mxu1 %v8005_v14  ;;  %v8031_v14 = vld [vmem:[#allocation7 + $0x28] ss:$16 sps:$4 sm:$0xff]  }
 0xe63   :  { %7563 = vmatprep.subr.bf16.mxu1 %v8414_v0  ;;  %5494 = vmatpush1.bf16.msra.mxu0 %v9077_v18  ;;  %v8013_v18 = vld [vmem:[#allocation7 + $0xa8] ss:$16 sps:$4 sm:$0xff]  }
 0xe64   :  { %5495 = vmatprep.subr.bf16.mxu0 %v9082_v28  ;;  %v8015_v28 = vld [vmem:[#allocation7 + $0xe8] ss:$16 sps:$4 sm:$0xff]  }
 0xe66   :  { %7564 = vmatpush3.bf16.msra.mxu1 %v8006_v2  ;;  %v8034_v2 = vld [vmem:[#allocation7 + $0x44] ss:$16 sps:$4 sm:$0xff]  }
 0xe67   :  { %7565 = vmatprep.subr.bf16.mxu1 %v8414_v0  ;;  %5496 = vmatpush1.bf16.msra.mxu0 %v9086_v8  ;;  %v5001_v8 = vld [vmem:[#allocation4 + $0x1a0] sm:$0xff] }
 0xe68   :  { %5497 = vmatprep.subr.bf16.mxu0 %v9089_v31  ;;  %v5002_v31 = vld [vmem:[#allocation4 + $0x1a8] sm:$0xff] }
 0xe6a   :  { %7566 = vmatpush3.bf16.msra.mxu1 %v8007_v43  ;;  %v8032_v43 = vld [vmem:[#allocation7 + $0x40] ss:$16 sps:$4 sm:$0xff]  }
 0xe6b   :  { %7571 = vmatprep.subr.bf16.mxu1 %v8414_v0  ;;  %5498 = vmatpush1.bf16.msra.mxu0 %v9093_v32 }
 0xe6c   :  { %7591 = vmatprep.subr.bf16.mxu0 %v8414_v0 }
 0xe6d   :  { %7568 = vmatmul.mubr.bf16.vlgmr.msra.gmra.mrb[80].mxu1 %v5005_v48  ;;  %v8026_v48 = vld [vmem:[#allocation7 + $0x4] ss:$16 sps:$4 sm:$0xff]  }
 0xe6e   :  { %7587 = vmatprep.mubr.msk.bf16.mxu1 %vm8416_vm0, %v8414_v0  ;;  %7572 = vmatpush3.bf16.msra.mxu1 %v8008_v44  ;;  %v8035_v44 = vld [vmem:[#allocation7 + $0x48] ss:$16 sps:$4 sm:$0xff]  }
 0xe6f   :  { %7573 = vmatprep.subr.bf16.mxu1 %v8414_v0 }
 0xe72   :  { %7574 = vmatpush3.bf16.msra.mxu1 %v8009_v52  ;;  %v8038_v52 = vld [vmem:[#allocation7 + $0x64] ss:$16 sps:$4 sm:$0xff]  }
 0xe73   :  { %7575 = vmatprep.subr.bf16.mxu1 %v8414_v0 }
 0xe76   :  { %7576 = vmatpush3.bf16.msra.mxu1 %v8010_v56  ;;  %v8036_v56 = vld [vmem:[#allocation7 + $0x60] ss:$16 sps:$4 sm:$0xff]  }
 0xe77   :  { %7577 = vmatprep.subr.bf16.mxu1 %v8414_v0 }
 0xe7a   :  { %7578 = vmatpush3.bf16.msra.mxu1 %v8011_v5  ;;  %v8039_v5 = vld [vmem:[#allocation7 + $0x68] ss:$16 sps:$4 sm:$0xff]  }
 0xe7b   :  { %7579 = vmatprep.subr.bf16.mxu1 %v8414_v0 }
 0xe7e   :  { %7580 = vmatpush3.bf16.msra.mxu1 %v8012_v7  ;;  %v8042_v7 = vld [vmem:[#allocation7 + $0x84] ss:$16 sps:$4 sm:$0xff]  }
 0xe7f   :  { %7581 = vmatprep.subr.bf16.mxu1 %v8414_v0 }
 0xe82   :  { %7582 = vmatpush3.bf16.msra.mxu1 %v8013_v18  ;;  %v8040_v18 = vld [vmem:[#allocation7 + $0x80] ss:$16 sps:$4 sm:$0xff]  }
 0xe83   :  { %7583 = vmatprep.subr.bf16.mxu1 %v8414_v0 }
 0xe86   :  { %7584 = vmatpush3.bf16.msra.mxu1 %v8014_v20  ;;  %v8043_v20 = vld [vmem:[#allocation7 + $0x88] ss:$16 sps:$4 sm:$0xff]  }
 0xe87   :  { %7585 = vmatprep.subr.bf16.mxu1 %v8414_v0 }
 0xe8a   :  { %7586 = vmatpush3.bf16.msra.mxu1 %v8015_v28  ;;  %v8044_v28 = vld [vmem:[#allocation7 + $0xa0] ss:$16 sps:$4 sm:$0xff]  }
 0xe8b   :  { %5864 = vmatprep.subr.bf16.mxu1 %v8026_v48  ;;  %v8056_v48 = vld [vmem:[#allocation7 + $0xc] ss:$16 sps:$4 sm:$0xff]  }
 0xf20   :  { %v5136_v32 = vpop.f32.mrb[76].mxu1  ;;  %v5255_v45 = vpop.f32.mrb[80].mxu0 }
 0xf21   :  { %v5143_v35 = vadd.f32 %v5136_v32, %v5001_v8  ;;  %v5138_v51 = vpop.f32.mrb[77].mxu1  ;;  %v7549_v54 = vpop.f32.mrb[81].mxu0  ;;  %v5261_v62 = vadd.f32 %v5255_v45, %v5003_v46  ;;  %v8046_v8 = vld [vmem:[#allocation7 + $0xa4] ss:$16 sps:$4 sm:$0xff]   ;;  %v8048_v45 = vld [vmem:[#allocation7 + $0xc0] ss:$16 sps:$4 sm:$0xff]  }
 0xf22   :  { %v5144_v57 = vadd.f32 %v5138_v51, %v5002_v31  ;;  %v5140_v60 = vpop.f32.mrb[78].mxu1  ;;  %v5258_v61 = vpop.f32.mrb[82].mxu0  ;;  %v8047_v31 = vld [vmem:[#allocation7 + $0xa8] ss:$16 sps:$4 sm:$0xff]   ;;  %v8050_v32 = vld [vmem:[#allocation7 + $0xc4] ss:$16 sps:$4 sm:$0xff]  }
 0xf23   :  { %v6634_v27 = vmul.f32 -1.442695, %v5143_v35  ;;  %v5141_v3 = vpop.f32.mrb[79].mxu1  ;;  %v7550_v41 = vpop.f32.mrb[83].mxu0  ;;  %v8051_v35 = vld [vmem:[#allocation7 + $0xc8] ss:$16 sps:$4 sm:$0xff]  }
 0xf24   :  { %v6635_v13 = vmul.f32 -1.442695, %v5144_v57  ;;  %v8054_v51 = vld [vmem:[#allocation7 + $0xe4] ss:$16 sps:$4 sm:$0xff]   ;;  %v8052_v54 = vld [vmem:[#allocation7 + $0xe0] ss:$16 sps:$4 sm:$0xff]  }
 0xf25   :  { %8272 = vpow2.f32 %v6634_v27  ;;  %v8055_v57 = vld [vmem:[#allocation7 + $0xe8] ss:$16 sps:$4 sm:$0xff]   ;;  %v5382_v60 = vld [vmem:[#allocation4 + $0x1c0] sm:$0xff] }
 0xf26   :  { %8274 = vpow2.f32 %v6635_v13  ;;  %v5383_v61 = vld [vmem:[#allocation4 + $0x1c8] sm:$0xff] }
 0xf27   :  { %8276 = vtanh.f32 %v5261_v62 }
 0xf2f   :  { %v8273_v55 = vpop.eup %8272 }
 0xf30   :  { %v8275_v59 = vpop.eup %8274  ;;  %v5151_v6 = vadd.f32 1.0, %v8273_v55 }
 0xf31   :  { %v5152_v10 = vadd.f32 1.0, %v8275_v59  ;;  %v8277_v11 = vpop.eup %8276 }
 0xf32   :  { %8278 = vrcp.f32 %v5151_v6 }
 0xf33   :  { %8280 = vrcp.f32 %v5152_v10 }
 0xf3c   :  { %v8279_v17 = vpop.eup %8278 }
 0xf3d   :  { %v8281_v15 = vpop.eup %8280  ;;  %v5375_v40 = vmul.f32 %v8279_v17, %v8277_v11 }
 0xf3e   :  { %v5374_v25 = vmul.f32 %v8281_v15, %v9142_v24  ;;  %v5384_v15 = vld [vmem:[#allocation4 + $0x1d0] sm:$0xff] }
 0xf40   :  { %v9182_v53 = vadd.f32 %v5375_v40, %v5374_v25  ;;  %v5361_v12 = vpop.f32.mrb[80].mxu1 }
 0xf41   :  { %v5367_v4 = vadd.f32 %v5361_v12, %v5004_v47  ;;  %v7569_v9 = vpop.f32.mrb[81].mxu1 }
 0xf42   :  { %v5364_v19 = vpop.f32.mrb[82].mxu1 }
 0xf43   :  { %v6652_v22 = vmul.f32 -1.442695, %v5367_v4  ;;  %v7570_v23 = vpop.f32.mrb[83].mxu1 }
 0xf45   :  { %8282 = vpow2.f32 %v6652_v22 }
 0xf46   :  { %8284 = vtanh.f32 %v9182_v53 }
 0xf4f   :  { %v8283_v29 = vpop.eup %8282 }
 0xf50   :  { %v5371_v37 = vadd.f32 1.0, %v8283_v29  ;;  %v8285_v38 = vpop.eup %8284 }
 0xf52   :  { %8286 = vrcp.f32 %v5371_v37  ;;  %v5385_v37 = vld [vmem:[#allocation4 + $0x1d8] sm:$0xff] }
 0xf5c   :  { %v8287_v50 = vpop.eup %8286 }
 0xf5d   :  { %v5378_v49 = vmul.f32 %v8287_v50, %v8285_v38 }
 0xf5f   :  { %5380 = vst [vmem:[#allocation9 + $0x68] sm:$0xff] %v5378_v49  ;;  %v5386_v24 = vpack.c.bf16 %v5378_v49, %v5378_v49 }
 0xf61   :  { %5516 = vmatmul.mubr.bf16.vlgmr.msra.gmra.mrb[84].mxu0 %v5386_v24  ;;  %7588 = vmatmul.mubr.bf16.vlgmr.msra.gmra.mrb[84].mxu1 %v5386_v24 }
 0xf62   :  { %7592 = vmatpush3.bf16.msra.mxu0 %v8016_v58  ;;  %7607 = vmatprep.mubr.msk.bf16.mxu0 %vm8416_vm0, %v8414_v0 }
 0xf63   :  { %7593 = vmatprep.subr.bf16.mxu0 %v8414_v0  ;;  %5896 = vmatprep.mubr.bf16.mxu1 %v8415_v1  ;;  %v8023_v1 = vld [vmem:[#allocation7 + $0xec] ss:$16 sps:$4 sm:$0xff]  }
 0xf64   :  { %5865 = vmatpush1.bf16.msra.mxu1 %v8024_v39  ;;  %v8057_v39 = vld [vmem:[#allocation7 + $0x2c] ss:$16 sps:$4 sm:$0xff]  }
 0xf65   :  { %5866 = vmatprep.subr.bf16.mxu1 %v8030_v63  ;;  %v8059_v63 = vld [vmem:[#allocation7 + $0x6c] ss:$16 sps:$4 sm:$0xff]  }
 0xf66   :  { %7594 = vmatpush3.bf16.msra.mxu0 %v8017_v16 }
 0xf67   :  { %7595 = vmatprep.subr.bf16.mxu0 %v8414_v0 }
 0xf68   :  { %5867 = vmatpush1.bf16.msra.mxu1 %v8028_v26  ;;  %v8060_v26 = vld [vmem:[#allocation7 + $0x8c] ss:$16 sps:$4 sm:$0xff]  }
 0xf69   :  { %5868 = vmatprep.subr.bf16.mxu1 %v8034_v2  ;;  %v8062_v2 = vld [vmem:[#allocation7 + $0xcc] ss:$16 sps:$4 sm:$0xff]  }
 0xf6a   :  { %7596 = vmatpush3.bf16.msra.mxu0 %v8018_v21 }
 0xf6b   :  { %7597 = vmatprep.subr.bf16.mxu0 %v8414_v0 }
 0xf6c   :  { %5869 = vmatpush1.bf16.msra.mxu1 %v8032_v43  ;;  %v8063_v43 = vld [vmem:[#allocation7 + $0xec] ss:$16 sps:$4 sm:$0xff]  }
 0xf6d   :  { %5870 = vmatprep.subr.bf16.mxu1 %v8038_v52  ;;  %v5764_v52 = vld [vmem:[#allocation4 + $0x1e8] sm:$0xff] }
 0xf6e   :  { %7598 = vmatpush3.bf16.msra.mxu0 %v8019_v30 }
 0xf6f   :  { %7599 = vmatprep.subr.bf16.mxu0 %v8414_v0 }
 0xf70   :  { %5871 = vmatpush1.bf16.msra.mxu1 %v8036_v56 }
 0xf71   :  { %5872 = vmatprep.subr.bf16.mxu1 %v8042_v7 }
 0xf72   :  { %7600 = vmatpush3.bf16.msra.mxu0 %v8020_v33 }
 0xf73   :  { %7601 = vmatprep.subr.bf16.mxu0 %v8414_v0 }
 0xf74   :  { %5873 = vmatpush1.bf16.msra.mxu1 %v8040_v18 }
 0xf75   :  { %5874 = vmatprep.subr.bf16.mxu1 %v8046_v8 }
 0xf76   :  { %7602 = vmatpush3.bf16.msra.mxu0 %v8021_v34 }
 0xf77   :  { %7603 = vmatprep.subr.bf16.mxu0 %v8414_v0 }
 0xf78   :  { %5875 = vmatpush1.bf16.msra.mxu1 %v8044_v28 }
 0xf79   :  { %5876 = vmatprep.subr.bf16.mxu1 %v8050_v32 }
 0xf7a   :  { %7604 = vmatpush3.bf16.msra.mxu0 %v8022_v36 }
 0xf7b   :  { %7605 = vmatprep.subr.bf16.mxu0 %v8414_v0 }
 0xf7c   :  { %5877 = vmatpush1.bf16.msra.mxu1 %v8048_v45 }
 0xf7d   :  { %5878 = vmatprep.subr.bf16.mxu1 %v8054_v51 }
 0xf7e   :  { %7606 = vmatpush3.bf16.msra.mxu0 %v8023_v1 }
 0xf7f   :  { %7611 = vmatprep.subr.bf16.mxu0 %v8414_v0 }
 0xf80   :  { %5879 = vmatpush1.bf16.msra.mxu1 %v8052_v54  ;;  %v5765_v54 = vld [vmem:[#allocation4 + $0x1f0] sm:$0xff] }
 0xf81   :  { %7608 = vmatmul.mubr.bf16.vlgmr.msra.gmra.mrb[88].mxu0 %v5386_v24  ;;  %7631 = vmatprep.subr.bf16.mxu1 %v8414_v0 }
 0xf82   :  { %7627 = vmatprep.mubr.msk.bf16.mxu0 %vm8416_vm0, %v8414_v0  ;;  %7612 = vmatpush3.bf16.msra.mxu0 %v8027_v42  ;;  %v8058_v42 = vld [vmem:[#allocation7 + $0x4c] ss:$16 sps:$4 sm:$0xff]  }
 0xf83   :  { %7613 = vmatprep.subr.bf16.mxu0 %v8414_v0 }
 0xf86   :  { %7614 = vmatpush3.bf16.msra.mxu0 %v8031_v14  ;;  %v8061_v14 = vld [vmem:[#allocation7 + $0xac] ss:$16 sps:$4 sm:$0xff]  }
 0xf87   :  { %7615 = vmatprep.subr.bf16.mxu0 %v8414_v0 }
 0xf8a   :  { %7616 = vmatpush3.bf16.msra.mxu0 %v8035_v44  ;;  %v5763_v44 = vld [vmem:[#allocation4 + $0x1e0] sm:$0xff] }
 0xf8b   :  { %7617 = vmatprep.subr.bf16.mxu0 %v8414_v0 }
 0xf8e   :  { %7618 = vmatpush3.bf16.msra.mxu0 %v8039_v5 }
 0xf8f   :  { %7619 = vmatprep.subr.bf16.mxu0 %v8414_v0 }
 0xf92   :  { %7620 = vmatpush3.bf16.msra.mxu0 %v8043_v20 }
 0xf93   :  { %7621 = vmatprep.subr.bf16.mxu0 %v8414_v0 }
 0xf96   :  { %7622 = vmatpush3.bf16.msra.mxu0 %v8047_v31 }
 0xf97   :  { %7623 = vmatprep.subr.bf16.mxu0 %v8414_v0 }
 0xf9a   :  { %7624 = vmatpush3.bf16.msra.mxu0 %v8051_v35 }
 0xf9b   :  { %7625 = vmatprep.subr.bf16.mxu0 %v8414_v0 }
 0xf9e   :  { %7626 = vmatpush3.bf16.msra.mxu0 %v8055_v57 }
0x1034   :  { %v5517_v27 = vpop.f32.mrb[84].mxu0  ;;  %v5636_v3 = vpop.f32.mrb[84].mxu1 }
0x1035   :  { %v5524_v41 = vadd.f32 %v5517_v27, %v5382_v60  ;;  %v5519_v13 = vpop.f32.mrb[85].mxu0  ;;  %v7589_v46 = vpop.f32.mrb[85].mxu1  ;;  %v5642_v40 = vadd.f32 %v5636_v3, %v5384_v15 }
0x1036   :  { %v5525_v62 = vadd.f32 %v5519_v13, %v5383_v61  ;;  %v5521_v55 = vpop.f32.mrb[86].mxu0  ;;  %v5639_v59 = vpop.f32.mrb[86].mxu1 }
0x1037   :  { %v6669_v6 = vmul.f32 -1.442695, %v5524_v41  ;;  %v5522_v10 = vpop.f32.mrb[87].mxu0  ;;  %v7590_v11 = vpop.f32.mrb[87].mxu1  ;;  %v5766_v55 = vld [vmem:[#allocation4 + $0x1f8] sm:$0xff] }
0x1038   :  { %v6670_v17 = vmul.f32 -1.442695, %v5525_v62 }
0x1039   :  { %8288 = vpow2.f32 %v6669_v6 }
0x103a   :  { %8290 = vpow2.f32 %v6670_v17 }
0x103b   :  { %8292 = vtanh.f32 %v5642_v40 }
0x1043   :  { %v8289_v25 = vpop.eup %8288 }
0x1044   :  { %v8291_v47 = vpop.eup %8290  ;;  %v5532_v12 = vadd.f32 1.0, %v8289_v25 }
0x1045   :  { %v5533_v4 = vadd.f32 1.0, %v8291_v47  ;;  %v8293_v9 = vpop.eup %8292 }
0x1046   :  { %8294 = vrcp.f32 %v5532_v12 }
0x1047   :  { %8296 = vrcp.f32 %v5533_v4 }
0x1050   :  { %v8295_v19 = vpop.eup %8294 }
0x1051   :  { %v8297_v22 = vpop.eup %8296  ;;  %v5756_v23 = vmul.f32 %v8295_v19, %v8293_v9 }
0x1052   :  { %v5755_v29 = vmul.f32 %v8297_v22, %v9182_v53 }
0x1054   :  { %v9207_v38 = vadd.f32 %v5756_v23, %v5755_v29  ;;  %v5742_v50 = vpop.f32.mrb[88].mxu0 }
0x1055   :  { %v5748_v49 = vadd.f32 %v5742_v50, %v5385_v37  ;;  %v7609_v58 = vpop.f32.mrb[89].mxu0 }
0x1056   :  { %v5745_v24 = vpop.f32.mrb[90].mxu0 }
0x1057   :  { %v6687_v16 = vmul.f32 -1.442695, %v5748_v49  ;;  %v7610_v21 = vpop.f32.mrb[91].mxu0 }
0x1059   :  { %8298 = vpow2.f32 %v6687_v16 }
0x105a   :  { %8300 = vtanh.f32 %v9207_v38 }
0x1063   :  { %v8299_v30 = vpop.eup %8298 }
0x1064   :  { %v5752_v33 = vadd.f32 1.0, %v8299_v30  ;;  %v8301_v34 = vpop.eup %8300 }
0x1066   :  { %8302 = vrcp.f32 %v5752_v33 }
0x1070   :  { %v8303_v36 = vpop.eup %8302 }
0x1071   :  { %v5759_v1 = vmul.f32 %v8303_v36, %v8301_v34 }
0x1073   :  { %5761 = vst [vmem:[#allocation9 + $0x70] sm:$0xff] %v5759_v1  ;;  %v5767_v53 = vpack.c.bf16 %v5759_v1, %v5759_v1 }
0x1075   :  { %5897 = vmatmul.mubr.bf16.vlgmr.msra.gmra.mrb[88].mxu1 %v5767_v53  ;;  %7628 = vmatmul.mubr.bf16.vlgmr.msra.gmra.mrb[92].mxu0 %v5767_v53 }
0x1076   :  { %7632 = vmatpush3.bf16.msra.mxu1 %v8056_v48  ;;  %7647 = vmatprep.mubr.msk.bf16.mxu1 %vm8416_vm0, %v8414_v0 }
0x1077   :  { %7633 = vmatprep.subr.bf16.mxu1 %v8414_v0 }
0x107a   :  { %7634 = vmatpush3.bf16.msra.mxu1 %v8057_v39 }
0x107b   :  { %7635 = vmatprep.subr.bf16.mxu1 %v8414_v0 }
0x107e   :  { %7636 = vmatpush3.bf16.msra.mxu1 %v8058_v42 }
0x107f   :  { %7637 = vmatprep.subr.bf16.mxu1 %v8414_v0 }
0x1082   :  { %7638 = vmatpush3.bf16.msra.mxu1 %v8059_v63 }
0x1083   :  { %7639 = vmatprep.subr.bf16.mxu1 %v8414_v0 }
0x1086   :  { %7640 = vmatpush3.bf16.msra.mxu1 %v8060_v26 }
0x1087   :  { %7641 = vmatprep.subr.bf16.mxu1 %v8414_v0 }
0x108a   :  { %7642 = vmatpush3.bf16.msra.mxu1 %v8061_v14 }
0x108b   :  { %7643 = vmatprep.subr.bf16.mxu1 %v8414_v0 }
0x108e   :  { %7644 = vmatpush3.bf16.msra.mxu1 %v8062_v2 }
0x108f   :  { %7645 = vmatprep.subr.bf16.mxu1 %v8414_v0 }
0x1092   :  { %7646 = vmatpush3.bf16.msra.mxu1 %v8063_v43 }
0x1095   :  { %7648 = vmatmul.mubr.bf16.vlgmr.msra.gmra.mrb[92].mxu1 %v5767_v53 }
0x1148   :  { %v5898_v56 = vpop.f32.mrb[88].mxu1  ;;  %v6017_v5 = vpop.f32.mrb[92].mxu0 }
0x1149   :  { %v5905_v7 = vadd.f32 %v5898_v56, %v5763_v44  ;;  %v5900_v18 = vpop.f32.mrb[89].mxu1  ;;  %v7629_v20 = vpop.f32.mrb[93].mxu0  ;;  %v6023_v0 = vadd.f32 %v6017_v5, %v5765_v54 }
0x114a   :  { %v5906_v28 = vadd.f32 %v5900_v18, %v5764_v52  ;;  %v5902_v8 = vpop.f32.mrb[90].mxu1  ;;  %v6020_v31 = vpop.f32.mrb[94].mxu0 }
0x114b   :  { %v6704_v32 = vmul.f32 -1.442695, %v5905_v7  ;;  %v5903_v45 = vpop.f32.mrb[91].mxu1  ;;  %v7630_v35 = vpop.f32.mrb[95].mxu0 }
0x114c   :  { %v6705_v51 = vmul.f32 -1.442695, %v5906_v28 }
0x114d   :  { %8304 = vpow2.f32 %v6704_v32 }
0x114e   :  { %8306 = vpow2.f32 %v6705_v51 }
0x114f   :  { %8308 = vtanh.f32 %v6023_v0 }
0x1157   :  { %v8305_v57 = vpop.eup %8304 }
0x1158   :  { %v8307_v60 = vpop.eup %8306  ;;  %v5913_v61 = vadd.f32 1.0, %v8305_v57 }
0x1159   :  { %v5914_v27 = vadd.f32 1.0, %v8307_v60  ;;  %v8309_v3 = vpop.eup %8308 }
0x115a   :  { %8310 = vrcp.f32 %v5913_v61 }
0x115b   :  { %8312 = vrcp.f32 %v5914_v27 }
0x1164   :  { %v8311_v41 = vpop.eup %8310 }
0x1165   :  { %v8313_v13 = vpop.eup %8312  ;;  %v6137_v46 = vmul.f32 %v8311_v41, %v8309_v3 }
0x1166   :  { %v6136_v62 = vmul.f32 %v8313_v13, %v9207_v38 }
0x1168   :  { %v6138_v59 = vadd.f32 %v6137_v46, %v6136_v62  ;;  %v6123_v6 = vpop.f32.mrb[92].mxu1 }
0x1169   :  { %v6129_v10 = vadd.f32 %v6123_v6, %v5766_v55  ;;  %v7649_v11 = vpop.f32.mrb[93].mxu1 }
0x116a   :  { %v6126_v17 = vpop.f32.mrb[94].mxu1 }
0x116b   :  { %v6722_v15 = vmul.f32 -1.442695, %v6129_v10  ;;  %v7650_v40 = vpop.f32.mrb[95].mxu1 }
0x116d   :  { %8314 = vpow2.f32 %v6722_v15 }
0x116e   :  { %8316 = vtanh.f32 %v6138_v59 }
0x1177   :  { %v8315_v25 = vpop.eup %8314 }
0x1178   :  { %v6133_v47 = vadd.f32 1.0, %v8315_v25  ;;  %v8317_v12 = vpop.eup %8316 }
0x117a   :  { %8318 = vrcp.f32 %v6133_v47 }
0x1184   :  { %v8319_v4 = vpop.eup %8318 }
0x1185   :  { %v6140_v9 = vmul.f32 %v8319_v4, %v8317_v12 }
0x1187   :  { %6142 = vst [vmem:[#allocation9 + $0x78] sm:$0xff] %v6140_v9 }
0x1188   :  { %8391 = shalt.err (!%p8388_p6)
}
0x1189   :  { %s8392_s12 = scalar_lea.hbm %s9234_s2, 2048 }
0x118a   :  { %p8393_p7 = scmp.ne.s32.totalorder %s9234_s2, %s8392_s12  ;;  %p8396_p8 = scmp.lt.u32.totalorder %s8392_s12, %s9234_s2 }
0x118c   :  { %p8398_p9 = pnand %p8396_p8, %p8393_p7 }
0x118e   :  { %8401 = shalt.err (!%p8398_p9)
}
0x118f   :  { %s8419_s17 = smov 128   ;;  %s8420_s18 = smov 8  }
0x1190   :  { %6156 = dma.vmem_to_hbm [thread:$0]  %s6151_s8, 2048, %s9234_s2, [#allocation6], %s8419_s17, %s8419_s17, %s8420_s18  }
0x1191   :  { %8406 = dma.done.wait [#allocation6], 2048  }
0x1192   :  { %8407 = vsyncadd [#allocation6], 4294965248 }
0x1193   :  { %6160 = vsyncpa [#allocation5], 1 }
0x1194   :  { %6161 = vsyncpa [#allocation8], 1 }
0x1195   :  { %6162 = vsyncpa [#allocation6], 1 }

</bundles_post_ra>
